<compile_context>
chip_gen: v6e
topology: v6e:2x2x1
jax: 0.10.0
libtpu: 0.0.40
codegen_flags: <defaults>
</compile_context>

<pallas_src>
import numpy as np
import jax
import jax.numpy as jnp
from jax.experimental import pallas as pl
from jax.experimental.pallas import tpu as pltpu

MAX_OBJ_NUM = 294
MAX_ATTRIBUTE_NUM = 2
MAX_CONCEPT_NUM = 4
NPAD = 384  # 294 objects padded up to a multiple of 128 lanes

CONCEPT2ID = {0: {'trans_white': 0, 'red': 1, 'black': 2, 'white': 3},
              1: {'irregularity': 0, 'square': 1}}

# Static operator program (the `op_lists_clip` argument of Reasoning.forward).
# Each entry is (op, param); 'and'/'or' params index into the buffer list,
# exactly as in the PyTorch interpreter loop.
OP_LIST = (
    ('objects', None),          # b0 = ones over objects
    ('filter_name', 'red'),     # b1 = b0 * concept_matrix[0, red]
    ('obj_attibute', (1, 1)),   # b2 = b1 * concept_matrix[1, square]
    ('and', 0),                 # b3 = min(b2, b0)
    ('filter_name', 'black'),   # b4 = b3 * concept_matrix[0, black]
    ('or', 2),                  # b5 = max(b4, b2)
    ('and', 3),                 # b6 = min(b5, b3)
    ('count', None),            # b7 = sum(b6)   -> answer (one scalar per example)
)


def _compute_last_use(op_list):
    """Trace-time liveness: last step at which each buffer index is referenced."""
    last = {}
    for i, (op, param) in enumerate(op_list):
        if op != 'objects' and i > 0:
            last[i - 1] = i                        # every non-'objects' op reads buffer[-1]
        if op in ('and', 'or', 'intersect', 'union'):
            last[param] = i
    return last


def make_reasoning_kernel(op_list, blk):
    last_use = _compute_last_use(op_list)

    def kernel(packed_ref, out_ref):
        packed = packed_ref[...]                      # (blk, 8, NPAD) f32, objects on lanes
        cl = packed[:, 0:4, :]                        # (blk, 4, NPAD) colour logits
        s0 = packed[:, 4, :]                          # (blk, NPAD) shape logit 'irregularity'
        s1 = packed[:, 5, :]                          # (blk, NPAD) shape logit 'square'

        # Validity mask generated in-kernel (1.0 for real objects, 0.0 for pad lanes).
        # Every buffer chains multiplicatively / via min,max of non-negatives from
        # b0 = valid, so pad lanes stay exactly zero with no extra masking.
        obj_idx = jax.lax.broadcasted_iota(jnp.int32, (1, NPAD), 1)
        valid = jnp.broadcast_to(
            jnp.where(obj_idx < MAX_OBJ_NUM, 1.0, 0.0).astype(jnp.float32), (blk, NPAD))

        # Colour concept rows: shared 4-class softmax denominator, divide only the
        # rows the op list actually references.
        m = jnp.max(cl, axis=1, keepdims=True)        # (blk, 1, NPAD)
        e = jnp.exp(cl - m)                           # (blk, 4, NPAD)
        inv_den = pl.reciprocal(jnp.sum(e, axis=1), approx=False)   # (blk, NPAD)

        def get_concept_mask(attr, cidx):
            # Static attribute / concept index -> (blk, NPAD) concept-matrix row.
            if attr == 0:
                return e[:, cidx, :] * inv_den
            # Shape attribute: 2-class softmax == sigmoid of the logit difference.
            if cidx == 0:
                return jax.nn.sigmoid(s0 - s1)
            if cidx == 1:
                return jax.nn.sigmoid(s1 - s0)
            return jnp.zeros((blk, NPAD), jnp.float32)   # unused shape concepts 2,3

        buffer = []
        for i, (op, param) in enumerate(op_list):
            if op == 'objects':
                buffer.append(valid)
            elif op == 'filter_nearest_obj':
                buffer.append(buffer[-1] * 1.0)
            elif op == 'filter_name':
                cidx = CONCEPT2ID[0][param] if isinstance(param, str) else param
                buffer.append(buffer[-1] * get_concept_mask(0, cidx))
            elif op == 'obj_attibute':
                buffer.append(buffer[-1] * get_concept_mask(param[0], param[1]))
            elif op == 'filter_index':
                sel = jnp.where(obj_idx == param, 1.0, 0.0).astype(jnp.float32)
                buffer.append(buffer[-1] * sel)
            elif op in ('and', 'intersect'):
                buffer.append(jnp.minimum(buffer[-1], buffer[param]))
            elif op in ('or', 'union'):
                buffer.append(jnp.maximum(buffer[-1], buffer[param]))
            elif op == 'attribute_combin':
                c_bin = jax.nn.sigmoid((get_concept_mask(0, param[0]) - 0.5) * 100.0)
                s_bin = jax.nn.sigmoid((get_concept_mask(1, param[1]) - 0.5) * 100.0)
                buffer.append(jnp.sum(buffer[-1] * c_bin * s_bin, axis=-1, keepdims=True))
            elif op == 'count':
                buffer.append(jnp.sum(buffer[-1], axis=-1, keepdims=True))
            elif op == 'exist':
                buffer.append(jnp.max(buffer[-1], axis=-1, keepdims=True))
            else:
                raise ValueError(f'[!!!ERROR!!!] operator not exist: {op}')
            # Trace-time liveness pruning: drop buffers never referenced again so the
            # live set stays ~3 (blk, NPAD) arrays regardless of program length.
            for j in range(i):
                if buffer[j] is not None and last_use.get(j, -1) <= i:
                    buffer[j] = None

        answer = buffer[-1]
        assert answer.shape == (blk, 1), 'program must end with a scalar-per-example op'
        # Lane-dense output row per example; consumer reads column 0 outside the jit.
        out_ref[...] = jnp.broadcast_to(answer.astype(jnp.float32), (blk, 128))

    return kernel


def _pick_block(batch):
    # Largest block that divides the batch, multiple of 8 (sublane-aligned output),
    # capped at 256 (3 MiB input block, double-buffered 6 MiB -> safe on v7x VMEM).
    for blk in (256, 128, 64, 32, 16, 8):
        if batch % blk == 0:
            return blk
    return batch  # fallback: single block equal to full batch dim


@jax.jit
def reasoning_forward(packed):
    """packed: (B, 8, NPAD) f32 — rows 0-3 colour logits, 4-5 shape logits, 6-7 zero;
    objects on lanes (padded to NPAD). Returns (B, 128); answer per example in col 0."""
    batch = packed.shape[0]
    blk = _pick_block(batch)
    grid = (batch // blk,)

    return pl.pallas_call(
        make_reasoning_kernel(OP_LIST, blk),
        out_shape=jax.ShapeDtypeStruct((batch, 128), jnp.float32),
        grid_spec=pltpu.PrefetchScalarGridSpec(
            num_scalar_prefetch=0,
            grid=grid,
            in_specs=[pl.BlockSpec((blk, 8, NPAD), lambda b: (b, 0, 0))],
            out_specs=pl.BlockSpec((blk, 128), lambda b: (b, 0))),
        compiler_params=pltpu.CompilerParams(
            dimension_semantics=("parallel",)),   # shards batch across 2 TCs on v7x
    )(packed)


def pack_classifier_logits(colour_logits, shape_logits):
    """Stand-in for Predicator.attributes_classify: emit logits already in kernel
    layout (classes x objects, lane-padded). One-time data prep outside the jitted
    hot path, so the jit contains nothing but the pallas_call."""
    B = colour_logits.shape[0]
    packed = np.zeros((B, 8, NPAD), np.float32)
    packed[:, 0:4, :MAX_OBJ_NUM] = np.transpose(np.asarray(colour_logits), (0, 2, 1))
    packed[:, 4:6, :MAX_OBJ_NUM] = np.transpose(np.asarray(shape_logits), (0, 2, 1))
    return jnp.asarray(packed)


def reference_forward(colour_logits, shape_logits):
    """Pure-JAX batched reference mirroring the PyTorch Executor / Reasoning semantics."""
    B = colour_logits.shape[0]
    cm_colour = jnp.transpose(jax.nn.softmax(colour_logits, axis=-1), (0, 2, 1))   # (B,4,294)
    cm_shape = jnp.concatenate(
        [jnp.transpose(jax.nn.softmax(shape_logits, axis=-1), (0, 2, 1)),
         jnp.zeros((B, 2, MAX_OBJ_NUM), jnp.float32)], axis=1)                      # (B,4,294)
    cm = (cm_colour, cm_shape)

    buffer = []
    for op, param in OP_LIST:
        if op == 'objects':
            buffer.append(jnp.ones((B, MAX_OBJ_NUM), jnp.float32))
        elif op == 'filter_nearest_obj':
            buffer.append(buffer[-1] * 1.0)
        elif op == 'filter_name':
            cidx = CONCEPT2ID[0][param] if isinstance(param, str) else param
            buffer.append(buffer[-1] * cm[0][:, cidx, :])
        elif op == 'obj_attibute':
            buffer.append(buffer[-1] * cm[param[0]][:, param[1], :])
        elif op == 'filter_index':
            buffer.append(buffer[-1] * jnp.zeros(MAX_OBJ_NUM).at[param].set(1.0))
        elif op in ('and', 'intersect'):
            buffer.append(jnp.minimum(buffer[-1], buffer[param]))
        elif op in ('or', 'union'):
            buffer.append(jnp.maximum(buffer[-1], buffer[param]))
        elif op == 'attribute_combin':
            c_bin = jax.nn.sigmoid((cm[0][:, param[0], :] - 0.5) * 100.0)
            s_bin = jax.nn.sigmoid((cm[1][:, param[1], :] - 0.5) * 100.0)
            buffer.append(jnp.sum(buffer[-1] * c_bin * s_bin, axis=-1))
        elif op == 'count':
            buffer.append(jnp.sum(buffer[-1], axis=-1))
        elif op == 'exist':
            buffer.append(jnp.max(buffer[-1], axis=-1))
        else:
            raise ValueError(op)
    return buffer[-1]   # (B,)


if __name__ == "__main__":
    BATCH = 32
    key = jax.random.PRNGKey(0)
    k1, k2 = jax.random.split(key)
    # Deterministic synthetic classifier logits (stand-in for OnClassify_v3 outputs).
    colour_logits = jax.random.normal(k1, (BATCH, MAX_OBJ_NUM, 4), jnp.float32)
    shape_logits = jax.random.normal(k2, (BATCH, MAX_OBJ_NUM, 2), jnp.float32)

    packed = pack_classifier_logits(colour_logits, shape_logits)

    out = reasoning_forward(packed)
    jax.block_until_ready(out)
    answers = np.asarray(out)[:, 0]          # consumer-side scalar extraction

    ref = np.asarray(reference_forward(colour_logits, shape_logits))
    np.testing.assert_allclose(answers, ref, rtol=1e-4, atol=1e-4)

    print("KERNEL_OK")
</pallas_src>

<mosaic_0001>
module attributes {stable_mosaic.version = 11 : i64} {
  func.func @kernel(%arg0: i32, %arg1: memref<32x8x384xf32, #tpu.memory_space<vmem>>, %arg2: memref<32x128xf32, #tpu.memory_space<vmem>>) attributes {dimension_semantics = [#tpu.dimension_semantics<parallel>], iteration_bounds = array<i64: 1>, scalar_prefetch = 0 : i64, scratch_operands = 0 : i64, tpu.core_type = #tpu.core_type<tc>, window_params = [{transform_indices = @transform_0, window_bounds = array<i64: 32, 8, 384>}, {transform_indices = @transform_1, window_bounds = array<i64: 32, 128>}]} {
    %c0 = arith.constant 0 : index
    %c0_0 = arith.constant 0 : index
    %c0_1 = arith.constant 0 : index
    %0 = vector.load %arg1[%c0, %c0_0, %c0_1] : memref<32x8x384xf32, #tpu.memory_space<vmem>>, vector<32x8x384xf32>
    %1 = vector.extract_strided_slice %0 {offsets = [0, 0, 0], sizes = [32, 4, 384], strides = [1, 1, 1]} : vector<32x8x384xf32> to vector<32x4x384xf32>
    %2 = vector.extract_strided_slice %0 {offsets = [0, 4, 0], sizes = [32, 1, 384], strides = [1, 1, 1]} : vector<32x8x384xf32> to vector<32x1x384xf32>
    %3 = vector.shape_cast %2 : vector<32x1x384xf32> to vector<32x384xf32>
    %4 = vector.extract_strided_slice %0 {offsets = [0, 5, 0], sizes = [32, 1, 384], strides = [1, 1, 1]} : vector<32x8x384xf32> to vector<32x1x384xf32>
    %5 = vector.shape_cast %4 : vector<32x1x384xf32> to vector<32x384xf32>
    %6 = tpu.iota {dimensions = array<i32: 1>} : vector<1x384xi32>
    %c294_i32 = arith.constant 294 : i32
    %7 = vector.broadcast %c294_i32 : i32 to vector<1x384xi32>
    %8 = arith.cmpi slt, %6, %7 : vector<1x384xi32>
    %cst = arith.constant 1.000000e+00 : f32
    %cst_2 = arith.constant 0.000000e+00 : f32
    %9 = vector.broadcast %cst : f32 to vector<1x384xf32>
    %10 = vector.broadcast %cst_2 : f32 to vector<1x384xf32>
    %11 = arith.select %8, %9, %10 : vector<1x384xi1>, vector<1x384xf32>
    %12 = vector.shape_cast %11 : vector<1x384xf32> to vector<1x384xf32>
    %13 = vector.broadcast %12 : vector<1x384xf32> to vector<32x384xf32>
    %cst_3 = arith.constant dense<0xFF800000> : vector<32x384xf32>
    %14 = vector.multi_reduction <maximumf>, %1, %cst_3 [1] : vector<32x4x384xf32> to vector<32x384xf32>
    %15 = vector.shape_cast %14 : vector<32x384xf32> to vector<32x1x384xf32>
    %16 = vector.broadcast %15 : vector<32x1x384xf32> to vector<32x4x384xf32>
    %17 = arith.subf %1, %16 : vector<32x4x384xf32>
    %18 = math.exp %17 : vector<32x4x384xf32>
    %cst_4 = arith.constant dense<0.000000e+00> : vector<32x384xf32>
    %19 = vector.multi_reduction <add>, %18, %cst_4 [1] : vector<32x4x384xf32> to vector<32x384xf32>
    %20 = tpu.reciprocal %19 : vector<32x384xf32> -> vector<32x384xf32>
    %21 = vector.extract_strided_slice %18 {offsets = [0, 1, 0], sizes = [32, 1, 384], strides = [1, 1, 1]} : vector<32x4x384xf32> to vector<32x1x384xf32>
    %22 = vector.shape_cast %21 : vector<32x1x384xf32> to vector<32x384xf32>
    %23 = arith.mulf %22, %20 : vector<32x384xf32>
    %24 = arith.mulf %13, %23 : vector<32x384xf32>
    %25 = arith.subf %5, %3 : vector<32x384xf32>
    %26 = arith.negf %25 : vector<32x384xf32>
    %27 = math.exp %26 : vector<32x384xf32>
    %cst_5 = arith.constant 1.000000e+00 : f32
    %28 = vector.broadcast %cst_5 : f32 to vector<32x384xf32>
    %29 = arith.addf %28, %27 : vector<32x384xf32>
    %30 = arith.divf %28, %29 : vector<32x384xf32>
    %31 = arith.mulf %24, %30 : vector<32x384xf32>
    %32 = arith.minimumf %31, %13 : vector<32x384xf32>
    %33 = vector.extract_strided_slice %18 {offsets = [0, 2, 0], sizes = [32, 1, 384], strides = [1, 1, 1]} : vector<32x4x384xf32> to vector<32x1x384xf32>
    %34 = vector.shape_cast %33 : vector<32x1x384xf32> to vector<32x384xf32>
    %35 = arith.mulf %34, %20 : vector<32x384xf32>
    %36 = arith.mulf %32, %35 : vector<32x384xf32>
    %37 = arith.maximumf %36, %31 : vector<32x384xf32>
    %38 = arith.minimumf %37, %32 : vector<32x384xf32>
    %cst_6 = arith.constant dense<0.000000e+00> : vector<32xf32>
    %39 = vector.multi_reduction <add>, %38, %cst_6 [1] : vector<32x384xf32> to vector<32xf32>
    %40 = vector.shape_cast %39 : vector<32xf32> to vector<32x1xf32>
    %41 = vector.shape_cast %40 : vector<32x1xf32> to vector<32x1xf32>
    %42 = vector.broadcast %41 : vector<32x1xf32> to vector<32x128xf32>
    %c0_7 = arith.constant 0 : index
    %c0_8 = arith.constant 0 : index
    %43 = vector.load %arg2[%c0_7, %c0_8] : memref<32x128xf32, #tpu.memory_space<vmem>>, vector<32x128xf32>
    tpu.vector_store %arg2[%c0_7, %c0_8], %42 {strides = array<i32>} : memref<32x128xf32, #tpu.memory_space<vmem>>, vector<32x128xf32>,
    return
  }
  func.func @transform_0(%arg0: i32) -> (i32, i32, i32) {
    %c0_i32 = arith.constant 0 : i32
    %c0_i32_0 = arith.constant 0 : i32
    %c0_i32_1 = arith.constant 0 : i32
    return %arg0, %c0_i32, %c0_i32_0 : i32, i32, i32
  }
  func.func @transform_1(%arg0: i32) -> (i32, i32) {
    %c0_i32 = arith.constant 0 : i32
    %c0_i32_0 = arith.constant 0 : i32
    return %arg0, %c0_i32 : i32, i32
  }
}

</mosaic_0001>

<bundles_post_ra>
// kernel: reasoning_forward.1
= control target key start
LH: loop header
LB: loop body
LE: loop exit
PB: predicated region body
PF: predicated region fallthrough
CT: control target
= control target key end

     0   :  { %6 = vsyncpa [#allocation3], 0  ;;  %s7373_s0 = inlined_call_operand.hbm [shape: f32[32,8,384], index: 0, kind: input, shape index: {}]   ;;  %s7374_s1 = inlined_call_operand.hbm [shape: f32[32,128], index: 1, kind: output, shape index: {}]  }
   0x1   :  { %7 = vsyncpa [#allocation4], 0  ;;  %s4699_s6 = smov [#allocation2]  }
   0x2   :  { %s13_s7 = sshll.u32 %s4699_s6, 4  ;;  %s14_s7 = int_to_ptr.vmem [resolvable:$true] %s13_s7 }
   0x3   :  { %s4663_s8 = scalar_lea.vmem %s14_s7, 12288  ;;  %p4668_p1 = scmp.lt.s32.totalorder %s14_s7, %s14_s7 }
   0x4   :  { %p4664_p0 = scmp.ne.s32.totalorder %s14_s7, %s4663_s8  ;;  %p4669_p2 = scmp.lt.s32.totalorder %s4663_s8, %s4663_s8 }
   0x6   :  { %p4670_p3 = por %p4669_p2, %p4668_p1 }
   0x8   :  { %p4671_p4 = pnand %p4670_p3, %p4664_p0 }
   0xa   :  { %4674 = shalt.err (!%p4671_p4)
}
   0xb   :  { %s4700_s9 = smov 384   ;;  %s4701_s10 = smov 24  }
   0xc   :  { %19 = dma.hbm_to_vmem [thread:$0]  %s7373_s0, 12288, %s14_s7, [#allocation3], %s4700_s9, %s4700_s9, %s4701_s10  }
   0xd   :  { %4695 = dma.done.wait [#allocation3], 12288  }
   0xe   :  { %4696 = vsyncadd [#allocation3], 4294955008  ;;  %vm129_vm0 = vcmask 1043456   ;;  %v4719_v0 = vld [vmem:[#allocation2 + $0x180] sm:$0xff]  ;;  %v4721_v1 = vld [vmem:[#allocation2 + $0x188] sm:$0xff]  ;;  %v119_v11 = vlaneseq  ;;  %v4702_v62 = vmov 0.0  }
   0xf   :  { %v4723_v2 = vld [vmem:[#allocation2 + $0x190] sm:$0xff]  ;;  %v466_v3 = vsel %vm129_vm0, %v4719_v0, -inf  ;;  %v4727_v4 = vld [vmem:[#allocation2 + $0x198] sm:$0xff]  ;;  %v4729_v5 = vld [vmem:[#allocation2 + $0x1a0] sm:$0xff]  ;;  %v473_v8 = vsel %vm129_vm0, %v4721_v1, -inf  ;;  %vm2051_vm2 = vcmask 1041409  }
  0x10   :  { %v4731_v6 = vld [vmem:[#allocation2 + $0x1a8] sm:$0xff]  ;;  %v467_v7 = vrot.slane %v466_v3, 4  ;;  %v480_v9 = vsel %vm129_vm0, %v4723_v2, -inf  ;;  %v4737_v10 = vld [vmem:[#allocation2 + $0x1b0] sm:$0xff]  ;;  %v4739_v12 = vld [vmem:[#allocation2 + $0x1b8] sm:$0xff]  ;;  %v474_v13 = vrot.slane %v473_v8, 4 }
  0x11   :  { %v487_v14 = vsel %vm129_vm0, %v4727_v4, -inf  ;;  %v494_v15 = vsel %vm129_vm0, %v4729_v5, -inf  ;;  %v501_v16 = vsel %vm129_vm0, %v4731_v6, -inf  ;;  %v481_v18 = vrot.slane %v480_v9, 4  ;;  %v4751_v33 = vld [vmem:[#allocation2 + $0x1c0] sm:$0xff]  ;;  %v4753_v39 = vld [vmem:[#allocation2 + $0x1c8] sm:$0xff] }
  0x12   :  { %v468_v17 = vmax.f32 %v466_v3, %v467_v7  ;;  %v508_v19 = vsel %vm129_vm0, %v4737_v10, -inf  ;;  %v488_v20 = vrot.slane %v487_v14, 4  ;;  %v495_v21 = vrot.slane %v494_v15, 4  ;;  %v4755_v41 = vld [vmem:[#allocation2 + $0x1d0] sm:$0xff]  ;;  %v4757_v42 = vld [vmem:[#allocation2 + $0x1d8] sm:$0xff]  ;;  %v4761_v47 = vld [vmem:[#allocation2 + $0x1e0] sm:$0xff] }
  0x13   :  { %v502_v22 = vrot.slane %v501_v16, 4  ;;  %v515_v23 = vsel %vm129_vm0, %v4739_v12, -inf  ;;  %v120_v24 = vand.u32 127, %v119_v11  ;;  %v475_v25 = vmax.f32 %v473_v8, %v474_v13  ;;  %7606 = vst [vmem:[#allocation8_spill] sm:$0xff] %v4757_v42  ;;  %7607 = vst [vmem:[#allocation9_spill] sm:$0xff] %v4761_v47  ;;  %v4765_v53 = vld [vmem:[#allocation2 + $0x1e8] sm:$0xff] }
  0x14   :  { %v469_v26 = vrot.slane %v468_v17, 2  ;;  %v482_v27 = vmax.f32 %v480_v9, %v481_v18  ;;  %v509_v28 = vrot.slane %v508_v19, 4  ;;  %v516_v29 = vrot.slane %v515_v23, 4  ;;  %7608 = vst [vmem:[#allocation10_spill] sm:$0xff] %v4765_v53  ;;  %v4776_v8 = vld [vmem:[#allocation2 + $0x1f0] sm:$0xff]  ;;  %v4778_v9 = vld [vmem:[#allocation2 + $0x1f8] sm:$0xff] }
  0x15   :  { %v489_v30 = vmax.f32 %v487_v14, %v488_v20  ;;  %v496_v31 = vmax.f32 %v494_v15, %v495_v21  ;;  %v503_v32 = vmax.f32 %v501_v16, %v502_v22  ;;  %v122_v34 = vadd.s32 256, %v120_v24  ;;  %7610 = vst [vmem:[#allocation12_spill] sm:$0xff] %v4776_v8  ;;  %7611 = vst [vmem:[#allocation13_spill] sm:$0xff] %v4778_v9  ;;  %v4784_v24 = vld [vmem:[#allocation2 + $0x200] sm:$0xff]  ;;  %s4703_s0 = smov [#allocation5]  }
  0x16   :  { %v476_v35 = vrot.slane %v475_v25, 2  ;;  %v470_v36 = vmax.f32 %v468_v17, %v469_v26  ;;  %v483_v37 = vrot.slane %v482_v27, 2  ;;  %v510_v38 = vmax.f32 %v508_v19, %v509_v28  ;;  %7612 = vst [vmem:[#allocation14_spill] sm:$0xff] %v4784_v24  ;;  %s3750_s13 = sshll.u32 %s4703_s0, 4  ;;  %s3751_s13 = int_to_ptr.vmem [resolvable:$true] %s3750_s13 }
  0x17   :  { %v517_v40 = vmax.f32 %v515_v23, %v516_v29  ;;  %v490_v43 = vrot.slane %v489_v30, 2  ;;  %v497_v44 = vrot.slane %v496_v31, 2  ;;  %v504_v45 = vrot.slane %v503_v32, 2  ;;  %s4675_s14 = scalar_lea.vmem %s3751_s13, 512  ;;  %p4680_p6 = scmp.lt.s32.totalorder %s3751_s13, %s3751_s13 }
  0x18   :  { %v522_v46 = vsel %vm129_vm0, %v4751_v33, -inf  ;;  %vm125_vm1 = vcmp.lt.s32.totalorder %v122_v34, 294  ;;  %v477_v48 = vmax.f32 %v475_v25, %v476_v35  ;;  %v471_v49 = vrot.slane %v470_v36, 1  ;;  %v4792_v34 = vld [vmem:[#allocation2 + $0x208] sm:$0xff]  ;;  %p4676_p5 = scmp.ne.s32.totalorder %s3751_s13, %s4675_s14  ;;  %p4681_p7 = scmp.lt.s32.totalorder %s4675_s14, %s4675_s14 }
  0x19   :  { %v484_v50 = vmax.f32 %v482_v27, %v483_v37  ;;  %v511_v51 = vrot.slane %v510_v38, 2  ;;  %v529_v52 = vsel %vm129_vm0, %v4753_v39, -inf  ;;  %v518_v54 = vrot.slane %v517_v40, 2  ;;  %7613 = vst [vmem:[#allocation15_spill] sm:$0xff] %v4792_v34 }
  0x1a   :  { %v523_v55 = vrot.slane %v522_v46, 4  ;;  %v536_v56 = vsel %vm129_vm0, %v4755_v41, -inf  ;;  %v543_v57 = vsel %vm129_vm0, %v4757_v42, -inf  ;;  %v491_v58 = vmax.f32 %v489_v30, %v490_v43  ;;  %p4682_p8 = por %p4681_p7, %p4680_p6 }
  0x1b   :  { %v498_v59 = vmax.f32 %v496_v31, %v497_v44  ;;  %v505_v60 = vmax.f32 %v503_v32, %v504_v45  ;;  %v550_v61 = vsel %vm129_vm0, %v4761_v47, -inf  ;;  %v4774_v63 = vsel %vm125_vm1, 1.0, %v4702_v62  ;;  %v4816_v62 = vld [vmem:[#allocation2 + $0x230] sm:$0xff] }
  0x1c   :  { %7609 = vst [vmem:[#allocation11_spill] sm:$0xff] %v4774_v63  ;;  %v478_v3 = vrot.slane %v477_v48, 1  ;;  %v530_v7 = vrot.slane %v529_v52, 4  ;;  %v512_v11 = vmax.f32 %v510_v38, %v511_v51  ;;  %v537_v13 = vrot.slane %v536_v56, 4  ;;  %7618 = vst [vmem:[#allocation20_spill] sm:$0xff] %v4816_v62  ;;  %p4683_p9 = pnand %p4682_p8, %p4676_p5 }
  0x1d   :  { %v544_v14 = vrot.slane %v543_v57, 4  ;;  %v557_v15 = vsel %vm129_vm0, %v4765_v53, -inf  ;;  %v485_v16 = vrot.slane %v484_v50, 1  ;;  %v519_v17 = vmax.f32 %v517_v40, %v518_v54  ;;  %v4808_v54 = vld [vmem:[#allocation2 + $0x220] sm:$0xff] }
  0x1e   :  { %v524_v18 = vmax.f32 %v522_v46, %v523_v55  ;;  %v551_v19 = vrot.slane %v550_v61, 4  ;;  %v4782_v20 = vmax.f32 %v470_v36, %v471_v49  ;;  %v492_v21 = vrot.slane %v491_v58, 1  ;;  %v4800_v46 = vld [vmem:[#allocation2 + $0x210] sm:$0xff]  ;;  %7616 = vst [vmem:[#allocation18_spill] sm:$0xff] %v4808_v54 }
  0x1f   :  { %v499_v22 = vrot.slane %v498_v59, 1  ;;  %v506_v23 = vrot.slane %v505_v60, 1  ;;  %v531_v25 = vmax.f32 %v529_v52, %v530_v7  ;;  %v558_v26 = vrot.slane %v557_v15, 4  ;;  %7614 = vst [vmem:[#allocation16_spill] sm:$0xff] %v4800_v46 }
  0x20   :  { %v564_v27 = vsel %vm129_vm0, %v4776_v8, -inf  ;;  %v571_v28 = vsel %vm129_vm0, %v4778_v9, -inf  ;;  %v4790_v29 = vmax.f32 %v477_v48, %v478_v3  ;;  %v513_v30 = vrot.slane %v512_v11, 1  ;;  %v4802_v48 = vld [vmem:[#allocation2 + $0x218] sm:$0xff] }
  0x21   :  { %v538_v31 = vmax.f32 %v536_v56, %v537_v13  ;;  %v545_v32 = vmax.f32 %v543_v57, %v544_v14  ;;  %v4794_v35 = vmax.f32 %v484_v50, %v485_v16  ;;  %v520_v36 = vrot.slane %v519_v17, 1  ;;  %7615 = vst [vmem:[#allocation17_spill] sm:$0xff] %v4802_v48  ;;  %v4820_v13 = vld [vmem:[#allocation2 + $0x238] sm:$0xff] }
  0x22   :  { %v525_v37 = vrot.slane %v524_v18, 2  ;;  %v552_v38 = vmax.f32 %v550_v61, %v551_v19  ;;  %v4796_v40 = vmax.f32 %v491_v58, %v492_v21  ;;  %v565_v43 = vrot.slane %v564_v27, 4  ;;  %v4814_v61 = vld [vmem:[#allocation2 + $0x228] sm:$0xff]  ;;  %7619 = vst [vmem:[#allocation21_spill] sm:$0xff] %v4820_v13 }
  0x23   :  { %v572_v44 = vrot.slane %v571_v28, 4  ;;  %v578_v45 = vsel %vm129_vm0, %v4784_v24, -inf  ;;  %v4804_v49 = vmax.f32 %v498_v59, %v499_v22  ;;  %v4806_v51 = vmax.f32 %v505_v60, %v506_v23  ;;  %7617 = vst [vmem:[#allocation19_spill] sm:$0xff] %v4814_v61 }
  0x24   :  { %v532_v50 = vrot.slane %v531_v25, 2  ;;  %v559_v52 = vmax.f32 %v557_v15, %v558_v26  ;;  %v4810_v55 = vmax.f32 %v512_v11, %v513_v30  ;;  %v539_v56 = vrot.slane %v538_v31, 2 }
  0x25   :  { %v546_v57 = vrot.slane %v545_v32, 2  ;;  %v585_v58 = vsel %vm129_vm0, %v4792_v34, -inf  ;;  %v4818_v3 = vmax.f32 %v519_v17, %v520_v36  ;;  %v526_v59 = vmax.f32 %v524_v18, %v525_v37 }
  0x26   :  { %v553_v60 = vrot.slane %v552_v38, 2  ;;  %v579_v7 = vrot.slane %v578_v45, 4  ;;  %v566_v14 = vmax.f32 %v564_v27, %v565_v43  ;;  %v573_v15 = vmax.f32 %v571_v28, %v572_v44 }
  0x27   :  { %v592_v11 = vsel %vm129_vm0, %v4800_v46, -inf  ;;  %v599_v16 = vsel %vm129_vm0, %v4802_v48, -inf  ;;  %v533_v19 = vmax.f32 %v531_v25, %v532_v50  ;;  %v560_v21 = vrot.slane %v559_v52, 2 }
  0x28   :  { %v586_v22 = vrot.slane %v585_v58, 4  ;;  %v606_v17 = vsel %vm129_vm0, %v4808_v54, -inf  ;;  %v540_v23 = vmax.f32 %v538_v31, %v539_v56  ;;  %v547_v18 = vmax.f32 %v545_v32, %v546_v57 }
  0x29   :  { %v613_v26 = vsel %vm129_vm0, %v4814_v61, -inf  ;;  %v620_v27 = vsel %vm129_vm0, %v4816_v62, -inf  ;;  %v580_v28 = vmax.f32 %v578_v45, %v579_v7  ;;  %v593_v30 = vrot.slane %v592_v11, 4 }
  0x2a   :  { %v600_v36 = vrot.slane %v599_v16, 4  ;;  %v627_v37 = vsel %vm129_vm0, %v4820_v13, -inf  ;;  %v554_v25 = vmax.f32 %v552_v38, %v553_v60  ;;  %v567_v43 = vrot.slane %v566_v14, 2 }
  0x2b   :  { %v574_v44 = vrot.slane %v573_v15, 2  ;;  %v607_v50 = vrot.slane %v606_v17, 4  ;;  %v561_v63 = vmax.f32 %v559_v52, %v560_v21  ;;  %v587_v54 = vmax.f32 %v585_v58, %v586_v22 }
  0x2c   :  { %v614_v31 = vrot.slane %v613_v26, 4  ;;  %v621_v32 = vrot.slane %v620_v27, 4  ;;  %v527_v56 = vrot.slane %v526_v59, 1  ;;  %v534_v57 = vrot.slane %v533_v19, 1 }
  0x2d   :  { %v541_v61 = vrot.slane %v540_v23, 1  ;;  %v628_v48 = vrot.slane %v627_v37, 4  ;;  %v548_v46 = vrot.slane %v547_v18, 1  ;;  %v581_v62 = vrot.slane %v580_v28, 2 }
  0x2e   :  { %v594_v45 = vmax.f32 %v592_v11, %v593_v30  ;;  %v601_v7 = vmax.f32 %v599_v16, %v600_v36  ;;  %v555_v34 = vrot.slane %v554_v25, 1  ;;  %v568_v24 = vmax.f32 %v566_v14, %v567_v43 }
  0x2f   :  { %v575_v9 = vmax.f32 %v573_v15, %v574_v44  ;;  %v608_v13 = vmax.f32 %v606_v17, %v607_v50  ;;  %v562_v38 = vrot.slane %v561_v63, 1  ;;  %v588_v60 = vrot.slane %v587_v54, 2 }
  0x30   :  { %v615_v8 = vmax.f32 %v613_v26, %v614_v31  ;;  %v622_v53 = vmax.f32 %v620_v27, %v621_v32  ;;  %v4834_v52 = vmax.f32 %v526_v59, %v527_v56  ;;  %v4836_v58 = vmax.f32 %v533_v19, %v534_v57 }
  0x31   :  { %v4838_v21 = vmax.f32 %v540_v23, %v541_v61  ;;  %v629_v22 = vmax.f32 %v627_v37, %v628_v48  ;;  %v4840_v47 = vmax.f32 %v547_v18, %v548_v46  ;;  %v582_v42 = vmax.f32 %v580_v28, %v581_v62 }
  0x32   :  { %v595_v11 = vrot.slane %v594_v45, 2  ;;  %v602_v16 = vrot.slane %v601_v7, 2  ;;  %v4842_v30 = vmax.f32 %v554_v25, %v555_v34  ;;  %v569_v14 = vrot.slane %v568_v24, 1 }
  0x33   :  { %v576_v15 = vrot.slane %v575_v9, 1  ;;  %v609_v17 = vrot.slane %v608_v13, 2  ;;  %v4844_v36 = vmax.f32 %v561_v63, %v562_v38  ;;  %v589_v26 = vmax.f32 %v587_v54, %v588_v60 }
  0x34   :  { %v616_v59 = vrot.slane %v615_v8, 2  ;;  %v623_v27 = vrot.slane %v622_v53, 2  ;;  %v630_v19 = vrot.slane %v629_v22, 2  ;;  %v850_v61 = vsub.f32 %v4719_v0, %v4782_v20 }
  0x35   :  { %v851_v46 = vsub.f32 %v4721_v1, %v4790_v29  ;;  %v852_v48 = vsub.f32 %v4723_v2, %v4794_v35  ;;  %v583_v34 = vrot.slane %v582_v42, 1  ;;  %v596_v62 = vmax.f32 %v594_v45, %v595_v11 }
  0x36   :  { %v603_v23 = vmax.f32 %v601_v7, %v602_v16  ;;  %v853_v63 = vsub.f32 %v4727_v4, %v4796_v40  ;;  %v4854_v18 = vmax.f32 %v568_v24, %v569_v14  ;;  %v4856_v54 = vmax.f32 %v575_v9, %v576_v15 }
  0x37   :  { %v610_v28 = vmax.f32 %v608_v13, %v609_v17  ;;  %v854_v20 = vsub.f32 %v4729_v5, %v4804_v49  ;;  %v590_v37 = vrot.slane %v589_v26, 1  ;;  %v617_v25 = vmax.f32 %v615_v8, %v616_v59  ;;  %v7620_v17 = vld [vmem:[#allocation8_spill] sm:$0xff]  ;;  %v7621_v59 = vld [vmem:[#allocation9_spill] sm:$0xff] }
  0x38   :  { %v624_v29 = vmax.f32 %v622_v53, %v623_v27  ;;  %v855_v35 = vsub.f32 %v4731_v6, %v4806_v51  ;;  %v631_v43 = vmax.f32 %v629_v22, %v630_v19  ;;  %v994_v44 = vmul.f32 1.442695, %v850_v61  ;;  %v7622_v19 = vld [vmem:[#allocation10_spill] sm:$0xff] }
  0x39   :  { %v996_v50 = vmul.f32 1.442695, %v851_v46  ;;  %v998_v31 = vmul.f32 1.442695, %v852_v48  ;;  %v584_v32 = vmax.f32 %v582_v42, %v583_v34  ;;  %v597_v40 = vrot.slane %v596_v62, 1  ;;  %v7624_v48 = vld [vmem:[#allocation13_spill] sm:$0xff] }
  0x3a   :  { %v604_v24 = vrot.slane %v603_v23, 1  ;;  %v1000_v56 = vmul.f32 1.442695, %v853_v63  ;;  %v611_v9 = vrot.slane %v610_v28, 1  ;;  %v856_v13 = vsub.f32 %v4737_v10, %v4810_v55  ;;  %v7626_v63 = vld [vmem:[#allocation15_spill] sm:$0xff] }
  0x3b   :  { %3865 = vpow2.f32 %v994_v44  ;;  %v1002_v49 = vmul.f32 1.442695, %v854_v20  ;;  %v618_v57 = vrot.slane %v617_v25, 1  ;;  %v625_v8 = vrot.slane %v624_v29, 1  ;;  %v7627_v20 = vld [vmem:[#allocation16_spill] sm:$0xff] }
  0x3c   :  { %3867 = vpow2.f32 %v996_v50  ;;  %v1004_v53 = vmul.f32 1.442695, %v855_v35  ;;  %v591_v45 = vmax.f32 %v589_v26, %v590_v37  ;;  %v632_v51 = vrot.slane %v631_v43, 1  ;;  %v7631_v44 = vld [vmem:[#allocation20_spill] sm:$0xff]  ;;  %v7632_v50 = vld [vmem:[#allocation21_spill] sm:$0xff] }
  0x3d   :  { %v857_v7 = vsub.f32 %v4739_v12, %v4818_v3  ;;  %3869 = vpow2.f32 %v998_v31  ;;  %v598_v42 = vmax.f32 %v596_v62, %v597_v40  ;;  %v605_v38 = vmax.f32 %v603_v23, %v604_v24 }
  0x3e   :  { %v858_v60 = vsub.f32 %v4751_v33, %v4834_v52  ;;  %3871 = vpow2.f32 %v1000_v56  ;;  %v612_v22 = vmax.f32 %v610_v28, %v611_v9  ;;  %v859_v55 = vsub.f32 %v4753_v39, %v4836_v58  ;;  %v7623_v58 = vld [vmem:[#allocation12_spill] sm:$0xff] }
  0x3f   :  { %3873 = vpow2.f32 %v1002_v49  ;;  %v1006_v11 = vmul.f32 1.442695, %v856_v13  ;;  %v619_v16 = vmax.f32 %v617_v25, %v618_v57  ;;  %v626_v14 = vmax.f32 %v624_v29, %v625_v8  ;;  %v7629_v29 = vld [vmem:[#allocation18_spill] sm:$0xff] }
  0x40   :  { %v860_v15 = vsub.f32 %v4755_v41, %v4838_v21  ;;  %3875 = vpow2.f32 %v1004_v53  ;;  %v633_v3 = vmax.f32 %v631_v43, %v632_v51  ;;  %v861_v26 = vsub.f32 %v7620_v17, %v4840_v47  ;;  %v7625_v21 = vld [vmem:[#allocation14_spill] sm:$0xff] }
  0x41   :  { %v862_v52 = vsub.f32 %v7621_v59, %v4842_v30  ;;  %v1008_v27 = vmul.f32 1.442695, %v857_v7  ;;  %v863_v61 = vsub.f32 %v7622_v19, %v4844_v36  ;;  %v864_v46 = vsub.f32 %v7623_v58, %v4854_v18  ;;  %v7628_v30 = vld [vmem:[#allocation17_spill] sm:$0xff]  ;;  %v7630_v36 = vld [vmem:[#allocation19_spill] sm:$0xff] }
  0x42   :  { %v865_v34 = vsub.f32 %v7624_v48, %v4856_v54  ;;  %v1010_v62 = vmul.f32 1.442695, %v858_v60  ;;  %v866_v23 = vsub.f32 %v7625_v21, %v584_v32  ;;  %v867_v28 = vsub.f32 %v7626_v63, %v591_v45 }
  0x43   :  { %3877 = vpow2.f32 %v1006_v11  ;;  %v1012_v47 = vmul.f32 1.442695, %v859_v55  ;;  %v868_v37 = vsub.f32 %v7627_v20, %v598_v42  ;;  %v869_v25 = vsub.f32 %v7628_v30, %v605_v38 }
  0x44   :  { %v870_v35 = vsub.f32 %v7629_v29, %v612_v22  ;;  %v871_v43 = vsub.f32 %v7630_v36, %v619_v16  ;;  %v872_v18 = vsub.f32 %v7631_v44, %v626_v14  ;;  %v873_v31 = vsub.f32 %v7632_v50, %v633_v3 }
  0x45   :  { %3879 = vpow2.f32 %v1008_v27  ;;  %v1014_v54 = vmul.f32 1.442695, %v860_v15  ;;  %v1016_v32 = vmul.f32 1.442695, %v861_v26  ;;  %v1018_v40 = vmul.f32 1.442695, %v862_v52 }
  0x46   :  { %3881 = vpow2.f32 %v1010_v62  ;;  %v1020_v24 = vmul.f32 1.442695, %v863_v61  ;;  %v1022_v56 = vmul.f32 1.442695, %v864_v46  ;;  %v1024_v9 = vmul.f32 1.442695, %v865_v34 }
  0x47   :  { %3883 = vpow2.f32 %v1012_v47  ;;  %v1026_v13 = vmul.f32 1.442695, %v866_v23  ;;  %v1028_v57 = vmul.f32 1.442695, %v867_v28  ;;  %v1030_v8 = vmul.f32 1.442695, %v868_v37 }
  0x48   :  { %v4890_v49 = vpop.eup %3865  ;;  %v1032_v53 = vmul.f32 1.442695, %v869_v25  ;;  %v4894_v51 = vmul.f32 1.442695, %v870_v35  ;;  %v4896_v7 = vmul.f32 1.442695, %v871_v43  ;;  %3885 = vpow2.f32 %v1014_v54 }
  0x49   :  { %7633 = vst [vmem:[#allocation19_spill] sm:$0xff] %v4890_v49  ;;  %v4892_v45 = vpop.eup %3867  ;;  %v4898_v42 = vmul.f32 1.442695, %v872_v18  ;;  %v4902_v60 = vmul.f32 1.442695, %v873_v31  ;;  %v1426_v22 = vsel %vm129_vm0, %v4890_v49, 0.0  ;;  %3887 = vpow2.f32 %v1016_v32 }
  0x4a   :  { %7634 = vst [vmem:[#allocation20_spill] sm:$0xff] %v4892_v45  ;;  %v4900_v38 = vpop.eup %3869  ;;  %v1433_v16 = vsel %vm129_vm0, %v4892_v45, 0.0  ;;  %v1427_v34 = vrot.slane %v1426_v22, 4  ;;  %3889 = vpow2.f32 %v1018_v40  ;;  %vm2054_vm3 = vcmask 1042434  }
  0x4b   :  { %7635 = vst [vmem:[#allocation21_spill] sm:$0xff] %v4900_v38  ;;  %v4907_v11 = vpop.eup %3871  ;;  %v1440_v14 = vsel %vm129_vm0, %v4900_v38, 0.0  ;;  %v1434_v47 = vrot.slane %v1433_v16, 4  ;;  %3891 = vpow2.f32 %v1020_v24  ;;  %vm2057_vm4 = vcmask 1043459  }
  0x4c   :  { %7636 = vst [vmem:[#allocation22_spill] sm:$0xff] %v4907_v11  ;;  %v4914_v3 = vpop.eup %3873  ;;  %v1447_v26 = vsel %vm129_vm0, %v4907_v11, 0.0  ;;  %v1441_v37 = vrot.slane %v1440_v14, 4  ;;  %3893 = vpow2.f32 %v1022_v56  ;;  %v1428_v40 = vadd.f32 %v1427_v34, %v1426_v22 }
  0x4d   :  { %7637 = vst [vmem:[#allocation23_spill] sm:$0xff] %v4914_v3  ;;  %v4921_v46 = vpop.eup %3875  ;;  %v1454_v62 = vsel %vm129_vm0, %v4914_v3, 0.0  ;;  %v1448_v25 = vrot.slane %v1447_v26, 4  ;;  %3895 = vpow2.f32 %v1024_v9  ;;  %v1435_v27 = vadd.f32 %v1434_v47, %v1433_v16 }
  0x4e   :  { %7638 = vst [vmem:[#allocation24_spill] sm:$0xff] %v4921_v46  ;;  %v1455_v35 = vrot.slane %v1454_v62, 4  ;;  %v1461_v43 = vsel %vm129_vm0, %v4921_v46, 0.0  ;;  %3897 = vpow2.f32 %v1026_v13  ;;  %v1442_v52 = vadd.f32 %v1441_v37, %v1440_v14 }
  0x4f   :  { %v1462_v23 = vrot.slane %v1461_v43, 4  ;;  %v1449_v18 = vadd.f32 %v1448_v25, %v1447_v26  ;;  %3899 = vpow2.f32 %v1028_v57  ;;  %v1429_v16 = vrot.slane %v1428_v40, 2 }
  0x50   :  { %v4930_v31 = vpop.eup %3877  ;;  %v1456_v56 = vadd.f32 %v1455_v35, %v1454_v62  ;;  %3901 = vpow2.f32 %v1030_v8  ;;  %v1436_v26 = vrot.slane %v1435_v27, 2  ;;  %v1443_v62 = vrot.slane %v1442_v52, 2 }
  0x51   :  { %7639 = vst [vmem:[#allocation25_spill] sm:$0xff] %v4930_v31  ;;  %v1468_v32 = vsel %vm129_vm0, %v4930_v31, 0.0  ;;  %3903 = vpow2.f32 %v1032_v53  ;;  %v1463_v14 = vadd.f32 %v1462_v23, %v1461_v43  ;;  %v1450_v47 = vrot.slane %v1449_v18, 2 }
  0x52   :  { %v4936_v61 = vpop.eup %3879  ;;  %v1469_v22 = vrot.slane %v1468_v32, 4  ;;  %v1457_v35 = vrot.slane %v1456_v56, 2  ;;  %3905 = vpow2.f32 %v4894_v51  ;;  %v1430_v24 = vadd.f32 %v1429_v16, %v1428_v40 }
  0x53   :  { %7640 = vst [vmem:[#allocation26_spill] sm:$0xff] %v4936_v61  ;;  %v4938_v15 = vpop.eup %3881  ;;  %v1475_v57 = vsel %vm129_vm0, %v4936_v61, 0.0  ;;  %3907 = vpow2.f32 %v4896_v7  ;;  %v1464_v54 = vrot.slane %v1463_v14, 2  ;;  %v1444_v55 = vadd.f32 %v1443_v62, %v1442_v52 }
  0x54   :  { %7641 = vst [vmem:[#allocation27_spill] sm:$0xff] %v4938_v15  ;;  %v4943_v9 = vpop.eup %3883  ;;  %v1476_v37 = vrot.slane %v1475_v57, 4  ;;  %v1470_v28 = vadd.f32 %v1469_v22, %v1468_v32  ;;  %v1482_v8 = vsel %vm129_vm0, %v4938_v15, 0.0  ;;  %v1437_v22 = vadd.f32 %v1436_v26, %v1435_v27 }
  0x55   :  { %7642 = vst [vmem:[#allocation28_spill] sm:$0xff] %v4943_v9  ;;  %v4949_v25 = vpop.eup %3885  ;;  %v1489_v13 = vsel %vm129_vm0, %v4943_v9, 0.0  ;;  %v1483_v23 = vrot.slane %v1482_v8, 4  ;;  %v1451_v46 = vadd.f32 %v1450_v47, %v1449_v18  ;;  %v1458_v51 = vadd.f32 %v1457_v35, %v1456_v56 }
  0x56   :  { %7643 = vst [vmem:[#allocation29_spill] sm:$0xff] %v4949_v25  ;;  %v4955_v53 = vpop.eup %3887  ;;  %v1490_v32 = vrot.slane %v1489_v13, 4  ;;  %v1477_v15 = vadd.f32 %v1476_v37, %v1475_v57  ;;  %v1496_v9 = vsel %vm129_vm0, %v4949_v25, 0.0  ;;  %v1471_v3 = vrot.slane %v1470_v28, 2 }
  0x57   :  { %7644 = vst [vmem:[#allocation30_spill] sm:$0xff] %v4955_v53  ;;  %v4963_v61 = vpop.eup %3889  ;;  %v1503_v43 = vsel %vm129_vm0, %v4955_v53, 0.0  ;;  %3909 = vpow2.f32 %v4898_v42  ;;  %v1484_v7 = vadd.f32 %v1483_v23, %v1482_v8  ;;  %v1431_v16 = vrot.slane %v1430_v24, 1 }
  0x58   :  { %7645 = vst [vmem:[#allocation31_spill] sm:$0xff] %v4963_v61  ;;  %v4967_v34 = vpop.eup %3891  ;;  %v1465_v57 = vadd.f32 %v1464_v54, %v1463_v14  ;;  %v1491_v26 = vadd.f32 %v1490_v32, %v1489_v13  ;;  %v1497_v18 = vrot.slane %v1496_v9, 4  ;;  %v1438_v62 = vrot.slane %v1437_v22, 1 }
  0x59   :  { %7646 = vst [vmem:[#allocation32_spill] sm:$0xff] %v4967_v34  ;;  %v4972_v40 = vpop.eup %3893  ;;  %v1445_v47 = vrot.slane %v1444_v55, 1  ;;  %v1478_v37 = vrot.slane %v1477_v15, 2  ;;  %v1504_v35 = vrot.slane %v1503_v43, 4  ;;  %v1452_v42 = vrot.slane %v1451_v46, 1 }
  0x5a   :  { %7647 = vst [vmem:[#allocation33_spill] sm:$0xff] %v4972_v40  ;;  %v4974_v56 = vpop.eup %3895  ;;  %v1459_v8 = vrot.slane %v1458_v51, 1  ;;  %v1472_v23 = vadd.f32 %v1471_v3, %v1470_v28  ;;  %3911 = vpow2.f32 %v4902_v60  ;;  %v1485_v54 = vrot.slane %v1484_v7, 2 }
  0x5b   :  { %7648 = vst [vmem:[#allocation34_spill] sm:$0xff] %v4974_v56  ;;  %v4976_v53 = vpop.eup %3897  ;;  %v1510_v13 = vsel %vm129_vm0, %v4963_v61, 0.0  ;;  %v4987_v25 = vadd.f32 %v1431_v16, %v1430_v24  ;;  %v1466_v31 = vrot.slane %v1465_v57, 1  ;;  %v1492_v11 = vrot.slane %v1491_v26, 2 }
  0x5c   :  { %7649 = vst [vmem:[#allocation35_spill] sm:$0xff] %v4976_v53  ;;  %v4979_v52 = vpop.eup %3899  ;;  %v1498_v20 = vadd.f32 %v1497_v18, %v1496_v9  ;;  %v4991_v28 = vadd.f32 %v1438_v62, %v1437_v22  ;;  %v4993_v27 = vadd.f32 %v1445_v47, %v1444_v55  ;;  %v1479_v60 = vadd.f32 %v1478_v37, %v1477_v15 }
  0x5d   :  { %7650 = vst [vmem:[#allocation36_spill] sm:$0xff] %v4979_v52  ;;  %v4985_v32 = vpop.eup %3901  ;;  %v1505_v30 = vadd.f32 %v1504_v35, %v1503_v43  ;;  %v4995_v38 = vadd.f32 %v1452_v42, %v1451_v46  ;;  %v4997_v61 = vadd.f32 %v1459_v8, %v1458_v51  ;;  %v1473_v14 = vrot.slane %v1472_v23, 1 }
  0x5e   :  { %7651 = vst [vmem:[#allocation37_spill] sm:$0xff] %v4985_v32  ;;  %v4989_v3 = vpop.eup %3903  ;;  %v1511_v29 = vrot.slane %v1510_v13, 4  ;;  %v1486_v63 = vadd.f32 %v1485_v54, %v1484_v7  ;;  %v1517_v24 = vsel %vm129_vm0, %v4967_v34, 0.0  ;;  %v1524_v9 = vsel %vm129_vm0, %v4972_v40, 0.0 }
  0x5f   :  { %7652 = vst [vmem:[#allocation38_spill] sm:$0xff] %v4989_v3  ;;  %v1531_v22 = vsel %vm129_vm0, %v4974_v56, 0.0  ;;  %v5005_v55 = vpop.eup %3905  ;;  %v5007_v15 = vadd.f32 %v1466_v31, %v1465_v57  ;;  %v1493_v46 = vadd.f32 %v1492_v11, %v1491_v26  ;;  %v1499_v43 = vrot.slane %v1498_v20, 2 }
  0x60   :  { %7653 = vst [vmem:[#allocation39_spill] sm:$0xff] %v5005_v55  ;;  %v1538_v51 = vsel %vm129_vm0, %v4976_v53, 0.0  ;;  %v5011_v16 = vpop.eup %3907  ;;  %v1480_v7 = vrot.slane %v1479_v60, 1  ;;  %v1506_v18 = vrot.slane %v1505_v30, 2  ;;  %v1545_v62 = vsel %vm129_vm0, %v4979_v52, 0.0 }
  0x61   :  { %7654 = vst [vmem:[#allocation40_spill] sm:$0xff] %v5011_v16  ;;  %v1552_v47 = vsel %vm129_vm0, %v4985_v32, 0.0  ;;  %v5017_v37 = vadd.f32 %v1473_v14, %v1472_v23  ;;  %v1518_v35 = vrot.slane %v1517_v24, 4  ;;  %v1525_v31 = vrot.slane %v1524_v9, 4 }
  0x62   :  { %v1532_v57 = vrot.slane %v1531_v22, 4  ;;  %v1487_v11 = vrot.slane %v1486_v63, 1  ;;  %v1512_v26 = vadd.f32 %v1511_v29, %v1510_v13  ;;  %v1539_v42 = vrot.slane %v1538_v51, 4 }
  0x63   :  { %v1559_v8 = vsel %vm129_vm0, %v4989_v3, 0.0  ;;  %v1494_v53 = vrot.slane %v1493_v46, 1  ;;  %v1500_v56 = vadd.f32 %v1499_v43, %v1498_v20  ;;  %v1546_v40 = vrot.slane %v1545_v62, 4 }
  0x64   :  { %v5021_v54 = vpop.eup %3909  ;;  %v1553_v52 = vrot.slane %v1552_v47, 4  ;;  %v5023_v34 = vadd.f32 %v1480_v7, %v1479_v60  ;;  %v1507_v32 = vadd.f32 %v1506_v18, %v1505_v30  ;;  %v1560_v23 = vrot.slane %v1559_v8, 4 }
  0x65   :  { %7655 = vst [vmem:[#allocation41_spill] sm:$0xff] %v5021_v54  ;;  %v1566_v14 = vsel %vm129_vm0, %v5005_v55, 0.0  ;;  %v1519_v21 = vadd.f32 %v1518_v35, %v1517_v24  ;;  %v1526_v45 = vadd.f32 %v1525_v31, %v1524_v9  ;;  %v1533_v29 = vadd.f32 %v1532_v57, %v1531_v22 }
  0x66   :  { %v1567_v13 = vrot.slane %v1566_v14, 4  ;;  %v5027_v48 = vadd.f32 %v1487_v11, %v1486_v63  ;;  %v1513_v3 = vrot.slane %v1512_v26, 2  ;;  %v1540_v58 = vadd.f32 %v1539_v42, %v1538_v51 }
  0x67   :  { %v1573_v20 = vsel %vm129_vm0, %v5011_v16, 0.0  ;;  %v5031_v43 = vpop.eup %3911  ;;  %v5033_v60 = vadd.f32 %v1494_v53, %v1493_v46  ;;  %v1501_v30 = vrot.slane %v1500_v56, 1  ;;  %v1547_v7 = vadd.f32 %v1546_v40, %v1545_v62 }
  0x68   :  { %7656 = vst [vmem:[#allocation42_spill] sm:$0xff] %v5031_v43  ;;  %v1554_v18 = vadd.f32 %v1553_v52, %v1552_v47  ;;  %v1508_v19 = vrot.slane %v1507_v32, 1  ;;  %v1561_v55 = vadd.f32 %v1560_v23, %v1559_v8  ;;  %v1574_v24 = vrot.slane %v1573_v20, 4 }
  0x69   :  { %v1580_v9 = vsel %vm129_vm0, %v5021_v54, 0.0  ;;  %v1520_v63 = vrot.slane %v1519_v21, 2  ;;  %v1527_v22 = vrot.slane %v1526_v45, 2  ;;  %v1534_v35 = vrot.slane %v1533_v29, 2 }
  0x6a   :  { %v1568_v51 = vadd.f32 %v1567_v13, %v1566_v14  ;;  %v1541_v31 = vrot.slane %v1540_v58, 2  ;;  %v1575_v57 = vadd.f32 %v1574_v24, %v1573_v20  ;;  %v1581_v11 = vrot.slane %v1580_v9, 4 }
  0x6b   :  { %v1587_v53 = vsel %vm129_vm0, %v5031_v43, 0.0  ;;  %v1514_v46 = vadd.f32 %v1513_v3, %v1512_v26  ;;  %v1548_v42 = vrot.slane %v1547_v7, 2  ;;  %v1555_v40 = vrot.slane %v1554_v18, 2 }
  0x6c   :  { %v1588_v52 = vrot.slane %v1587_v53, 4  ;;  %v1502_v62 = vadd.f32 %v1501_v30, %v1500_v56  ;;  %v1509_v47 = vadd.f32 %v1508_v19, %v1507_v32  ;;  %v1562_v8 = vrot.slane %v1561_v55, 2 }
  0x6d   :  { %v1582_v23 = vadd.f32 %v1581_v11, %v1580_v9  ;;  %v1521_v16 = vadd.f32 %v1520_v63, %v1519_v21  ;;  %v1528_v54 = vadd.f32 %v1527_v22, %v1526_v45  ;;  %v1569_v59 = vrot.slane %v1568_v51, 2 }
  0x6e   :  { %v1589_v17 = vadd.f32 %v1588_v52, %v1587_v53  ;;  %v1535_v49 = vadd.f32 %v1534_v35, %v1533_v29  ;;  %v1542_v14 = vadd.f32 %v1541_v31, %v1540_v58  ;;  %v1576_v13 = vrot.slane %v1575_v57, 2 }
  0x6f   :  { %3913 = vrcp.f32 %v4987_v25  ;;  %v1549_v20 = vadd.f32 %v1548_v42, %v1547_v7  ;;  %v1556_v24 = vadd.f32 %v1555_v40, %v1554_v18  ;;  %v1583_v43 = vrot.slane %v1582_v23, 2 }
  0x70   :  { %3915 = vrcp.f32 %v4991_v28  ;;  %v1515_v3 = vrot.slane %v1514_v46, 1  ;;  %v1563_v26 = vadd.f32 %v1562_v8, %v1561_v55  ;;  %v1590_v56 = vrot.slane %v1589_v17, 2 }
  0x71   :  { %3917 = vrcp.f32 %v4993_v27  ;;  %v1522_v19 = vrot.slane %v1521_v16, 1  ;;  %v1529_v21 = vrot.slane %v1528_v54, 1  ;;  %v1570_v45 = vadd.f32 %v1569_v59, %v1568_v51 }
  0x72   :  { %3919 = vrcp.f32 %v4995_v38  ;;  %v1536_v32 = vrot.slane %v1535_v49, 1  ;;  %v1543_v58 = vrot.slane %v1542_v14, 1  ;;  %v1577_v29 = vadd.f32 %v1576_v13, %v1575_v57 }
  0x73   :  { %3921 = vrcp.f32 %v4997_v61  ;;  %v1550_v25 = vrot.slane %v1549_v20, 1  ;;  %v1557_v30 = vrot.slane %v1556_v24, 1  ;;  %v1584_v7 = vadd.f32 %v1583_v43, %v1582_v23 }
  0x74   :  { %3923 = vrcp.f32 %v5017_v37  ;;  %v1516_v28 = vadd.f32 %v1515_v3, %v1514_v46  ;;  %v1564_v55 = vrot.slane %v1563_v26, 1  ;;  %v1591_v18 = vadd.f32 %v1590_v56, %v1589_v17 }
  0x75   :  { %3925 = vrcp.f32 %v5007_v15  ;;  %v1523_v27 = vadd.f32 %v1522_v19, %v1521_v16  ;;  %v1530_v9 = vadd.f32 %v1529_v21, %v1528_v54  ;;  %v1571_v59 = vrot.slane %v1570_v45, 1  ;;  %v7669_v19 = vld [vmem:[#allocation8_spill] sm:$0xff] }
  0x76   :  { %3927 = vrcp.f32 %v5023_v34  ;;  %v1537_v38 = vadd.f32 %v1536_v32, %v1535_v49  ;;  %v1544_v63 = vadd.f32 %v1543_v58, %v1542_v14  ;;  %v1578_v22 = vrot.slane %v1577_v29, 1 }
  0x77   :  { %3929 = vrcp.f32 %v5027_v48  ;;  %v1551_v61 = vadd.f32 %v1550_v25, %v1549_v20  ;;  %v1558_v35 = vadd.f32 %v1557_v30, %v1556_v24  ;;  %v1585_v43 = vrot.slane %v1584_v7, 1  ;;  %v7675_v30 = vld [vmem:[#allocation12_spill] sm:$0xff] }
  0x78   :  { %3931 = vrcp.f32 %v5033_v60  ;;  %v1565_v37 = vadd.f32 %v1564_v55, %v1563_v26  ;;  %v1592_v51 = vrot.slane %v1591_v18, 1  ;;  %v2414_v17 = vrot.slane %v7630_v36, 7  ;;  %v7677_v55 = vld [vmem:[#allocation13_spill] sm:$0xff] }
  0x79   :  { %3933 = vrcp.f32 %v1502_v62  ;;  %v1572_v15 = vadd.f32 %v1571_v59, %v1570_v45  ;;  %v2415_v16 = vrot.slane %v7631_v44, 7  ;;  %v2416_v34 = vrot.slane %v7632_v50, 7  ;;  %v7671_v45 = vld [vmem:[#allocation9_spill] sm:$0xff]  ;;  %v7679_v59 = vld [vmem:[#allocation20_spill] sm:$0xff] }
  0x7a   :  { %v7657_v49 = vrot.slane %v4719_v0, 7  ;;  %v1579_v48 = vadd.f32 %v1578_v22, %v1577_v29  ;;  %v7658_v31 = vrot.slane %v4721_v1, 7  ;;  %v7659_v60 = vrot.slane %v4723_v2, 7  ;;  %v7673_v29 = vld [vmem:[#allocation10_spill] sm:$0xff] }
  0x7b   :  { %v7660_v53 = vrot.slane %v4727_v4, 7  ;;  %v1586_v40 = vadd.f32 %v1585_v43, %v1584_v7  ;;  %3935 = vrcp.f32 %v1509_v47  ;;  %v7662_v62 = vrot.slane %v4731_v6, 7 }
  0x7c   :  { %v2585_v54 = vsub.f32 %v4719_v0, %v7657_v49  ;;  %v2586_v57 = vsub.f32 %v4721_v1, %v7658_v31  ;;  %v5061_v11 = vsub.f32 %v4723_v2, %v7659_v60  ;;  %v3914_v42 = vpop.eup %3913  ;;  %v7661_v0 = vrot.slane %v4729_v5, 7  ;;  %v7682_v49 = vld [vmem:[#allocation15_spill] sm:$0xff] }
  0x7d   :  { %v2588_v46 = vsub.f32 %v4727_v4, %v7660_v53  ;;  %v5072_v1 = vsub.f32 %v4731_v6, %v7662_v62  ;;  %v3916_v8 = vpop.eup %3915  ;;  %v1593_v2 = vadd.f32 %v1592_v51, %v1591_v18  ;;  %3937 = vrcp.f32 %v1516_v28 }
  0x7e   :  { %v2589_v52 = vsub.f32 %v4729_v5, %v7661_v0  ;;  %v7663_v23 = vrot.slane %v4737_v10, 7  ;;  %v7664_v47 = vrot.slane %v4739_v12, 7  ;;  %v3918_v13 = vpop.eup %3917  ;;  %3939 = vrcp.f32 %v1523_v27 }
  0x7f   :  { %v7665_v5 = vrot.slane %v4751_v33, 7  ;;  %v7666_v20 = vrot.slane %v4753_v39, 7  ;;  %v3920_v26 = vpop.eup %3919  ;;  %3941 = vrcp.f32 %v1530_v9  ;;  %v7670_v21 = vrot.slane %v7669_v19, 7 }
  0x80   :  { %v5077_v4 = vsub.f32 %v4737_v10, %v7663_v23  ;;  %v5082_v14 = vsub.f32 %v4739_v12, %v7664_v47  ;;  %v7667_v10 = vrot.slane %v4755_v41, 7  ;;  %v7668_v12 = vld [vmem:[#allocation19_spill] sm:$0xff]  ;;  %v7672_v32 = vrot.slane %v7671_v45, 7  ;;  %v3922_v58 = vpop.eup %3921  ;;  %v7687_v23 = vld [vmem:[#allocation17_spill] sm:$0xff] }
  0x81   :  { %v5087_v6 = vsub.f32 %v4751_v33, %v7665_v5  ;;  %v5092_v24 = vsub.f32 %v4753_v39, %v7666_v20  ;;  %v5100_v56 = vmul.f32 %v3914_v42, %v7668_v12  ;;  %v5105_v33 = vsub.f32 %v7669_v19, %v7670_v21  ;;  %v3924_v9 = vpop.eup %3923  ;;  %v7684_v42 = vld [vmem:[#allocation21_spill] sm:$0xff]  ;;  %v7690_v19 = vld [vmem:[#allocation18_spill] sm:$0xff] }
  0x82   :  { %v5097_v3 = vsub.f32 %v4755_v41, %v7667_v10  ;;  %v5110_v39 = vsub.f32 %v7671_v45, %v7672_v32  ;;  %3943 = vrcp.f32 %v1537_v38  ;;  %v7674_v41 = vrot.slane %v7673_v29, 7  ;;  %v7680_v38 = vld [vmem:[#allocation14_spill] sm:$0xff]  ;;  %v3926_v53 = vpop.eup %3925  ;;  %v7692_v32 = vld [vmem:[#allocation25_spill] sm:$0xff] }
  0x83   :  { %v7676_v7 = vrot.slane %v7675_v30, 7  ;;  %v7678_v18 = vrot.slane %v7677_v55, 7  ;;  %3945 = vrcp.f32 %v1544_v63  ;;  %v5128_v22 = vmul.f32 %v3916_v8, %v7679_v59  ;;  %v7685_v63 = vld [vmem:[#allocation16_spill] sm:$0xff]  ;;  %v3928_v20 = vpop.eup %3927  ;;  %v7689_v10 = vld [vmem:[#allocation22_spill] sm:$0xff] }
  0x84   :  { %v5115_v25 = vsub.f32 %v7673_v29, %v7674_v41  ;;  %v7681_v43 = vrot.slane %v7680_v38, 7  ;;  %v7683_v31 = vrot.slane %v7682_v49, 7  ;;  %3947 = vrcp.f32 %v1551_v61  ;;  %v3930_v45 = vpop.eup %3929 }
  0x85   :  { %v5120_v28 = vsub.f32 %v7675_v30, %v7676_v7  ;;  %v5125_v27 = vsub.f32 %v7677_v55, %v7678_v18  ;;  %v5141_v0 = vmul.f32 %v3918_v13, %v7684_v42  ;;  %v7686_v62 = vrot.slane %v7685_v63, 7 }
  0x86   :  { %v5133_v51 = vsub.f32 %v7680_v38, %v7681_v43  ;;  %v5138_v60 = vsub.f32 %v7682_v49, %v7683_v31  ;;  %v7688_v47 = vrot.slane %v7687_v23, 7  ;;  %3949 = vrcp.f32 %v1558_v35  ;;  %v3932_v35 = vpop.eup %3931  ;;  %v7694_v38 = vld [vmem:[#allocation24_spill] sm:$0xff] }
  0x87   :  { %v5146_v8 = vsub.f32 %v7685_v63, %v7686_v62  ;;  %v5154_v12 = vmul.f32 %v3920_v26, %v7689_v10  ;;  %v2141_v61 = vrot.slane %v5100_v56, 1  ;;  %v7691_v13 = vrot.slane %v7690_v19, 7  ;;  %v7693_v26 = vld [vmem:[#allocation23_spill] sm:$0xff]  ;;  %v3934_v59 = vpop.eup %3933  ;;  %v7698_v63 = vld [vmem:[#allocation29_spill] sm:$0xff] }
  0x88   :  { %v5151_v5 = vsub.f32 %v7687_v23, %v7688_v47  ;;  %3951 = vrcp.f32 %v1565_v37  ;;  %v5163_v29 = vmul.f32 %v3924_v9, %v7692_v32  ;;  %v5166_v41 = vsub.f32 %v7630_v36, %v2414_v17  ;;  %v7695_v37 = vld [vmem:[#allocation26_spill] sm:$0xff]  ;;  %v3936_v31 = vpop.eup %3935 }
  0x89   :  { %v5160_v21 = vsub.f32 %v7690_v19, %v7691_v13  ;;  %v3810_v30 = vmul.f32 -1.442695, %v2585_v54  ;;  %3953 = vrcp.f32 %v1572_v15  ;;  %v5169_v7 = vmul.f32 %v3922_v58, %v7693_v26  ;;  %v7699_v19 = vld [vmem:[#allocation30_spill] sm:$0xff] }
  0x8a   :  { %v2155_v55 = vrot.slane %v5128_v22, 1  ;;  %v3811_v18 = vmul.f32 -1.442695, %v2586_v57  ;;  %3955 = vrcp.f32 %v1579_v48  ;;  %v5173_v43 = vmul.f32 %v3926_v53, %v7694_v38  ;;  %v7696_v57 = vld [vmem:[#allocation27_spill] sm:$0xff]  ;;  %v7697_v53 = vld [vmem:[#allocation28_spill] sm:$0xff] }
  0x8b   :  { %v5176_v9 = vmul.f32 %v3928_v20, %v7695_v37  ;;  %v2169_v36 = vrot.slane %v5141_v0, 1  ;;  %3957 = vrcp.f32 %v1586_v40  ;;  %v2142_v17 = vsel %vm2051_vm2, %v5154_v12, %v2141_v61 }
  0x8c   :  { %v3812_v15 = vmul.f32 -1.442695, %v5061_v11  ;;  %v3813_v54 = vmul.f32 -1.442695, %v2588_v46  ;;  %3959 = vrcp.f32 %v1593_v2  ;;  %v5183_v58 = vmul.f32 %v3930_v45, %v7696_v57  ;;  %v3938_v11 = vpop.eup %3937 }
  0x8d   :  { %v2143_v48 = vrot.slane %v5163_v29, 7  ;;  %v3814_v49 = vmul.f32 -1.442695, %v2589_v52  ;;  %v5187_v42 = vmul.f32 %v3932_v35, %v7697_v53  ;;  %v5190_v62 = vmul.f32 %v3934_v59, %v7698_v63  ;;  %v3940_v23 = vpop.eup %3939  ;;  %v7700_v35 = vld [vmem:[#allocation31_spill] sm:$0xff] }
  0x8e   :  { %v2156_v40 = vsel %vm2051_vm2, %v5169_v7, %v2155_v55  ;;  %3961 = vpow2.f32 %v3810_v30  ;;  %vm2060_vm5 = vcmask 1044484   ;;  %v2157_v46 = vrot.slane %v5176_v9, 7  ;;  %v3942_v61 = vpop.eup %3941 }
  0x8f   :  { %v2170_v2 = vsel %vm2051_vm2, %v5173_v43, %v2169_v36  ;;  %3963 = vpow2.f32 %v3811_v18  ;;  %v3815_v52 = vmul.f32 -1.442695, %v5072_v1  ;;  %v3816_v47 = vmul.f32 -1.442695, %v5077_v4  ;;  %v3944_v30 = vpop.eup %3943 }
  0x90   :  { %3965 = vpow2.f32 %v3812_v15  ;;  %v3817_v20 = vmul.f32 -1.442695, %v5082_v14  ;;  %v3818_v10 = vmul.f32 -1.442695, %v5087_v6  ;;  %v5202_v13 = vmul.f32 %v3936_v31, %v7699_v19  ;;  %v3946_v14 = vpop.eup %3945  ;;  %v7701_v6 = vld [vmem:[#allocation32_spill] sm:$0xff]  ;;  %v7703_v31 = vld [vmem:[#allocation34_spill] sm:$0xff] }
  0x91   :  { %v2144_v45 = vsel %vm2054_vm3, %v2143_v48, %v2142_v17  ;;  %v2171_v32 = vrot.slane %v5183_v58, 7  ;;  %3967 = vpow2.f32 %v3813_v54  ;;  %v5207_v1 = vmul.f32 %v3938_v11, %v7700_v35  ;;  %v3948_v38 = vpop.eup %3947  ;;  %v7702_v54 = vld [vmem:[#allocation33_spill] sm:$0xff]  ;;  %v7704_v11 = vld [vmem:[#allocation35_spill] sm:$0xff] }
  0x92   :  { %v2145_v26 = vrot.slane %v5187_v42, 6  ;;  %v2159_v4 = vrot.slane %v5190_v62, 6  ;;  %3969 = vpow2.f32 %v3814_v49  ;;  %v5212_v55 = vmul.f32 %v3940_v23, %v7701_v6 }
  0x93   :  { %v2158_v18 = vsel %vm2054_vm3, %v2157_v46, %v2156_v40  ;;  %3971 = vpow2.f32 %v3815_v52  ;;  %v3819_v59 = vmul.f32 -1.442695, %v5092_v24  ;;  %vm2063_vm6 = vcmask 1045509   ;;  %v3950_v15 = vpop.eup %3949 }
  0x94   :  { %v5219_v37 = vsub.f32 %v7631_v44, %v2415_v16  ;;  %v5224_v36 = vsub.f32 %v7632_v50, %v2416_v34  ;;  %3973 = vpow2.f32 %v3816_v47  ;;  %v3820_v17 = vmul.f32 -1.442695, %v5097_v3 }
  0x95   :  { %v5228_v57 = vmul.f32 %v3942_v61, %v7702_v54  ;;  %v2172_v24 = vsel %vm2054_vm3, %v2171_v32, %v2170_v2  ;;  %v2173_v48 = vrot.slane %v5202_v13, 6  ;;  %3975 = vpow2.f32 %v3817_v20  ;;  %v3952_v49 = vpop.eup %3951  ;;  %v7708_v54 = vld [vmem:[#allocation39_spill] sm:$0xff] }
  0x96   :  { %v2146_v44 = vsel %vm2057_vm4, %v2145_v26, %v2144_v45  ;;  %v2147_v16 = vrot.slane %v5207_v1, 5  ;;  %v2160_v50 = vsel %vm2057_vm4, %v2159_v4, %v2158_v18  ;;  %3977 = vpow2.f32 %v3818_v10  ;;  %v3954_v34 = vpop.eup %3953 }
  0x97   :  { %v5236_v3 = vmul.f32 %v3944_v30, %v7703_v31  ;;  %v2161_v53 = vrot.slane %v5212_v55, 5  ;;  %3979 = vpow2.f32 %v3819_v59  ;;  %v3821_v63 = vmul.f32 -1.442695, %v5105_v33  ;;  %v3956_v40 = vpop.eup %3955 }
  0x98   :  { %v5241_v46 = vmul.f32 %v3946_v14, %v7704_v11  ;;  %3981 = vpow2.f32 %v3820_v17  ;;  %v3822_v2 = vmul.f32 -1.442695, %v5110_v39  ;;  %v3823_v52 = vmul.f32 -1.442695, %v5115_v25  ;;  %v3958_v23 = vpop.eup %3957  ;;  %v7705_v39 = vld [vmem:[#allocation36_spill] sm:$0xff]  ;;  %v7707_v17 = vld [vmem:[#allocation38_spill] sm:$0xff] }
  0x99   :  { %v2174_v47 = vsel %vm2057_vm4, %v2173_v48, %v2172_v24  ;;  %v2175_v20 = vrot.slane %v5228_v57, 5  ;;  %3983 = vpow2.f32 %v3821_v63  ;;  %v3824_v10 = vmul.f32 -1.442695, %v5120_v28  ;;  %v3960_v61 = vpop.eup %3959  ;;  %v7706_v28 = vld [vmem:[#allocation37_spill] sm:$0xff] }
  0x9a   :  { %v2148_v33 = vsel %vm2060_vm5, %v2147_v16, %v2146_v44  ;;  %3985 = vpow2.f32 %v3822_v2  ;;  %v3825_v19 = vmul.f32 -1.442695, %v5125_v27  ;;  %v3826_v45 = vmul.f32 -1.442695, %v5133_v51 }
  0x9b   :  { %v3962_v32 = vpop.eup %3961  ;;  %v5252_v30 = vmul.f32 %v3948_v38, %v7705_v39  ;;  %vm2066_vm7 = vcmask 1046534   ;;  %v2149_v25 = vrot.slane %v5236_v3, 4  ;;  %3987 = vpow2.f32 %v3823_v52 }
  0x9c   :  { %v3827_v35 = vmul.f32 -1.442695, %v5138_v60  ;;  %v3964_v26 = vpop.eup %3963  ;;  %v5257_v4 = vmul.f32 %v3950_v15, %v7706_v28  ;;  %v2163_v14 = vrot.slane %v5241_v46, 4  ;;  %3989 = vpow2.f32 %v3824_v10 }
  0x9d   :  { %v3828_v27 = vmul.f32 -1.442695, %v5146_v8  ;;  %v3966_v51 = vpop.eup %3965  ;;  %v2162_v6 = vsel %vm2060_vm5, %v2161_v53, %v2160_v50  ;;  %v2176_v18 = vsel %vm2060_vm5, %v2175_v20, %v2174_v47  ;;  %3991 = vpow2.f32 %v3825_v19  ;;  %v7709_v53 = vld [vmem:[#allocation40_spill] sm:$0xff] }
  0x9e   :  { %v3829_v59 = vmul.f32 -1.442695, %v5151_v5  ;;  %v3968_v38 = vpop.eup %3967  ;;  %v5265_v60 = vmul.f32 %v3952_v49, %v7707_v17  ;;  %v5268_v15 = vmul.f32 %v3954_v34, %v7708_v54  ;;  %3993 = vpow2.f32 %v3826_v45 }
  0x9f   :  { %v3830_v24 = vmul.f32 -1.442695, %v5160_v21  ;;  %v3970_v48 = vpop.eup %3969  ;;  %v2150_v8 = vsel %vm2063_vm6, %v2149_v25, %v2148_v33  ;;  %v2177_v44 = vrot.slane %v5252_v30, 4  ;;  %3995 = vpow2.f32 %v3827_v35  ;;  %v7710_v21 = vld [vmem:[#allocation42_spill] sm:$0xff]  ;;  %v7711_v33 = vld [vmem:[#allocation41_spill] sm:$0xff] }
  0xa0   :  { %v3831_v16 = vmul.f32 -1.442695, %v5166_v41  ;;  %v3972_v50 = vpop.eup %3971  ;;  %v2151_v5 = vrot.slane %v5257_v4, 3  ;;  %v2164_v49 = vsel %vm2063_vm6, %v2163_v14, %v2162_v6  ;;  %3997 = vpow2.f32 %v3828_v27 }
  0xa1   :  { %v3832_v34 = vmul.f32 -1.442695, %v5219_v37  ;;  %v3974_v31 = vpop.eup %3973  ;;  %v5278_v63 = vmul.f32 %v3956_v40, %v7709_v53  ;;  %v5281_v11 = vmul.f32 %v3960_v61, %v7710_v21  ;;  %3999 = vpow2.f32 %v3829_v59 }
  0xa2   :  { %v3833_v2 = vmul.f32 -1.442695, %v5224_v36  ;;  %v3976_v52 = vpop.eup %3975  ;;  %v2165_v41 = vrot.slane %v5265_v60, 3  ;;  %v2179_v47 = vrot.slane %v5268_v15, 3  ;;  %4001 = vpow2.f32 %v3830_v24 }
  0xa3   :  { %v2969_v20 = vadd.f32 1.0, %v3962_v32  ;;  %v3978_v10 = vpop.eup %3977  ;;  %v5287_v37 = vmul.f32 %v3958_v23, %v7711_v33  ;;  %v2178_v40 = vsel %vm2063_vm6, %v2177_v44, %v2176_v18  ;;  %4003 = vpow2.f32 %v3831_v16 }
  0xa4   :  { %v2970_v19 = vadd.f32 1.0, %v3964_v26  ;;  %v3980_v61 = vpop.eup %3979  ;;  %4005 = vpow2.f32 %v3832_v34  ;;  %v2971_v45 = vadd.f32 1.0, %v3966_v51  ;;  %v3593_v36 = vrot.slane %v5100_v56, 2 }
  0xa5   :  { %v3594_v39 = vrot.slane %v5154_v12, 1  ;;  %v3982_v25 = vpop.eup %3981  ;;  %vm2069_vm8 = vcmask 1047559   ;;  %v2181_v35 = vrot.slane %v5281_v11, 2  ;;  %4007 = vpow2.f32 %v3833_v2 }
  0xa6   :  { %v2972_v32 = vadd.f32 1.0, %v3968_v38  ;;  %v3984_v28 = vpop.eup %3983  ;;  %v2152_v23 = vsel %vm2066_vm7, %v2151_v5, %v2150_v8  ;;  %v2180_v14 = vsel %vm2066_vm7, %v2179_v47, %v2178_v40  ;;  %v2973_v27 = vadd.f32 1.0, %v3970_v48 }
  0xa7   :  { %4009 = vrcp.f32 %v2969_v20  ;;  %v3986_v26 = vpop.eup %3985  ;;  %v2153_v51 = vrot.slane %v5278_v63, 2  ;;  %v2166_v56 = vsel %vm2066_vm7, %v2165_v41, %v2164_v49  ;;  %v2974_v6 = vadd.f32 1.0, %v3972_v50 }
  0xa8   :  { %4011 = vrcp.f32 %v2970_v19  ;;  %v3988_v12 = vpop.eup %3987  ;;  %v2167_v18 = vrot.slane %v5287_v37, 2  ;;  %v2975_v59 = vadd.f32 1.0, %v3974_v31  ;;  %v3595_v38 = vsel %vm2051_vm2, %v3594_v39, %v3593_v36 }
  0xa9   :  { %4013 = vrcp.f32 %v2971_v45  ;;  %v3990_v17 = vpop.eup %3989  ;;  %v2182_v54 = vsel %vm2069_vm8, %v2181_v35, %v2180_v14  ;;  %v2976_v24 = vadd.f32 1.0, %v3976_v52  ;;  %v2977_v48 = vadd.f32 1.0, %v3978_v10  ;;  %v7712_v52 = vld [vmem:[#allocation11_spill] sm:$0xff] }
  0xaa   :  { %4015 = vrcp.f32 %v2972_v32  ;;  %v3992_v8 = vpop.eup %3991  ;;  %v3597_v44 = vrot.slane %v5187_v42, 7  ;;  %v3607_v16 = vrot.slane %v5128_v22, 2  ;;  %v3608_v50 = vrot.slane %v5169_v7, 1 }
  0xab   :  { %4017 = vrcp.f32 %v2973_v27  ;;  %v3994_v5 = vpop.eup %3993  ;;  %v2978_v49 = vadd.f32 1.0, %v3980_v61  ;;  %v3596_v34 = vsel %vm2054_vm3, %v5163_v29, %v3595_v38  ;;  %v5306_v53 = vsel %vm2069_vm8, %v2153_v51, %v2152_v23 }
  0xac   :  { %4019 = vrcp.f32 %v2974_v6  ;;  %v3996_v31 = vpop.eup %3995  ;;  %v5309_v21 = vsel %vm2069_vm8, %v2167_v18, %v2166_v56  ;;  %v2979_v2 = vadd.f32 1.0, %v3982_v25  ;;  %v5312_v22 = vmul.f32 %v2182_v54, %v7712_v52 }
  0xad   :  { %4021 = vrcp.f32 %v2975_v59  ;;  %v3998_v42 = vpop.eup %3997  ;;  %v2980_v7 = vadd.f32 1.0, %v3984_v28  ;;  %v3599_v41 = vrot.slane %v5207_v1, 6  ;;  %v2981_v20 = vadd.f32 1.0, %v3986_v26 }
  0xae   :  { %4023 = vrcp.f32 %v2976_v24  ;;  %v4000_v47 = vpop.eup %3999  ;;  %v3598_v29 = vsel %vm2057_vm4, %v3597_v44, %v3596_v34  ;;  %v3609_v10 = vsel %vm2051_vm2, %v3608_v50, %v3607_v16  ;;  %v2982_v40 = vadd.f32 1.0, %v3988_v12 }
  0xaf   :  { %4025 = vrcp.f32 %v2977_v48  ;;  %v4002_v33 = vpop.eup %4001  ;;  %v3621_v19 = vrot.slane %v5141_v0, 2  ;;  %v3622_v61 = vrot.slane %v5173_v43, 1  ;;  %v2983_v36 = vadd.f32 1.0, %v3990_v17 }
  0xb0   :  { %4027 = vrcp.f32 %v2978_v49  ;;  %v4004_v45 = vpop.eup %4003  ;;  %v3601_v39 = vrot.slane %v5236_v3, 5  ;;  %v3611_v1 = vrot.slane %v5190_v62, 7  ;;  %v2984_v35 = vadd.f32 1.0, %v3992_v8 }
  0xb1   :  { %4029 = vrcp.f32 %v2979_v2  ;;  %v4006_v25 = vpop.eup %4005  ;;  %v3600_v32 = vsel %vm2060_vm5, %v3599_v41, %v3598_v29  ;;  %v3610_v28 = vsel %vm2054_vm3, %v5176_v9, %v3609_v10  ;;  %v2985_v14 = vadd.f32 1.0, %v3994_v5 }
  0xb2   :  { %4031 = vrcp.f32 %v2980_v7  ;;  %v4008_v23 = vpop.eup %4007  ;;  %v3603_v0 = vrot.slane %v5257_v4, 4  ;;  %v3613_v43 = vrot.slane %v5212_v55, 6  ;;  %v2986_v26 = vadd.f32 1.0, %v3996_v31 }
  0xb3   :  { %4033 = vrcp.f32 %v2981_v20  ;;  %v3615_v62 = vrot.slane %v5241_v46, 5  ;;  %v3623_v3 = vsel %vm2051_vm2, %v3622_v61, %v3621_v19  ;;  %v2987_v56 = vadd.f32 1.0, %v3998_v42 }
  0xb4   :  { %v4010_v27 = vpop.eup %4009  ;;  %4035 = vrcp.f32 %v2982_v40  ;;  %v5329_v6 = vsel %vm2063_vm6, %v3601_v39, %v3600_v32  ;;  %v3612_v9 = vsel %vm2057_vm4, %v3611_v1, %v3610_v28  ;;  %v2988_v18 = vadd.f32 1.0, %v4000_v47  ;;  %v5343_v40 = vld [vmem:[#allocation2 + $0x8] sm:$0xff] }
  0xb5   :  { %v4012_v51 = vpop.eup %4011  ;;  %4037 = vrcp.f32 %v2983_v36  ;;  %v3389_v59 = vrot.slane %v4010_v27, 5  ;;  %v3625_v55 = vrot.slane %v5202_v13, 7  ;;  %v2989_v17 = vadd.f32 1.0, %v4002_v33  ;;  %v5341_v33 = vld [vmem:[#allocation2] sm:$0xff] }
  0xb6   :  { %v4014_v12 = vpop.eup %4013  ;;  %4039 = vrcp.f32 %v2984_v35  ;;  %v3403_v54 = vrot.slane %v4012_v51, 5  ;;  %v3624_v24 = vsel %vm2054_vm3, %v5183_v58, %v3623_v3  ;;  %v2990_v8 = vadd.f32 1.0, %v4004_v45 }
  0xb7   :  { %v4016_v38 = vpop.eup %4015  ;;  %4041 = vrcp.f32 %v2985_v14  ;;  %v3417_v16 = vrot.slane %v4014_v12, 5  ;;  %v2991_v5 = vadd.f32 1.0, %v4006_v25  ;;  %v3627_v34 = vrot.slane %v5228_v57, 6 }
  0xb8   :  { %v4018_v48 = vpop.eup %4017  ;;  %4043 = vrcp.f32 %v2986_v26  ;;  %v3390_v44 = vrot.slane %v4016_v38, 4  ;;  %v2992_v13 = vadd.f32 1.0, %v4008_v23  ;;  %v3626_v47 = vsel %vm2057_vm4, %v3625_v55, %v3624_v24  ;;  %v5362_v55 = vld [vmem:[#allocation2 + $0x10] sm:$0xff]  ;;  %v5365_v24 = vld [vmem:[#allocation2 + $0x18] sm:$0xff] }
  0xb9   :  { %v4020_v50 = vpop.eup %4019  ;;  %4045 = vrcp.f32 %v2987_v56  ;;  %v3404_v49 = vrot.slane %v4018_v48, 4  ;;  %v3614_v57 = vsel %vm2060_vm5, %v3613_v43, %v3612_v9  ;;  %v3629_v36 = vrot.slane %v5252_v30, 5 }
  0xba   :  { %v4022_v31 = vpop.eup %4021  ;;  %4047 = vrcp.f32 %v2988_v18  ;;  %v3391_v2 = vsel %vm2051_vm2, %v3390_v44, %v3389_v59  ;;  %v3418_v42 = vrot.slane %v4020_v50, 4  ;;  %v3628_v35 = vsel %vm2060_vm5, %v3627_v34, %v3626_v47 }
  0xbb   :  { %v4024_v7 = vpop.eup %4023  ;;  %4049 = vrcp.f32 %v2989_v17  ;;  %v3392_v58 = vrot.slane %v4022_v31, 3  ;;  %v3405_v41 = vsel %vm2051_vm2, %v3404_v49, %v3403_v54  ;;  %v130_v14 = vsel %vm129_vm0, %v5341_v33, -inf }
  0xbc   :  { %v4026_v20 = vpop.eup %4025  ;;  %4051 = vrcp.f32 %v2990_v8  ;;  %v3406_v29 = vrot.slane %v4024_v7, 3  ;;  %v3419_v10 = vsel %vm2051_vm2, %v3418_v42, %v3417_v16  ;;  %v137_v43 = vsel %vm129_vm0, %v5343_v40, -inf  ;;  %v5373_v16 = vld [vmem:[#allocation2 + $0x20] sm:$0xff] }
  0xbd   :  { %v4028_v19 = vpop.eup %4027  ;;  %4053 = vrcp.f32 %v2991_v5  ;;  %v3393_v61 = vsel %vm2054_vm3, %v3392_v58, %v3391_v2  ;;  %v3420_v45 = vrot.slane %v4026_v20, 3  ;;  %v3616_v3 = vsel %vm2063_vm6, %v3615_v62, %v3614_v57 }
  0xbe   :  { %v4030_v39 = vpop.eup %4029  ;;  %4055 = vrcp.f32 %v2992_v13  ;;  %v3394_v1 = vrot.slane %v4028_v19, 2  ;;  %v3407_v25 = vsel %vm2054_vm3, %v3406_v29, %v3405_v41  ;;  %v3617_v51 = vrot.slane %v5265_v60, 4 }
  0xbf   :  { %v4032_v32 = vpop.eup %4031  ;;  %v3408_v28 = vrot.slane %v4030_v39, 2  ;;  %v3421_v23 = vsel %vm2054_vm3, %v3420_v45, %v3419_v10  ;;  %v3630_v18 = vsel %vm2063_vm6, %v3629_v36, %v3628_v35  ;;  %v3631_v59 = vrot.slane %v5268_v15, 4  ;;  %v5392_v45 = vld [vmem:[#allocation2 + $0x28] sm:$0xff] }
  0xc0   :  { %v4034_v27 = vpop.eup %4033  ;;  %v3395_v30 = vsel %vm2057_vm4, %v3394_v1, %v3393_v61  ;;  %v3422_v26 = vrot.slane %v4032_v32, 2  ;;  %v131_v46 = vrot.slane %v130_v14, 4  ;;  %v138_v62 = vrot.slane %v137_v43, 4  ;;  %v5396_v32 = vld [vmem:[#allocation2 + $0x30] sm:$0xff] }
  0xc1   :  { %v4036_v56 = vpop.eup %4035  ;;  %v3396_v9 = vrot.slane %v4034_v27, 1  ;;  %v3409_v12 = vsel %vm2057_vm4, %v3408_v28, %v3407_v25  ;;  %v3604_v44 = vsel %vm2066_vm7, %v3603_v0, %v5329_v6  ;;  %v3605_v15 = vrot.slane %v5278_v63, 3  ;;  %v5399_v27 = vld [vmem:[#allocation2 + $0x38] sm:$0xff] }
  0xc2   :  { %v4038_v38 = vpop.eup %4037  ;;  %v3410_v17 = vrot.slane %v4036_v56, 1  ;;  %v3423_v54 = vsel %vm2057_vm4, %v3422_v26, %v3421_v23  ;;  %v3618_v49 = vsel %vm2066_vm7, %v3617_v51, %v3616_v3  ;;  %v3619_v34 = vrot.slane %v5287_v37, 3 }
  0xc3   :  { %v4040_v48 = vpop.eup %4039  ;;  %v3397_v60 = vsel %vm2060_vm5, %v3396_v9, %v3395_v30  ;;  %v3424_v8 = vrot.slane %v4038_v38, 1  ;;  %v144_v31 = vsel %vm129_vm0, %v5362_v55, -inf  ;;  %v3632_v4 = vsel %vm2066_vm7, %v3631_v59, %v3630_v18 }
  0xc4   :  { %v4042_v50 = vpop.eup %4041  ;;  %v3411_v5 = vsel %vm2060_vm5, %v3410_v17, %v3409_v12  ;;  %v3633_v0 = vrot.slane %v5281_v11, 3  ;;  %v151_v63 = vsel %vm129_vm0, %v5365_v24, -inf  ;;  %v3398_v42 = vsel %vm2063_vm6, %v4040_v48, %v3397_v60 }
  0xc5   :  { %v4044_v13 = vpop.eup %4043  ;;  %v3425_v2 = vsel %vm2060_vm5, %v3424_v8, %v3423_v54  ;;  %v132_v7 = vmax.f32 %v130_v14, %v131_v46  ;;  %v139_v58 = vmax.f32 %v137_v43, %v138_v62  ;;  %v158_v37 = vsel %vm129_vm0, %v5373_v16, -inf }
  0xc6   :  { %v4046_v6 = vpop.eup %4045  ;;  %v3412_v20 = vsel %vm2063_vm6, %v4042_v50, %v3411_v5  ;;  %v3606_v29 = vsel %vm2069_vm8, %v3605_v15, %v3604_v44  ;;  %v145_v10 = vrot.slane %v144_v31, 4  ;;  %v3426_v19 = vsel %vm2063_vm6, %v4044_v13, %v3425_v2 }
  0xc7   :  { %v4048_v41 = vpop.eup %4047  ;;  %v3399_v47 = vrot.slane %v4046_v6, 7  ;;  %v3620_v61 = vsel %vm2069_vm8, %v3619_v34, %v3618_v49  ;;  %v152_v36 = vrot.slane %v151_v63, 4  ;;  %v3634_v35 = vsel %vm2069_vm8, %v3633_v0, %v3632_v4  ;;  %v5414_v49 = vld [vmem:[#allocation2 + $0x40] sm:$0xff] }
  0xc8   :  { %v4050_v57 = vpop.eup %4049  ;;  %v3413_v11 = vrot.slane %v4048_v41, 7  ;;  %v159_v28 = vrot.slane %v158_v37, 4  ;;  %v133_v30 = vrot.slane %v132_v7, 2  ;;  %v140_v26 = vrot.slane %v139_v58, 2 }
  0xc9   :  { %v4052_v39 = vpop.eup %4051  ;;  %v3400_v1 = vsel %vm2066_vm7, %v3399_v47, %v3398_v42  ;;  %v3427_v25 = vrot.slane %v4050_v57, 7  ;;  %v146_v9 = vmax.f32 %v144_v31, %v145_v10  ;;  %v165_v12 = vsel %vm129_vm0, %v5392_v45, -inf  ;;  %v5419_v47 = vld [vmem:[#allocation2 + $0x48] sm:$0xff] }
  0xca   :  { %v4054_v23 = vpop.eup %4053  ;;  %v3401_v14 = vrot.slane %v4052_v39, 6  ;;  %v3414_v43 = vsel %vm2066_vm7, %v3413_v11, %v3412_v20  ;;  %v153_v38 = vmax.f32 %v151_v63, %v152_v36  ;;  %v172_v17 = vsel %vm129_vm0, %v5396_v32, -inf  ;;  %v5421_v20 = vld [vmem:[#allocation2 + $0x50] sm:$0xff]  ;;  %v5423_v11 = vld [vmem:[#allocation2 + $0x58] sm:$0xff] }
  0xcb   :  { %v4056_v3 = vpop.eup %4055  ;;  %v3415_v51 = vrot.slane %v4054_v23, 6  ;;  %v3428_v56 = vsel %vm2066_vm7, %v3427_v25, %v3426_v19  ;;  %v160_v62 = vmax.f32 %v158_v37, %v159_v28  ;;  %v179_v48 = vsel %vm129_vm0, %v5399_v27, -inf  ;;  %v5427_v23 = vld [vmem:[#allocation2 + $0x68] sm:$0xff] }
  0xcc   :  { %v3402_v18 = vsel %vm2069_vm8, %v3401_v14, %v3400_v1  ;;  %v3429_v59 = vrot.slane %v4056_v3, 6  ;;  %v134_v44 = vmax.f32 %v132_v7, %v133_v30  ;;  %v166_v15 = vrot.slane %v165_v12, 4  ;;  %v5425_v1 = vld [vmem:[#allocation2 + $0x60] sm:$0xff]  ;;  %7714 = vst [vmem:[#allocation8_spill] sm:$0xff] %v5427_v23 }
  0xcd   :  { %v3416_v54 = vsel %vm2069_vm8, %v3415_v51, %v3414_v43  ;;  %v3491_v46 = vmul.f32 %v3402_v18, %v5306_v53  ;;  %v147_v34 = vrot.slane %v146_v9, 2  ;;  %v173_v31 = vrot.slane %v172_v17, 4  ;;  %7713 = vst [vmem:[#allocation19_spill] sm:$0xff] %v5425_v1 }
  0xce   :  { %v3430_v60 = vsel %vm2069_vm8, %v3429_v59, %v3428_v56  ;;  %v3492_v8 = vmul.f32 %v3416_v54, %v5309_v21  ;;  %v141_v2 = vmax.f32 %v139_v58, %v140_v26  ;;  %v154_v53 = vrot.slane %v153_v38, 2 }
  0xcf   :  { %v3493_v50 = vmul.f32 %v3430_v60, %v5312_v22  ;;  %v3503_v5 = vmin.f32 %v3491_v46, 1.0  ;;  %v180_v4 = vrot.slane %v179_v48, 4  ;;  %v161_v6 = vrot.slane %v160_v62, 2 }
  0xd0   :  { %v3504_v13 = vmin.f32 %v3492_v8, 1.0  ;;  %v135_v37 = vrot.slane %v134_v44, 1  ;;  %v167_v21 = vmax.f32 %v165_v12, %v166_v15  ;;  %v186_v7 = vsel %vm129_vm0, %v5414_v49, -inf }
  0xd1   :  { %v3505_v0 = vmin.f32 %v3493_v50, %v7712_v52  ;;  %v3695_v63 = vmul.f32 %v3606_v29, %v3503_v5  ;;  %v148_v10 = vmax.f32 %v146_v9, %v147_v34  ;;  %v174_v58 = vmax.f32 %v172_v17, %v173_v31  ;;  %v5443_v31 = vld [vmem:[#allocation2 + $0x78] sm:$0xff] }
  0xd2   :  { %v3696_v42 = vmul.f32 %v3620_v61, %v3504_v13  ;;  %v142_v19 = vrot.slane %v141_v2, 1  ;;  %v155_v29 = vmax.f32 %v153_v38, %v154_v53  ;;  %v181_v36 = vmax.f32 %v179_v48, %v180_v4  ;;  %v5439_v48 = vld [vmem:[#allocation2 + $0x70] sm:$0xff]  ;;  %7716 = vst [vmem:[#allocation10_spill] sm:$0xff] %v5443_v31 }
  0xd3   :  { %v3697_v22 = vmul.f32 %v3634_v35, %v3505_v0  ;;  %v3707_v41 = vmax.f32 %v3695_v63, %v3491_v46  ;;  %v162_v25 = vmax.f32 %v160_v62, %v161_v6  ;;  %v187_v28 = vrot.slane %v186_v7, 4  ;;  %7715 = vst [vmem:[#allocation9_spill] sm:$0xff] %v5439_v48  ;;  %v5451_v6 = vld [vmem:[#allocation2 + $0x88] sm:$0xff] }
  0xd4   :  { %v3708_v57 = vmax.f32 %v3696_v42, %v3492_v8  ;;  %v168_v14 = vrot.slane %v167_v21, 2  ;;  %v193_v43 = vsel %vm129_vm0, %v5419_v47, -inf  ;;  %v200_v30 = vsel %vm129_vm0, %v5421_v20, -inf  ;;  %7718 = vst [vmem:[#allocation13_spill] sm:$0xff] %v5451_v6 }
  0xd5   :  { %v3709_v61 = vmax.f32 %v3697_v22, %v3493_v50  ;;  %v3719_v39 = vmin.f32 %v3707_v41, %v3503_v5  ;;  %v149_v3 = vrot.slane %v148_v10, 1  ;;  %v175_v51 = vrot.slane %v174_v58, 2 }
  0xd6   :  { %v3720_v35 = vmin.f32 %v3708_v57, %v3504_v13  ;;  %v207_v56 = vsel %vm129_vm0, %v5423_v11, -inf  ;;  %v156_v12 = vrot.slane %v155_v29, 1  ;;  %v182_v18 = vrot.slane %v181_v36, 2  ;;  %v5445_v13 = vld [vmem:[#allocation2 + $0x80] sm:$0xff] }
  0xd7   :  { %v3721_v26 = vmin.f32 %v3709_v61, %v3505_v0  ;;  %v214_v59 = vsel %vm129_vm0, %v5425_v1, -inf  ;;  %v188_v38 = vmax.f32 %v186_v7, %v187_v28  ;;  %v194_v17 = vrot.slane %v193_v43, 4  ;;  %7717 = vst [vmem:[#allocation12_spill] sm:$0xff] %v5445_v13 }
  0xd8   :  { %v3733_v9 = vadd.f32 %v3720_v35, %v3719_v39  ;;  %v201_v54 = vrot.slane %v200_v30, 4  ;;  %v221_v46 = vsel %vm129_vm0, %v5427_v23, -inf  ;;  %v163_v60 = vrot.slane %v162_v25, 1 }
  0xd9   :  { %v169_v8 = vmax.f32 %v167_v21, %v168_v14  ;;  %v208_v15 = vrot.slane %v207_v56, 4  ;;  %v5441_v50 = vmax.f32 %v134_v44, %v135_v37  ;;  %v176_v5 = vmax.f32 %v174_v58, %v175_v51  ;;  %v5455_v37 = vld [vmem:[#allocation2 + $0x90] sm:$0xff] }
  0xda   :  { %v3734_v62 = vadd.f32 %v3733_v9, %v3721_v26  ;;  %v215_v34 = vrot.slane %v214_v59, 4  ;;  %v5447_v53 = vmax.f32 %v141_v2, %v142_v19  ;;  %v5449_v4 = vmax.f32 %v148_v10, %v149_v3  ;;  %7719 = vst [vmem:[#allocation20_spill] sm:$0xff] %v5455_v37  ;;  %v5461_v10 = vld [vmem:[#allocation2 + $0x98] sm:$0xff] }
  0xdb   :  { %v183_v0 = vmax.f32 %v181_v36, %v182_v18  ;;  %v222_v63 = vrot.slane %v221_v46, 4  ;;  %v189_v42 = vrot.slane %v188_v38, 2  ;;  %v195_v21 = vmax.f32 %v193_v43, %v194_v17  ;;  %7720 = vst [vmem:[#allocation14_spill] sm:$0xff] %v5461_v10 }
  0xdc   :  { %3735 = vadd.xlane.f32.xlu1 %v3734_v62  ;;  %v202_v7 = vmax.f32 %v200_v30, %v201_v54  ;;  %v228_v44 = vsel %vm129_vm0, %v5439_v48, -inf  ;;  %v5457_v22 = vmax.f32 %v155_v29, %v156_v12  ;;  %v5459_v41 = vmax.f32 %v162_v25, %v163_v60  ;;  %v5469_v25 = vld [vmem:[#allocation2 + $0xa0] sm:$0xff]  ;;  %v5479_v54 = vld [vmem:[#allocation2 + $0xa8] sm:$0xff] }
  0xdd   :  { %v170_v2 = vrot.slane %v169_v8, 1  ;;  %v209_v58 = vmax.f32 %v207_v56, %v208_v15  ;;  %v177_v57 = vrot.slane %v176_v5, 1  ;;  %v216_v19 = vmax.f32 %v214_v59, %v215_v34  ;;  %7721 = vst [vmem:[#allocation15_spill] sm:$0xff] %v5469_v25  ;;  %7722 = vst [vmem:[#allocation21_spill] sm:$0xff] %v5479_v54 }
  0xde   :  { %v235_v36 = vsel %vm129_vm0, %v5443_v31, -inf  ;;  %v242_v61 = vsel %vm129_vm0, %v5445_v13, -inf  ;;  %v184_v39 = vrot.slane %v183_v0, 1  ;;  %v223_v28 = vmax.f32 %v221_v46, %v222_v63 }
  0xdf   :  { %v229_v35 = vrot.slane %v228_v44, 4  ;;  %v249_v29 = vsel %vm129_vm0, %v5451_v6, -inf  ;;  %v190_v14 = vmax.f32 %v188_v38, %v189_v42  ;;  %v196_v43 = vrot.slane %v195_v21, 2  ;;  %v5481_v38 = vld [vmem:[#allocation2 + $0xb0] sm:$0xff] }
  0xe0   :  { %v203_v30 = vrot.slane %v202_v7, 2  ;;  %v256_v26 = vsel %vm129_vm0, %v5455_v37, -inf  ;;  %v210_v3 = vrot.slane %v209_v58, 2  ;;  %v236_v51 = vrot.slane %v235_v36, 4  ;;  %7723 = vst [vmem:[#allocation16_spill] sm:$0xff] %v5481_v38 }
  0xe1   :  { %v243_v56 = vrot.slane %v242_v61, 4  ;;  %v263_v9 = vsel %vm129_vm0, %v5461_v10, -inf  ;;  %v5475_v12 = vmax.f32 %v169_v8, %v170_v2  ;;  %v5477_v18 = vmax.f32 %v176_v5, %v177_v57  ;;  %v5487_v2 = vld [vmem:[#allocation2 + $0xb8] sm:$0xff] }
  0xe2   :  { %v217_v59 = vrot.slane %v216_v19, 2  ;;  %v250_v17 = vrot.slane %v249_v29, 4  ;;  %v224_v46 = vrot.slane %v223_v28, 2  ;;  %v230_v62 = vmax.f32 %v228_v44, %v229_v35  ;;  %7724 = vst [vmem:[#allocation17_spill] sm:$0xff] %v5487_v2 }
  0xe3   :  { %v257_v60 = vrot.slane %v256_v26, 4  ;;  %v270_v15 = vsel %vm129_vm0, %v5469_v25, -inf  ;;  %v5485_v34 = vmax.f32 %v183_v0, %v184_v39  ;;  %v191_v63 = vrot.slane %v190_v14, 1 }
  0xe4   :  { %v197_v42 = vmax.f32 %v195_v21, %v196_v43  ;;  %v264_v8 = vrot.slane %v263_v9, 4  ;;  %v204_v5 = vmax.f32 %v202_v7, %v203_v30  ;;  %v211_v57 = vmax.f32 %v209_v58, %v210_v3 }
  0xe5   :  { %v237_v52 = vmax.f32 %v235_v36, %v236_v51  ;;  %v244_v10 = vmax.f32 %v242_v61, %v243_v56  ;;  %v251_v37 = vmax.f32 %v249_v29, %v250_v17  ;;  %v271_v6 = vrot.slane %v270_v15, 4 }
  0xe6   :  { %v277_v44 = vsel %vm129_vm0, %v5479_v54, -inf  ;;  %v284_v35 = vsel %vm129_vm0, %v5481_v38, -inf  ;;  %v218_v25 = vmax.f32 %v216_v19, %v217_v59  ;;  %v225_v0 = vmax.f32 %v223_v28, %v224_v46 }
  0xe7   :  { %v231_v39 = vrot.slane %v230_v62, 2  ;;  %v258_v13 = vmax.f32 %v256_v26, %v257_v60  ;;  %v265_v21 = vmax.f32 %v263_v9, %v264_v8  ;;  %v278_v43 = vrot.slane %v277_v44, 4 }
  0xe8   :  { %v285_v31 = vrot.slane %v284_v35, 4  ;;  %v291_v7 = vsel %vm129_vm0, %v5487_v2, -inf  ;;  %v198_v58 = vrot.slane %v197_v42, 1  ;;  %v205_v36 = vrot.slane %v204_v5, 1 }
  0xe9   :  { %v238_v61 = vrot.slane %v237_v52, 2  ;;  %v292_v29 = vrot.slane %v291_v7, 4  ;;  %v212_v30 = vrot.slane %v211_v57, 1  ;;  %v245_v3 = vrot.slane %v244_v10, 2 }
  0xea   :  { %v252_v51 = vrot.slane %v251_v37, 2  ;;  %v272_v56 = vmax.f32 %v270_v15, %v271_v6  ;;  %v219_v17 = vrot.slane %v218_v25, 1  ;;  %v232_v38 = vmax.f32 %v230_v62, %v231_v39 }
  0xeb   :  { %v259_v19 = vrot.slane %v258_v13, 2  ;;  %v279_v28 = vmax.f32 %v277_v44, %v278_v43  ;;  %v226_v59 = vrot.slane %v225_v0, 1  ;;  %v266_v26 = vrot.slane %v265_v21, 2 }
  0xec   :  { %v286_v9 = vmax.f32 %v284_v35, %v285_v31  ;;  %v293_v46 = vmax.f32 %v291_v7, %v292_v29  ;;  %v5495_v60 = vmax.f32 %v190_v14, %v191_v63  ;;  %v5497_v8 = vmax.f32 %v197_v42, %v198_v58 }
  0xed   :  { %v5499_v2 = vmax.f32 %v204_v5, %v205_v36  ;;  %v239_v54 = vmax.f32 %v237_v52, %v238_v61  ;;  %v5501_v48 = vmax.f32 %v211_v57, %v212_v30  ;;  %v246_v23 = vmax.f32 %v244_v10, %v245_v3 }
  0xee   :  { %v253_v1 = vmax.f32 %v251_v37, %v252_v51  ;;  %v273_v6 = vrot.slane %v272_v56, 2  ;;  %v5503_v15 = vmax.f32 %v218_v25, %v219_v17  ;;  %v233_v62 = vrot.slane %v232_v38, 1 }
  0xef   :  { %v260_v44 = vmax.f32 %v258_v13, %v259_v19  ;;  %v280_v39 = vrot.slane %v279_v28, 2  ;;  %v5505_v43 = vmax.f32 %v225_v0, %v226_v59  ;;  %v267_v31 = vmax.f32 %v265_v21, %v266_v26 }
  0xf0   :  { %v287_v14 = vrot.slane %v286_v9, 2  ;;  %v294_v63 = vrot.slane %v293_v46, 2  ;;  %v240_v42 = vrot.slane %v239_v54, 1  ;;  %v802_v5 = vsub.f32 %v5341_v33, %v5441_v50 }
  0xf1   :  { %v803_v52 = vsub.f32 %v5343_v40, %v5447_v53  ;;  %v804_v37 = vsub.f32 %v5362_v55, %v5449_v4  ;;  %v247_v10 = vrot.slane %v246_v23, 1  ;;  %v254_v25 = vrot.slane %v253_v1, 1 }
  0xf2   :  { %v274_v57 = vmax.f32 %v272_v56, %v273_v6  ;;  %v805_v13 = vsub.f32 %v5365_v24, %v5457_v22  ;;  %v234_v35 = vmax.f32 %v232_v38, %v233_v62  ;;  %v261_v0 = vrot.slane %v260_v44, 1 }
  0xf3   :  { %v281_v21 = vmax.f32 %v279_v28, %v280_v39  ;;  %v806_v7 = vsub.f32 %v5373_v16, %v5459_v41  ;;  %v268_v58 = vrot.slane %v267_v31, 1  ;;  %v288_v50 = vmax.f32 %v286_v9, %v287_v14  ;;  %v7725_v39 = vld [vmem:[#allocation19_spill] sm:$0xff] }
  0xf4   :  { %v295_v36 = vmax.f32 %v293_v46, %v294_v63  ;;  %v807_v53 = vsub.f32 %v5392_v45, %v5475_v12  ;;  %v241_v61 = vmax.f32 %v239_v54, %v240_v42  ;;  %v898_v4 = vmul.f32 1.442695, %v802_v5  ;;  %v7728_v5 = vld [vmem:[#allocation10_spill] sm:$0xff] }
  0xf5   :  { %v900_v29 = vmul.f32 1.442695, %v803_v52  ;;  %v902_v30 = vmul.f32 1.442695, %v804_v37  ;;  %v248_v3 = vmax.f32 %v246_v23, %v247_v10  ;;  %v255_v51 = vmax.f32 %v253_v1, %v254_v25  ;;  %v7729_v52 = vld [vmem:[#allocation12_spill] sm:$0xff] }
  0xf6   :  { %v275_v56 = vrot.slane %v274_v57, 1  ;;  %v904_v22 = vmul.f32 1.442695, %v805_v13  ;;  %v282_v38 = vrot.slane %v281_v21, 1  ;;  %v808_v17 = vsub.f32 %v5396_v32, %v5477_v18 }
  0xf7   :  { %4057 = vpow2.f32 %v898_v4  ;;  %v906_v41 = vmul.f32 1.442695, %v806_v7  ;;  %v289_v19 = vrot.slane %v288_v50, 1  ;;  %v296_v28 = vrot.slane %v295_v36, 1 }
  0xf8   :  { %4059 = vpow2.f32 %v900_v29  ;;  %v908_v59 = vmul.f32 1.442695, %v807_v53  ;;  %v262_v26 = vmax.f32 %v260_v44, %v261_v0  ;;  %v269_v12 = vmax.f32 %v267_v31, %v268_v58  ;;  %v7732_v0 = vld [vmem:[#allocation14_spill] sm:$0xff]  ;;  %v7736_v53 = vld [vmem:[#allocation17_spill] sm:$0xff] }
  0xf9   :  { %v809_v54 = vsub.f32 %v5399_v27, %v5485_v34  ;;  %4061 = vpow2.f32 %v902_v30  ;;  %v276_v23 = vmax.f32 %v274_v57, %v275_v56  ;;  %v810_v1 = vsub.f32 %v5414_v49, %v5495_v60  ;;  %v7726_v60 = vld [vmem:[#allocation8_spill] sm:$0xff] }
  0xfa   :  { %v811_v9 = vsub.f32 %v5419_v47, %v5497_v8  ;;  %4063 = vpow2.f32 %v904_v22  ;;  %v812_v18 = vsub.f32 %v5421_v20, %v5499_v2  ;;  %v813_v46 = vsub.f32 %v5423_v11, %v5501_v48  ;;  %v7727_v8 = vld [vmem:[#allocation9_spill] sm:$0xff]  ;;  %v7731_v57 = vld [vmem:[#allocation20_spill] sm:$0xff] }
  0xfb   :  { %4065 = vpow2.f32 %v906_v41  ;;  %v910_v6 = vmul.f32 1.442695, %v808_v17  ;;  %v283_v62 = vmax.f32 %v281_v21, %v282_v38  ;;  %v290_v44 = vmax.f32 %v288_v50, %v289_v19  ;;  %v7730_v48 = vld [vmem:[#allocation13_spill] sm:$0xff] }
  0xfc   :  { %v297_v34 = vmax.f32 %v295_v36, %v296_v28  ;;  %4067 = vpow2.f32 %v908_v59  ;;  %v814_v31 = vsub.f32 %v7725_v39, %v5503_v15  ;;  %v815_v14 = vsub.f32 %v7726_v60, %v5505_v43  ;;  %v7733_v15 = vld [vmem:[#allocation15_spill] sm:$0xff]  ;;  %v7734_v50 = vld [vmem:[#allocation21_spill] sm:$0xff]  ;;  %v7735_v36 = vld [vmem:[#allocation16_spill] sm:$0xff] }
  0xfd   :  { %v816_v63 = vsub.f32 %v7727_v8, %v234_v35  ;;  %v912_v42 = vmul.f32 1.442695, %v809_v54  ;;  %v817_v2 = vsub.f32 %v7728_v5, %v241_v61  ;;  %v818_v37 = vsub.f32 %v7729_v52, %v248_v3 }
  0xfe   :  { %v819_v10 = vsub.f32 %v7730_v48, %v255_v51  ;;  %v914_v25 = vmul.f32 1.442695, %v810_v1  ;;  %v820_v13 = vsub.f32 %v7731_v57, %v262_v26  ;;  %v821_v21 = vsub.f32 %v7732_v0, %v269_v12 }
  0xff   :  { %4069 = vpow2.f32 %v910_v6  ;;  %v916_v7 = vmul.f32 1.442695, %v811_v9  ;;  %v822_v58 = vsub.f32 %v7733_v15, %v276_v23  ;;  %v823_v43 = vsub.f32 %v7734_v50, %v283_v62 }
 0x100   :  { %v824_v35 = vsub.f32 %v7735_v36, %v290_v44  ;;  %v825_v4 = vsub.f32 %v7736_v53, %v297_v34  ;;  %4071 = vpow2.f32 %v912_v42  ;;  %v918_v61 = vmul.f32 1.442695, %v812_v18 }
 0x101   :  { %v920_v29 = vmul.f32 1.442695, %v813_v46  ;;  %v922_v30 = vmul.f32 1.442695, %v814_v31  ;;  %4073 = vpow2.f32 %v914_v25  ;;  %v924_v3 = vmul.f32 1.442695, %v815_v14 }
 0x102   :  { %v926_v51 = vmul.f32 1.442695, %v816_v63  ;;  %v928_v56 = vmul.f32 1.442695, %v817_v2  ;;  %4075 = vpow2.f32 %v916_v7  ;;  %v930_v22 = vmul.f32 1.442695, %v818_v37 }
 0x103   :  { %v5545_v38 = vmul.f32 1.442695, %v819_v10  ;;  %v5547_v17 = vmul.f32 1.442695, %v820_v13  ;;  %v5551_v19 = vmul.f32 1.442695, %v821_v21  ;;  %4077 = vpow2.f32 %v918_v61 }
 0x104   :  { %v5549_v41 = vpop.eup %4057  ;;  %v5553_v28 = vmul.f32 1.442695, %v822_v58  ;;  %v5555_v59 = vmul.f32 1.442695, %v823_v43  ;;  %v5559_v12 = vmul.f32 1.442695, %v824_v35  ;;  %4079 = vpow2.f32 %v920_v29 }
 0x105   :  { %7737 = vst [vmem:[#allocation22_spill] sm:$0xff] %v5549_v41  ;;  %v5557_v26 = vpop.eup %4059  ;;  %v5561_v54 = vmul.f32 1.442695, %v825_v4  ;;  %v1090_v62 = vsel %vm129_vm0, %v5549_v41, 0.0  ;;  %4081 = vpow2.f32 %v922_v30  ;;  %v7756_v53 = vrot.slane %v5343_v40, 7 }
 0x106   :  { %7738 = vst [vmem:[#allocation18_spill] sm:$0xff] %v5557_v26  ;;  %v5564_v1 = vpop.eup %4061  ;;  %v1097_v44 = vsel %vm129_vm0, %v5557_v26, 0.0  ;;  %v1091_v7 = vrot.slane %v1090_v62, 4  ;;  %4083 = vpow2.f32 %v924_v3 }
 0x107   :  { %7739 = vst [vmem:[#allocation25_spill] sm:$0xff] %v5564_v1  ;;  %v5569_v6 = vpop.eup %4063  ;;  %v1104_v10 = vsel %vm129_vm0, %v5564_v1, 0.0  ;;  %v1098_v58 = vrot.slane %v1097_v44, 4  ;;  %4085 = vpow2.f32 %v926_v51  ;;  %v5660_v36 = vsub.f32 %v5343_v40, %v7756_v53 }
 0x108   :  { %7740 = vst [vmem:[#allocation23_spill] sm:$0xff] %v5569_v6  ;;  %v5576_v31 = vpop.eup %4065  ;;  %v1111_v25 = vsel %vm129_vm0, %v5569_v6, 0.0  ;;  %v1105_v21 = vrot.slane %v1104_v10, 4  ;;  %v1092_v29 = vadd.f32 %v1091_v7, %v1090_v62  ;;  %4087 = vpow2.f32 %v928_v56 }
 0x109   :  { %7741 = vst [vmem:[#allocation24_spill] sm:$0xff] %v5576_v31  ;;  %v5582_v37 = vpop.eup %4067  ;;  %v1118_v43 = vsel %vm129_vm0, %v5576_v31, 0.0  ;;  %v1112_v13 = vrot.slane %v1111_v25, 4  ;;  %v1099_v61 = vadd.f32 %v1098_v58, %v1097_v44  ;;  %4089 = vpow2.f32 %v930_v22  ;;  %7757 = vst [vmem:[#allocation39_spill] sm:$0xff] %v5660_v36 }
 0x10a   :  { %7742 = vst [vmem:[#allocation26_spill] sm:$0xff] %v5582_v37  ;;  %v1125_v4 = vsel %vm129_vm0, %v5582_v37, 0.0  ;;  %v1119_v14 = vrot.slane %v1118_v43, 4  ;;  %v1106_v46 = vadd.f32 %v1105_v21, %v1104_v10  ;;  %4091 = vpow2.f32 %v5545_v38 }
 0x10b   :  { %v1126_v2 = vrot.slane %v1125_v4, 4  ;;  %v1113_v35 = vadd.f32 %v1112_v13, %v1111_v25  ;;  %v1093_v44 = vrot.slane %v1092_v29, 2  ;;  %v1100_v7 = vrot.slane %v1099_v61, 2 }
 0x10c   :  { %v5598_v42 = vpop.eup %4069  ;;  %v1120_v3 = vadd.f32 %v1119_v14, %v1118_v43  ;;  %4093 = vpow2.f32 %v5547_v17  ;;  %v1107_v10 = vrot.slane %v1106_v46, 2 }
 0x10d   :  { %7743 = vst [vmem:[#allocation27_spill] sm:$0xff] %v5598_v42  ;;  %v5604_v18 = vpop.eup %4071  ;;  %v1132_v30 = vsel %vm129_vm0, %v5598_v42, 0.0  ;;  %v1127_v58 = vadd.f32 %v1126_v2, %v1125_v4  ;;  %v1114_v25 = vrot.slane %v1113_v35, 2  ;;  %4095 = vpow2.f32 %v5551_v19 }
 0x10e   :  { %7744 = vst [vmem:[#allocation28_spill] sm:$0xff] %v5604_v18  ;;  %v5606_v9 = vpop.eup %4073  ;;  %v1133_v37 = vrot.slane %v1132_v30, 4  ;;  %v1139_v62 = vsel %vm129_vm0, %v5604_v18, 0.0  ;;  %v1121_v2 = vrot.slane %v1120_v3, 2  ;;  %4097 = vpow2.f32 %v5553_v28 }
 0x10f   :  { %7745 = vst [vmem:[#allocation29_spill] sm:$0xff] %v5606_v9  ;;  %v5612_v23 = vpop.eup %4075  ;;  %v1140_v31 = vrot.slane %v1139_v62, 4  ;;  %v1146_v56 = vsel %vm129_vm0, %v5606_v9, 0.0  ;;  %v1094_v21 = vadd.f32 %v1093_v44, %v1092_v29  ;;  %v1128_v43 = vrot.slane %v1127_v58, 2 }
 0x110   :  { %7746 = vst [vmem:[#allocation30_spill] sm:$0xff] %v5612_v23  ;;  %v5618_v63 = vpop.eup %4077  ;;  %v1134_v34 = vadd.f32 %v1133_v37, %v1132_v30  ;;  %v1153_v22 = vsel %vm129_vm0, %v5612_v23, 0.0  ;;  %v1147_v38 = vrot.slane %v1146_v56, 4  ;;  %v1101_v30 = vadd.f32 %v1100_v7, %v1099_v61 }
 0x111   :  { %7747 = vst [vmem:[#allocation31_spill] sm:$0xff] %v5618_v63  ;;  %v5624_v14 = vpop.eup %4079  ;;  %v1154_v13 = vrot.slane %v1153_v22, 4  ;;  %v1160_v4 = vsel %vm129_vm0, %v5618_v63, 0.0  ;;  %v1141_v23 = vadd.f32 %v1140_v31, %v1139_v62  ;;  %4099 = vpow2.f32 %v5555_v59 }
 0x112   :  { %7748 = vst [vmem:[#allocation32_spill] sm:$0xff] %v5624_v14  ;;  %v1135_v51 = vrot.slane %v1134_v34, 2  ;;  %v1167_v17 = vsel %vm129_vm0, %v5624_v14, 0.0  ;;  %v1108_v19 = vadd.f32 %v1107_v10, %v1106_v46  ;;  %v1115_v9 = vadd.f32 %v1114_v25, %v1113_v35  ;;  %v5635_v42 = vpop.eup %4081 }
 0x113   :  { %v1148_v18 = vadd.f32 %v1147_v38, %v1146_v56  ;;  %7749 = vst [vmem:[#allocation33_spill] sm:$0xff] %v5635_v42  ;;  %v1122_v37 = vadd.f32 %v1121_v2, %v1120_v3  ;;  %v1155_v28 = vadd.f32 %v1154_v13, %v1153_v22  ;;  %v1161_v29 = vrot.slane %v1160_v4, 4  ;;  %v5639_v62 = vpop.eup %4083 }
 0x114   :  { %4101 = vpow2.f32 %v5559_v12  ;;  %v1095_v61 = vrot.slane %v1094_v21, 1  ;;  %v1129_v7 = vadd.f32 %v1128_v43, %v1127_v58  ;;  %v1168_v31 = vrot.slane %v1167_v17, 4  ;;  %7750 = vst [vmem:[#allocation34_spill] sm:$0xff] %v5639_v62  ;;  %v5642_v56 = vpop.eup %4085 }
 0x115   :  { %4103 = vpow2.f32 %v5561_v54  ;;  %v1102_v59 = vrot.slane %v1101_v30, 1  ;;  %v1136_v46 = vadd.f32 %v1135_v51, %v1134_v34  ;;  %v1142_v35 = vrot.slane %v1141_v23, 2  ;;  %7751 = vst [vmem:[#allocation35_spill] sm:$0xff] %v5642_v56  ;;  %v5646_v38 = vpop.eup %4087 }
 0x116   :  { %v1109_v10 = vrot.slane %v1108_v19, 1  ;;  %v1116_v3 = vrot.slane %v1115_v9, 1  ;;  %v1149_v22 = vrot.slane %v1148_v18, 2  ;;  %v1174_v25 = vsel %vm129_vm0, %v5635_v42, 0.0  ;;  %7752 = vst [vmem:[#allocation36_spill] sm:$0xff] %v5646_v38  ;;  %v5653_v34 = vpop.eup %4089 }
 0x117   :  { %v1123_v12 = vrot.slane %v1122_v37, 1  ;;  %v1156_v58 = vrot.slane %v1155_v28, 2  ;;  %v1162_v2 = vadd.f32 %v1161_v29, %v1160_v4  ;;  %v7753_v13 = vrot.slane %v5341_v33, 7  ;;  %7755 = vst [vmem:[#allocation38_spill] sm:$0xff] %v5653_v34  ;;  %v5662_v42 = vpop.eup %4091 }
 0x118   :  { %v5655_v51 = vadd.f32 %v1095_v61, %v1094_v21  ;;  %v1130_v43 = vrot.slane %v1129_v7, 1  ;;  %v1169_v44 = vadd.f32 %v1168_v31, %v1167_v17  ;;  %7758 = vst [vmem:[#allocation40_spill] sm:$0xff] %v5662_v42  ;;  %v1137_v14 = vrot.slane %v1136_v46, 1 }
 0x119   :  { %v5651_v54 = vsub.f32 %v5341_v33, %v7753_v13  ;;  %v1143_v4 = vadd.f32 %v1142_v35, %v1141_v23  ;;  %v1175_v29 = vrot.slane %v1174_v25, 4  ;;  %v1181_v33 = vsel %vm129_vm0, %v5639_v62, 0.0  ;;  %v5672_v61 = vpop.eup %4093 }
 0x11a   :  { %v5666_v13 = vadd.f32 %v1102_v59, %v1101_v30  ;;  %v5668_v63 = vadd.f32 %v1109_v10, %v1108_v19  ;;  %v5670_v21 = vadd.f32 %v1116_v3, %v1115_v9  ;;  %v1150_v17 = vadd.f32 %v1149_v22, %v1148_v18  ;;  %7759 = vst [vmem:[#allocation42_spill] sm:$0xff] %v5672_v61  ;;  %v5678_v35 = vpop.eup %4095 }
 0x11b   :  { %7754 = vst [vmem:[#allocation37_spill] sm:$0xff] %v5651_v54  ;;  %v5674_v31 = vadd.f32 %v1123_v12, %v1122_v37  ;;  %v1157_v40 = vadd.f32 %v1156_v58, %v1155_v28  ;;  %v1163_v53 = vrot.slane %v1162_v2, 2  ;;  %v1188_v23 = vsel %vm129_vm0, %v5642_v56, 0.0  ;;  %7760 = vst [vmem:[#allocation41_spill] sm:$0xff] %v5678_v35  ;;  %v5684_v19 = vpop.eup %4097 }
 0x11c   :  { %v5680_v6 = vadd.f32 %v1130_v43, %v1129_v7  ;;  %v1170_v30 = vrot.slane %v1169_v44, 2  ;;  %v1182_v59 = vrot.slane %v1181_v33, 4  ;;  %v1195_v9 = vsel %vm129_vm0, %v5646_v38, 0.0  ;;  %7761 = vst [vmem:[#allocation19_spill] sm:$0xff] %v5684_v19 }
 0x11d   :  { %v5686_v18 = vadd.f32 %v1137_v14, %v1136_v46  ;;  %v1144_v37 = vrot.slane %v1143_v4, 1  ;;  %v1176_v10 = vadd.f32 %v1175_v29, %v1174_v25  ;;  %v1202_v28 = vsel %vm129_vm0, %v5653_v34, 0.0 }
 0x11e   :  { %v1151_v3 = vrot.slane %v1150_v17, 1  ;;  %v1189_v22 = vrot.slane %v1188_v23, 4  ;;  %v1209_v7 = vsel %vm129_vm0, %v5662_v42, 0.0  ;;  %v1216_v12 = vsel %vm129_vm0, %v5672_v61, 0.0  ;;  %v5694_v58 = vpop.eup %4099 }
 0x11f   :  { %7762 = vst [vmem:[#allocation8_spill] sm:$0xff] %v5694_v58  ;;  %v1158_v43 = vrot.slane %v1157_v40, 1  ;;  %v1164_v38 = vadd.f32 %v1163_v53, %v1162_v2  ;;  %v1196_v56 = vrot.slane %v1195_v9, 4  ;;  %v1223_v14 = vsel %vm129_vm0, %v5678_v35, 0.0 }
 0x120   :  { %v1171_v46 = vadd.f32 %v1170_v30, %v1169_v44  ;;  %v1183_v25 = vadd.f32 %v1182_v59, %v1181_v33  ;;  %v1203_v29 = vrot.slane %v1202_v28, 4  ;;  %v1230_v34 = vsel %vm129_vm0, %v5684_v19, 0.0 }
 0x121   :  { %v5700_v62 = vpop.eup %4101  ;;  %v1145_v42 = vadd.f32 %v1144_v37, %v1143_v4  ;;  %v1177_v50 = vrot.slane %v1176_v10, 2  ;;  %v1210_v1 = vrot.slane %v1209_v7, 4  ;;  %v1217_v61 = vrot.slane %v1216_v12, 4 }
 0x122   :  { %v5702_v15 = vpop.eup %4103  ;;  %v1152_v26 = vadd.f32 %v1151_v3, %v1150_v17  ;;  %v1190_v2 = vadd.f32 %v1189_v22, %v1188_v23  ;;  %v1224_v53 = vrot.slane %v1223_v14, 4  ;;  %v1237_v35 = vsel %vm129_vm0, %v5694_v58, 0.0 }
 0x123   :  { %v1159_v44 = vadd.f32 %v1158_v43, %v1157_v40  ;;  %v1165_v33 = vrot.slane %v1164_v38, 1  ;;  %v1197_v30 = vadd.f32 %v1196_v56, %v1195_v9  ;;  %v1231_v59 = vrot.slane %v1230_v34, 4 }
 0x124   :  { %v1172_v0 = vrot.slane %v1171_v46, 1  ;;  %v1184_v19 = vrot.slane %v1183_v25, 2  ;;  %v1204_v41 = vadd.f32 %v1203_v29, %v1202_v28  ;;  %v1244_v4 = vsel %vm129_vm0, %v5700_v62, 0.0 }
 0x125   :  { %v1178_v37 = vadd.f32 %v1177_v50, %v1176_v10  ;;  %v1211_v36 = vadd.f32 %v1210_v1, %v1209_v7  ;;  %v1218_v57 = vadd.f32 %v1217_v61, %v1216_v12  ;;  %v1238_v48 = vrot.slane %v1237_v35, 4 }
 0x126   :  { %v1191_v17 = vrot.slane %v1190_v2, 2  ;;  %v1225_v23 = vadd.f32 %v1224_v53, %v1223_v14  ;;  %v1245_v3 = vrot.slane %v1244_v4, 4  ;;  %v1251_v22 = vsel %vm129_vm0, %v5702_v15, 0.0 }
 0x127   :  { %v1166_v40 = vadd.f32 %v1165_v33, %v1164_v38  ;;  %v1198_v43 = vrot.slane %v1197_v30, 2  ;;  %v1232_v56 = vadd.f32 %v1231_v59, %v1230_v34  ;;  %v1252_v9 = vrot.slane %v1251_v22, 4 }
 0x128   :  { %v1173_v58 = vadd.f32 %v1172_v0, %v1171_v46  ;;  %v1185_v54 = vadd.f32 %v1184_v19, %v1183_v25  ;;  %v1205_v28 = vrot.slane %v1204_v41, 2  ;;  %4105 = vrcp.f32 %v5655_v51 }
 0x129   :  { %v1212_v29 = vrot.slane %v1211_v36, 2  ;;  %v1219_v50 = vrot.slane %v1218_v57, 2  ;;  %v1239_v1 = vadd.f32 %v1238_v48, %v1237_v35  ;;  %4107 = vrcp.f32 %v5666_v13 }
 0x12a   :  { %v1192_v61 = vadd.f32 %v1191_v17, %v1190_v2  ;;  %v1226_v10 = vrot.slane %v1225_v23, 2  ;;  %v1246_v7 = vadd.f32 %v1245_v3, %v1244_v4  ;;  %4109 = vrcp.f32 %v5668_v63  ;;  %v4633_v3 = vld [vmem:[#allocation2 + $0x10] sm:$0xff] }
 0x12b   :  { %v1199_v12 = vadd.f32 %v1198_v43, %v1197_v30  ;;  %v1233_v38 = vrot.slane %v1232_v56, 2  ;;  %v1253_v14 = vadd.f32 %v1252_v9, %v1251_v22  ;;  %4111 = vrcp.f32 %v5670_v21 }
 0x12c   :  { %v1179_v0 = vrot.slane %v1178_v37, 1  ;;  %v1186_v34 = vrot.slane %v1185_v54, 1  ;;  %v1206_v19 = vadd.f32 %v1205_v28, %v1204_v41  ;;  %4113 = vrcp.f32 %v5674_v31 }
 0x12d   :  { %v1213_v51 = vadd.f32 %v1212_v29, %v1211_v36  ;;  %v1220_v46 = vadd.f32 %v1219_v50, %v1218_v57  ;;  %v1240_v48 = vrot.slane %v1239_v1, 2  ;;  %4115 = vrcp.f32 %v5680_v6 }
 0x12e   :  { %v1193_v13 = vrot.slane %v1192_v61, 1  ;;  %v1227_v35 = vadd.f32 %v1226_v10, %v1225_v23  ;;  %v1247_v25 = vrot.slane %v1246_v7, 2  ;;  %4117 = vrcp.f32 %v5686_v18 }
 0x12f   :  { %v1200_v63 = vrot.slane %v1199_v12, 1  ;;  %v1234_v2 = vadd.f32 %v1233_v38, %v1232_v56  ;;  %v1254_v53 = vrot.slane %v1253_v14, 2  ;;  %4119 = vrcp.f32 %v1145_v42 }
 0x130   :  { %v1180_v21 = vadd.f32 %v1179_v0, %v1178_v37  ;;  %v1187_v33 = vadd.f32 %v1186_v34, %v1185_v54  ;;  %v1207_v30 = vrot.slane %v1206_v19, 1  ;;  %4121 = vrcp.f32 %v1152_v26  ;;  %v4634_v37 = vld [vmem:[#allocation2 + $0x18] sm:$0xff] }
 0x131   :  { %v1214_v41 = vrot.slane %v1213_v51, 1  ;;  %v1221_v31 = vrot.slane %v1220_v46, 1  ;;  %v1241_v36 = vadd.f32 %v1240_v48, %v1239_v1  ;;  %4123 = vrcp.f32 %v1159_v44 }
 0x132   :  { %v1194_v57 = vadd.f32 %v1193_v13, %v1192_v61  ;;  %v1228_v59 = vrot.slane %v1227_v35, 1  ;;  %v1248_v6 = vadd.f32 %v1247_v25, %v1246_v7  ;;  %4125 = vrcp.f32 %v1166_v40  ;;  %v4636_v7 = vld [vmem:[#allocation2 + $0x28] sm:$0xff] }
 0x133   :  { %v1201_v4 = vadd.f32 %v1200_v63, %v1199_v12  ;;  %v1235_v17 = vrot.slane %v1234_v2, 1  ;;  %v1255_v23 = vadd.f32 %v1254_v53, %v1253_v14  ;;  %4127 = vrcp.f32 %v1173_v58  ;;  %v4635_v58 = vld [vmem:[#allocation2 + $0x20] sm:$0xff]  ;;  %v4637_v14 = vld [vmem:[#allocation2 + $0x30] sm:$0xff] }
 0x134   :  { %v1208_v18 = vadd.f32 %v1207_v30, %v1206_v19  ;;  %4129 = vrcp.f32 %v1180_v21  ;;  %v7763_v42 = vrot.slane %v5362_v55, 7  ;;  %v7764_v26 = vrot.slane %v5365_v24, 7 }
 0x135   :  { %v4106_v43 = vpop.eup %4105  ;;  %v1215_v44 = vadd.f32 %v1214_v41, %v1213_v51  ;;  %v1222_v56 = vadd.f32 %v1221_v31, %v1220_v46  ;;  %v1242_v9 = vrot.slane %v1241_v36, 1  ;;  %4131 = vrcp.f32 %v1187_v33 }
 0x136   :  { %v2539_v54 = vsub.f32 %v4633_v3, %v7763_v42  ;;  %v2540_v22 = vsub.f32 %v4634_v37, %v7764_v26  ;;  %v4108_v40 = vpop.eup %4107  ;;  %v1229_v28 = vadd.f32 %v1228_v59, %v1227_v35  ;;  %v1249_v29 = vrot.slane %v1248_v6, 1 }
 0x137   :  { %4133 = vrcp.f32 %v1194_v57  ;;  %v7765_v50 = vrot.slane %v5373_v16, 7  ;;  %v4110_v61 = vpop.eup %4109  ;;  %v1236_v55 = vadd.f32 %v1235_v17, %v1234_v2  ;;  %v1256_v10 = vrot.slane %v1255_v23, 1  ;;  %v7779_v17 = vld [vmem:[#allocation13_spill] sm:$0xff] }
 0x138   :  { %4135 = vrcp.f32 %v1201_v4  ;;  %v7766_v24 = vrot.slane %v5392_v45, 7  ;;  %v4112_v38 = vpop.eup %4111  ;;  %v7767_v0 = vrot.slane %v5396_v32, 7  ;;  %v7768_v19 = vrot.slane %v5399_v27, 7 }
 0x139   :  { %v2541_v1 = vsub.f32 %v4635_v58, %v7765_v50  ;;  %4137 = vrcp.f32 %v1208_v18  ;;  %v7769_v16 = vrot.slane %v5414_v49, 7  ;;  %v4114_v48 = vpop.eup %4113  ;;  %v1243_v13 = vadd.f32 %v1242_v9, %v1241_v36  ;;  %v7781_v18 = vld [vmem:[#allocation20_spill] sm:$0xff]  ;;  %v7787_v50 = vld [vmem:[#allocation18_spill] sm:$0xff] }
 0x13a   :  { %v2542_v12 = vsub.f32 %v4636_v7, %v7766_v24  ;;  %v2543_v34 = vsub.f32 %v4637_v14, %v7767_v0  ;;  %v2544_v51 = vsub.f32 %v5399_v27, %v7768_v19  ;;  %4139 = vrcp.f32 %v1215_v44  ;;  %v4116_v63 = vpop.eup %4115 }
 0x13b   :  { %v2545_v46 = vsub.f32 %v5414_v49, %v7769_v16  ;;  %v7770_v45 = vrot.slane %v5419_v47, 7  ;;  %v7771_v25 = vrot.slane %v5421_v20, 7  ;;  %v1250_v2 = vadd.f32 %v1249_v29, %v1248_v6  ;;  %v4118_v33 = vpop.eup %4117  ;;  %v7778_v6 = vld [vmem:[#allocation37_spill] sm:$0xff] }
 0x13c   :  { %4141 = vrcp.f32 %v1222_v56  ;;  %v7772_v27 = vrot.slane %v5423_v11, 7  ;;  %v7773_v49 = vrot.slane %v7725_v39, 7  ;;  %v7774_v30 = vrot.slane %v7726_v60, 7  ;;  %v7785_v56 = vld [vmem:[#allocation14_spill] sm:$0xff]  ;;  %v7791_v16 = vld [vmem:[#allocation21_spill] sm:$0xff] }
 0x13d   :  { %v2546_v35 = vsub.f32 %v5419_v47, %v7770_v45  ;;  %v5739_v32 = vsub.f32 %v5421_v20, %v7771_v25  ;;  %v1257_v47 = vadd.f32 %v1256_v10, %v1255_v23  ;;  %4143 = vrcp.f32 %v1229_v28  ;;  %v7788_v10 = vld [vmem:[#allocation15_spill] sm:$0xff] }
 0x13e   :  { %v5744_v53 = vsub.f32 %v5423_v11, %v7772_v27  ;;  %v5749_v21 = vsub.f32 %v7725_v39, %v7773_v49  ;;  %v5754_v20 = vsub.f32 %v7726_v60, %v7774_v30  ;;  %v7775_v41 = vrot.slane %v7727_v8, 7  ;;  %v4120_v11 = vpop.eup %4119 }
 0x13f   :  { %4145 = vrcp.f32 %v1236_v55  ;;  %v7776_v36 = vrot.slane %v7728_v5, 7  ;;  %v7777_v57 = vrot.slane %v7729_v52, 7  ;;  %v3762_v60 = vmul.f32 -1.442695, %v7778_v6  ;;  %v4122_v4 = vpop.eup %4121 }
 0x140   :  { %v5759_v31 = vsub.f32 %v7727_v8, %v7775_v41  ;;  %4147 = vrcp.f32 %v1243_v13  ;;  %v7780_v23 = vrot.slane %v7779_v17, 7  ;;  %v7782_v3 = vrot.slane %v7781_v18, 7  ;;  %v4124_v26 = vpop.eup %4123 }
 0x141   :  { %v5764_v39 = vsub.f32 %v7728_v5, %v7776_v36  ;;  %v5769_v59 = vsub.f32 %v7729_v52, %v7777_v57  ;;  %v7783_v5 = vld [vmem:[#allocation39_spill] sm:$0xff]  ;;  %4149 = vrcp.f32 %v1250_v2  ;;  %v7784_v52 = vld [vmem:[#allocation22_spill] sm:$0xff]  ;;  %v7786_v9 = vrot.slane %v7785_v56, 7  ;;  %v4126_v58 = vpop.eup %4125  ;;  %v7795_v57 = vld [vmem:[#allocation24_spill] sm:$0xff] }
 0x142   :  { %v5775_v8 = vsub.f32 %v7779_v17, %v7780_v23  ;;  %v5780_v42 = vsub.f32 %v7781_v18, %v7782_v3  ;;  %v3763_v37 = vmul.f32 -1.442695, %v7783_v5  ;;  %v5784_v44 = vmul.f32 %v4106_v43, %v7784_v52  ;;  %v4128_v0 = vpop.eup %4127  ;;  %v7790_v43 = vld [vmem:[#allocation25_spill] sm:$0xff] }
 0x143   :  { %v5789_v28 = vsub.f32 %v7785_v56, %v7786_v9  ;;  %v3764_v29 = vmul.f32 -1.442695, %v2539_v54  ;;  %4151 = vrcp.f32 %v1257_v47  ;;  %v5792_v55 = vmul.f32 %v4108_v40, %v7787_v50  ;;  %v4130_v25 = vpop.eup %4129  ;;  %v7793_v47 = vld [vmem:[#allocation23_spill] sm:$0xff]  ;;  %v7798_v18 = vld [vmem:[#allocation29_spill] sm:$0xff] }
 0x144   :  { %v7789_v7 = vrot.slane %v7788_v10, 7  ;;  %v3765_v14 = vmul.f32 -1.442695, %v2540_v22  ;;  %v5800_v19 = vmul.f32 %v4110_v61, %v7790_v43  ;;  %v7792_v13 = vrot.slane %v7791_v16, 7  ;;  %v4132_v49 = vpop.eup %4131  ;;  %v7794_v22 = vld [vmem:[#allocation27_spill] sm:$0xff] }
 0x145   :  { %4153 = vpow2.f32 %v3762_v60  ;;  %v3766_v54 = vmul.f32 -1.442695, %v2541_v1  ;;  %v3767_v40 = vmul.f32 -1.442695, %v2542_v12  ;;  %v3768_v2 = vmul.f32 -1.442695, %v2543_v34  ;;  %v4134_v36 = vpop.eup %4133 }
 0x146   :  { %v5797_v24 = vsub.f32 %v7788_v10, %v7789_v7  ;;  %v5805_v45 = vsub.f32 %v7791_v16, %v7792_v13  ;;  %4155 = vpow2.f32 %v3763_v37  ;;  %v3769_v27 = vmul.f32 -1.442695, %v2544_v51  ;;  %v4136_v34 = vpop.eup %4135  ;;  %v7796_v51 = vld [vmem:[#allocation26_spill] sm:$0xff]  ;;  %v7800_v9 = vld [vmem:[#allocation31_spill] sm:$0xff]  ;;  %v7801_v16 = vld [vmem:[#allocation32_spill] sm:$0xff] }
 0x147   :  { %v5808_v30 = vmul.f32 %v4112_v38, %v7793_v47  ;;  %v5811_v41 = vmul.f32 %v4118_v33, %v7794_v22  ;;  %v2050_v61 = vrot.slane %v5784_v44, 1  ;;  %4157 = vpow2.f32 %v3764_v29  ;;  %v7797_v38 = vld [vmem:[#allocation28_spill] sm:$0xff]  ;;  %v4138_v23 = vpop.eup %4137 }
 0x148   :  { %v5815_v6 = vmul.f32 %v4114_v48, %v7795_v57  ;;  %v2071_v1 = vrot.slane %v5792_v55, 1  ;;  %4159 = vpow2.f32 %v3765_v14  ;;  %v3770_v12 = vmul.f32 -1.442695, %v2545_v46  ;;  %v7799_v48 = vld [vmem:[#allocation30_spill] sm:$0xff]  ;;  %v5831_v46 = vpop.eup %4139 }
 0x149   :  { %v5819_v60 = vmul.f32 %v4116_v63, %v7796_v51  ;;  %v5822_v17 = vmul.f32 %v4120_v11, %v7797_v38  ;;  %v2085_v33 = vrot.slane %v5800_v19, 1  ;;  %4161 = vpow2.f32 %v3766_v54  ;;  %v5837_v56 = vpop.eup %4141  ;;  %v7807_v38 = vld [vmem:[#allocation34_spill] sm:$0xff] }
 0x14a   :  { %v5826_v3 = vmul.f32 %v4122_v4, %v7798_v18  ;;  %v5829_v5 = vmul.f32 %v4124_v26, %v7799_v48  ;;  %4163 = vpow2.f32 %v3767_v40  ;;  %v3771_v37 = vmul.f32 -1.442695, %v2546_v35  ;;  %v5845_v29 = vpop.eup %4143 }
 0x14b   :  { %v2052_v63 = vsel %vm2051_vm2, %v5808_v30, %v2050_v61  ;;  %v2053_v11 = vrot.slane %v5811_v41, 7  ;;  %4165 = vpow2.f32 %v3768_v2  ;;  %v3772_v52 = vmul.f32 -1.442695, %v5739_v32  ;;  %v7802_v2 = vld [vmem:[#allocation33_spill] sm:$0xff]  ;;  %v7803_v61 = vld [vmem:[#allocation16_spill] sm:$0xff] }
 0x14c   :  { %v5840_v4 = vmul.f32 %v4126_v58, %v7800_v9  ;;  %v2072_v26 = vsel %vm2051_vm2, %v5815_v6, %v2071_v1  ;;  %4167 = vpow2.f32 %v3769_v27  ;;  %v3773_v35 = vmul.f32 -1.442695, %v5744_v53  ;;  %v5851_v7 = vpop.eup %4145 }
 0x14d   :  { %v2073_v50 = vrot.slane %v5822_v17, 7  ;;  %v2086_v10 = vsel %vm2051_vm2, %v5819_v60, %v2085_v33  ;;  %4169 = vpow2.f32 %v3770_v12  ;;  %v3774_v32 = vmul.f32 -1.442695, %v5749_v21  ;;  %v5856_v53 = vpop.eup %4147  ;;  %v7805_v12 = vld [vmem:[#allocation17_spill] sm:$0xff] }
 0x14e   :  { %v2056_v58 = vrot.slane %v5829_v5, 6  ;;  %v2087_v14 = vrot.slane %v5826_v3, 7  ;;  %4171 = vpow2.f32 %v3771_v37  ;;  %v3775_v43 = vmul.f32 -1.442695, %v5754_v20  ;;  %v5863_v21 = vpop.eup %4149  ;;  %v7808_v37 = vld [vmem:[#allocation35_spill] sm:$0xff] }
 0x14f   :  { %v5859_v13 = vmul.f32 %v4128_v0, %v7801_v16  ;;  %v2055_v54 = vsel %vm2054_vm3, %v2053_v11, %v2052_v63  ;;  %4173 = vpow2.f32 %v3772_v52  ;;  %v3776_v40 = vmul.f32 -1.442695, %v5759_v31 }
 0x150   :  { %v5866_v27 = vmul.f32 %v4130_v25, %v7802_v2  ;;  %v2075_v47 = vrot.slane %v5840_v4, 6  ;;  %4175 = vpow2.f32 %v3773_v35  ;;  %v3777_v20 = vmul.f32 -1.442695, %v5764_v39  ;;  %v5870_v22 = vpop.eup %4151 }
 0x151   :  { %v2074_v0 = vsel %vm2054_vm3, %v2073_v50, %v2072_v26  ;;  %v7804_v57 = vrot.slane %v7803_v61, 7  ;;  %v7806_v31 = vrot.slane %v7805_v12, 7  ;;  %4177 = vpow2.f32 %v3774_v32 }
 0x152   :  { %v4154_v25 = vpop.eup %4153  ;;  %v5880_v33 = vmul.f32 %v4132_v49, %v7807_v38  ;;  %v2058_v18 = vsel %vm2057_vm4, %v2056_v58, %v2055_v54  ;;  %v2088_v39 = vsel %vm2054_vm3, %v2087_v14, %v2086_v10  ;;  %4179 = vpow2.f32 %v3775_v43  ;;  %v7809_v10 = vld [vmem:[#allocation36_spill] sm:$0xff]  ;;  %v7810_v43 = vld [vmem:[#allocation38_spill] sm:$0xff] }
 0x153   :  { %v2559_v1 = vsub.f32 %v7803_v61, %v7804_v57  ;;  %v2560_v51 = vsub.f32 %v7805_v12, %v7806_v31  ;;  %v4156_v48 = vpop.eup %4155  ;;  %v5885_v63 = vmul.f32 %v4134_v36, %v7808_v37  ;;  %v2089_v11 = vrot.slane %v5859_v13, 6  ;;  %v7812_v12 = vld [vmem:[#allocation42_spill] sm:$0xff] }
 0x154   :  { %4181 = vpow2.f32 %v3776_v40  ;;  %v3778_v52 = vmul.f32 -1.442695, %v5769_v59  ;;  %v4158_v9 = vpop.eup %4157  ;;  %v2059_v26 = vrot.slane %v5866_v27, 5  ;;  %v2076_v49 = vsel %vm2057_vm4, %v2075_v47, %v2074_v0 }
 0x155   :  { %4183 = vpow2.f32 %v3777_v20  ;;  %v3779_v35 = vmul.f32 -1.442695, %v5775_v8  ;;  %v4160_v50 = vpop.eup %4159  ;;  %v5893_v32 = vmul.f32 %v4136_v34, %v7809_v10  ;;  %v3780_v36 = vmul.f32 -1.442695, %v5780_v42  ;;  %v7811_v42 = vld [vmem:[#allocation40_spill] sm:$0xff] }
 0x156   :  { %4185 = vpow2.f32 %v3778_v52  ;;  %v3781_v58 = vmul.f32 -1.442695, %v5789_v28  ;;  %v4162_v14 = vpop.eup %4161  ;;  %v5898_v59 = vmul.f32 %v4138_v23, %v7810_v43  ;;  %v3782_v16 = vmul.f32 -1.442695, %v5797_v24  ;;  %v7815_v43 = vld [vmem:[#allocation8_spill] sm:$0xff] }
 0x157   :  { %4187 = vpow2.f32 %v3779_v35  ;;  %v3783_v54 = vmul.f32 -1.442695, %v5805_v45  ;;  %v4164_v40 = vpop.eup %4163  ;;  %v2077_v8 = vrot.slane %v5880_v33, 5  ;;  %v2090_v34 = vsel %vm2057_vm4, %v2089_v11, %v2088_v39 }
 0x158   :  { %4189 = vpow2.f32 %v3780_v36  ;;  %v3784_v2 = vmul.f32 -1.442695, %v2559_v1  ;;  %v4166_v47 = vpop.eup %4165  ;;  %v5906_v28 = vmul.f32 %v5831_v46, %v7811_v42  ;;  %v2061_v23 = vsel %vm2060_vm5, %v2059_v26, %v2058_v18  ;;  %v7813_v18 = vld [vmem:[#allocation41_spill] sm:$0xff] }
 0x159   :  { %4191 = vpow2.f32 %v3781_v58  ;;  %v3785_v20 = vmul.f32 -1.442695, %v2560_v51  ;;  %v4168_v0 = vpop.eup %4167  ;;  %v2062_v24 = vrot.slane %v5893_v32, 4  ;;  %v2091_v45 = vrot.slane %v5885_v63, 5 }
 0x15a   :  { %4193 = vpow2.f32 %v3782_v16  ;;  %v2921_v61 = vadd.f32 1.0, %v4154_v25  ;;  %v4170_v57 = vpop.eup %4169  ;;  %v5913_v1 = vmul.f32 %v5837_v56, %v7812_v12  ;;  %v2079_v31 = vrot.slane %v5898_v59, 4  ;;  %v7814_v25 = vld [vmem:[#allocation19_spill] sm:$0xff] }
 0x15b   :  { %4195 = vpow2.f32 %v3783_v54  ;;  %v2922_v46 = vadd.f32 1.0, %v4156_v48  ;;  %v4172_v38 = vpop.eup %4171  ;;  %v5918_v51 = vmul.f32 %v5845_v29, %v7813_v18  ;;  %v2078_v39 = vsel %vm2060_vm5, %v2077_v8, %v2076_v49 }
 0x15c   :  { %4197 = vpow2.f32 %v3784_v2  ;;  %v2923_v37 = vadd.f32 1.0, %v4158_v9  ;;  %v4174_v11 = vpop.eup %4173  ;;  %v5923_v52 = vmul.f32 %v5851_v7, %v7814_v25  ;;  %v2093_v56 = vrot.slane %v5906_v28, 4 }
 0x15d   :  { %4199 = vpow2.f32 %v3785_v20  ;;  %v2924_v26 = vadd.f32 1.0, %v4160_v50  ;;  %v4176_v35 = vpop.eup %4175  ;;  %v2064_v48 = vsel %vm2063_vm6, %v2062_v24, %v2061_v23  ;;  %v2092_v10 = vsel %vm2060_vm5, %v2091_v45, %v2090_v34 }
 0x15e   :  { %v2925_v29 = vadd.f32 1.0, %v4162_v14  ;;  %4201 = vrcp.f32 %v2921_v61  ;;  %v4178_v36 = vpop.eup %4177  ;;  %v2065_v49 = vrot.slane %v5913_v1, 3  ;;  %v2080_v9 = vsel %vm2063_vm6, %v2079_v31, %v2078_v39 }
 0x15f   :  { %v2926_v58 = vadd.f32 1.0, %v4164_v40  ;;  %4203 = vrcp.f32 %v2922_v46  ;;  %v4180_v7 = vpop.eup %4179  ;;  %v5932_v16 = vmul.f32 %v5856_v53, %v7815_v43  ;;  %v2081_v50 = vrot.slane %v5918_v51, 3 }
 0x160   :  { %v2927_v54 = vadd.f32 1.0, %v4166_v47  ;;  %4205 = vrcp.f32 %v2923_v37  ;;  %v2094_v14 = vsel %vm2063_vm6, %v2093_v56, %v2092_v10  ;;  %v2095_v34 = vrot.slane %v5923_v52, 3 }
 0x161   :  { %v4182_v8 = vpop.eup %4181  ;;  %v2928_v2 = vadd.f32 1.0, %v4168_v0  ;;  %4207 = vrcp.f32 %v2924_v26  ;;  %v2929_v23 = vadd.f32 1.0, %v4170_v57  ;;  %v3509_v40 = vrot.slane %v5784_v44, 2 }
 0x162   :  { %v4184_v42 = vpop.eup %4183  ;;  %4209 = vrcp.f32 %v2925_v29  ;;  %v3510_v20 = vrot.slane %v5808_v30, 1  ;;  %v2930_v24 = vadd.f32 1.0, %v4172_v38  ;;  %v3523_v47 = vrot.slane %v5792_v55, 2 }
 0x163   :  { %v4186_v53 = vpop.eup %4185  ;;  %4211 = vrcp.f32 %v2926_v58  ;;  %v3524_v45 = vrot.slane %v5815_v6, 1  ;;  %v5943_v12 = vmul.f32 %v5863_v21, %v5700_v62  ;;  %v5947_v0 = vmul.f32 %v5870_v22, %v5702_v15 }
 0x164   :  { %v4188_v61 = vpop.eup %4187  ;;  %v2931_v57 = vadd.f32 1.0, %v4174_v11  ;;  %4213 = vrcp.f32 %v2927_v54  ;;  %v5950_v30 = vsel %vm2066_vm7, %v2065_v49, %v2064_v48  ;;  %v2068_v31 = vrot.slane %v5932_v16, 2 }
 0x165   :  { %v4190_v44 = vpop.eup %4189  ;;  %v2932_v55 = vadd.f32 1.0, %v4176_v35  ;;  %4215 = vrcp.f32 %v2928_v2  ;;  %v5954_v46 = vsel %vm2066_vm7, %v2081_v50, %v2080_v9  ;;  %v2933_v62 = vadd.f32 1.0, %v4178_v36 }
 0x166   :  { %v4192_v6 = vpop.eup %4191  ;;  %4217 = vrcp.f32 %v2929_v23  ;;  %v3511_v21 = vsel %vm2051_vm2, %v3510_v20, %v3509_v40  ;;  %v5958_v22 = vsel %vm2066_vm7, %v2095_v34, %v2094_v14  ;;  %v2934_v38 = vadd.f32 1.0, %v4180_v7 }
 0x167   :  { %v4194_v15 = vpop.eup %4193  ;;  %4219 = vrcp.f32 %v2930_v24  ;;  %v3525_v18 = vsel %vm2051_vm2, %v3524_v45, %v3523_v47  ;;  %v2097_v37 = vrot.slane %v5947_v0, 2  ;;  %v2935_v11 = vadd.f32 1.0, %v4182_v8 }
 0x168   :  { %v4196_v39 = vpop.eup %4195  ;;  %4221 = vrcp.f32 %v2931_v57  ;;  %v3513_v25 = vrot.slane %v5829_v5, 7  ;;  %v2936_v26 = vadd.f32 1.0, %v4184_v42  ;;  %v3512_v35 = vsel %vm2054_vm3, %v5811_v41, %v3511_v21 }
 0x169   :  { %v4198_v56 = vpop.eup %4197  ;;  %4223 = vrcp.f32 %v2932_v55  ;;  %v3527_v48 = vrot.slane %v5840_v4, 7  ;;  %v2937_v29 = vadd.f32 1.0, %v4186_v53  ;;  %v3515_v36 = vrot.slane %v5866_v27, 6 }
 0x16a   :  { %v4200_v10 = vpop.eup %4199  ;;  %4225 = vrcp.f32 %v2933_v62  ;;  %v3526_v49 = vsel %vm2054_vm3, %v5822_v17, %v3525_v18  ;;  %v2938_v58 = vadd.f32 1.0, %v4188_v61  ;;  %v3537_v5 = vrot.slane %v5800_v19, 2 }
 0x16b   :  { %v4202_v9 = vpop.eup %4201  ;;  %4227 = vrcp.f32 %v2934_v38  ;;  %v3538_v7 = vrot.slane %v5819_v60, 1  ;;  %v2939_v50 = vadd.f32 1.0, %v4190_v44  ;;  %v3514_v41 = vsel %vm2057_vm4, %v3513_v25, %v3512_v35 }
 0x16c   :  { %v4204_v43 = vpop.eup %4203  ;;  %4229 = vrcp.f32 %v2935_v11  ;;  %v3517_v4 = vrot.slane %v5893_v32, 5  ;;  %v2940_v8 = vadd.f32 1.0, %v4192_v6  ;;  %v3305_v27 = vrot.slane %v4202_v9, 5 }
 0x16d   :  { %v4206_v54 = vpop.eup %4205  ;;  %4231 = vrcp.f32 %v2936_v26  ;;  %v3528_v17 = vsel %vm2057_vm4, %v3527_v48, %v3526_v49  ;;  %v2941_v34 = vadd.f32 1.0, %v4194_v15  ;;  %v2942_v2 = vadd.f32 1.0, %v4196_v39 }
 0x16e   :  { %v4208_v14 = vpop.eup %4207  ;;  %4233 = vrcp.f32 %v2937_v29  ;;  %v3319_v19 = vrot.slane %v4204_v43, 5  ;;  %v3333_v23 = vrot.slane %v4206_v54, 5  ;;  %v3539_v40 = vsel %vm2051_vm2, %v3538_v7, %v3537_v5 }
 0x16f   :  { %v4210_v42 = vpop.eup %4209  ;;  %4235 = vrcp.f32 %v2938_v58  ;;  %v3306_v60 = vrot.slane %v4208_v14, 4  ;;  %v2943_v53 = vadd.f32 1.0, %v4198_v56  ;;  %v3541_v47 = vrot.slane %v5859_v13, 7 }
 0x170   :  { %v4212_v20 = vpop.eup %4211  ;;  %4237 = vrcp.f32 %v2939_v50  ;;  %v3320_v24 = vrot.slane %v4210_v42, 4  ;;  %v2944_v61 = vadd.f32 1.0, %v4200_v10  ;;  %v3540_v21 = vsel %vm2054_vm3, %v5826_v3, %v3539_v40 }
 0x171   :  { %v4214_v45 = vpop.eup %4213  ;;  %4239 = vrcp.f32 %v2940_v8  ;;  %v3307_v57 = vsel %vm2051_vm2, %v3306_v60, %v3305_v27  ;;  %v3334_v44 = vrot.slane %v4212_v20, 4  ;;  %v3529_v13 = vrot.slane %v5880_v33, 6 }
 0x172   :  { %v4216_v55 = vpop.eup %4215  ;;  %4241 = vrcp.f32 %v2941_v34  ;;  %v3308_v6 = vrot.slane %v4214_v45, 3  ;;  %v3321_v62 = vsel %vm2051_vm2, %v3320_v24, %v3319_v19  ;;  %v3543_v56 = vrot.slane %v5885_v63, 6 }
 0x173   :  { %v4218_v15 = vpop.eup %4217  ;;  %4243 = vrcp.f32 %v2942_v2  ;;  %v3322_v38 = vrot.slane %v4216_v55, 3  ;;  %v3335_v18 = vsel %vm2051_vm2, %v3334_v44, %v3333_v23  ;;  %v3542_v3 = vsel %vm2057_vm4, %v3541_v47, %v3540_v21  ;;  %v6000_v2 = vld [vmem:[#allocation2 + $0x240] sm:$0xff]  ;;  %v6018_v47 = vld [vmem:[#allocation2 + $0x248] sm:$0xff] }
 0x174   :  { %v4220_v39 = vpop.eup %4219  ;;  %4245 = vrcp.f32 %v2943_v53  ;;  %v3309_v11 = vsel %vm2054_vm3, %v3308_v6, %v3307_v57  ;;  %v3336_v25 = vrot.slane %v4218_v15, 3  ;;  %v3516_v33 = vsel %vm2060_vm5, %v3515_v36, %v3514_v41 }
 0x175   :  { %v4222_v26 = vpop.eup %4221  ;;  %4247 = vrcp.f32 %v2944_v61  ;;  %v3310_v35 = vrot.slane %v4220_v39, 2  ;;  %v3323_v48 = vsel %vm2054_vm3, %v3322_v38, %v3321_v62  ;;  %v3531_v9 = vrot.slane %v5898_v59, 5  ;;  %v7816_v39 = vld [vmem:[#allocation11_spill] sm:$0xff] }
 0x176   :  { %v4224_v10 = vpop.eup %4223  ;;  %v3324_v29 = vrot.slane %v4222_v26, 2  ;;  %v3337_v49 = vsel %vm2054_vm3, %v3336_v25, %v3335_v18  ;;  %v3530_v63 = vsel %vm2060_vm5, %v3529_v13, %v3528_v17  ;;  %v3545_v43 = vrot.slane %v5906_v28, 5  ;;  %v6036_v26 = vld [vmem:[#allocation2 + $0x250] sm:$0xff] }
 0x177   :  { %v4226_v58 = vpop.eup %4225  ;;  %v3311_v5 = vsel %vm2057_vm4, %v3310_v35, %v3309_v11  ;;  %v3338_v7 = vrot.slane %v4224_v10, 2  ;;  %v3519_v27 = vrot.slane %v5913_v1, 4  ;;  %v3544_v14 = vsel %vm2060_vm5, %v3543_v56, %v3542_v3 }
 0x178   :  { %v4228_v50 = vpop.eup %4227  ;;  %v3312_v54 = vrot.slane %v4226_v58, 1  ;;  %v3325_v8 = vsel %vm2057_vm4, %v3324_v29, %v3323_v48  ;;  %v3518_v41 = vsel %vm2063_vm6, %v3517_v4, %v3516_v33  ;;  %v3533_v17 = vrot.slane %v5918_v51, 4  ;;  %v6041_v29 = vld [vmem:[#allocation2 + $0x258] sm:$0xff] }
 0x179   :  { %v4230_v34 = vpop.eup %4229  ;;  %v3326_v36 = vrot.slane %v4228_v50, 1  ;;  %v3339_v59 = vsel %vm2057_vm4, %v3338_v7, %v3337_v49  ;;  %v3532_v1 = vsel %vm2063_vm6, %v3531_v9, %v3530_v63  ;;  %v3547_v60 = vrot.slane %v5923_v52, 4  ;;  %v6043_v49 = vld [vmem:[#allocation2 + $0x260] sm:$0xff]  ;;  %v6049_v7 = vld [vmem:[#allocation2 + $0x270] sm:$0xff] }
 0x17a   :  { %v4232_v28 = vpop.eup %4231  ;;  %v3313_v19 = vsel %vm2060_vm5, %v3312_v54, %v3311_v5  ;;  %v3340_v42 = vrot.slane %v4230_v34, 1  ;;  %v2070_v32 = vsel %vm2069_vm8, %v2068_v31, %v5950_v30  ;;  %v2083_v4 = vrot.slane %v5943_v12, 2  ;;  %v6047_v5 = vld [vmem:[#allocation2 + $0x268] sm:$0xff]  ;;  %v6055_v34 = vld [vmem:[#allocation2 + $0x278] sm:$0xff] }
 0x17b   :  { %v4234_v23 = vpop.eup %4233  ;;  %v3327_v51 = vsel %vm2060_vm5, %v3326_v36, %v3325_v8  ;;  %v3546_v40 = vsel %vm2063_vm6, %v3545_v43, %v3544_v14  ;;  %v2098_v53 = vsel %vm2069_vm8, %v2097_v37, %v5958_v22  ;;  %v3521_v24 = vrot.slane %v5932_v16, 3 }
 0x17c   :  { %v4236_v20 = vpop.eup %4235  ;;  %v3341_v52 = vsel %vm2060_vm5, %v3340_v42, %v3339_v59  ;;  %v634_v30 = vsel %vm129_vm0, %v6000_v2, -inf  ;;  %v3314_v45 = vsel %vm2063_vm6, %v4232_v28, %v3313_v19  ;;  %v3520_v61 = vsel %vm2066_vm7, %v3519_v27, %v3518_v41 }
 0x17d   :  { %v4238_v31 = vpop.eup %4237  ;;  %v3534_v57 = vsel %vm2066_vm7, %v3533_v17, %v3532_v1  ;;  %v3535_v44 = vrot.slane %v5943_v12, 3  ;;  %v3328_v37 = vsel %vm2063_vm6, %v4234_v23, %v3327_v51  ;;  %v3548_v16 = vsel %vm2066_vm7, %v3547_v60, %v3546_v40 }
 0x17e   :  { %v4240_v55 = vpop.eup %4239  ;;  %v3315_v22 = vrot.slane %v4238_v31, 7  ;;  %v3549_v6 = vrot.slane %v5947_v0, 3  ;;  %v3342_v15 = vsel %vm2063_vm6, %v4236_v20, %v3341_v52  ;;  %v635_v38 = vrot.slane %v634_v30, 4 }
 0x17f   :  { %v4242_v62 = vpop.eup %4241  ;;  %v3329_v21 = vrot.slane %v4240_v55, 7  ;;  %v641_v18 = vsel %vm129_vm0, %v6018_v47, -inf  ;;  %v2084_v12 = vsel %vm2069_vm8, %v2083_v4, %v5954_v46  ;;  %v2239_v11 = vmul.f32 %v2098_v53, %v7816_v39 }
 0x180   :  { %v4244_v13 = vpop.eup %4243  ;;  %v3316_v25 = vsel %vm2066_vm7, %v3315_v22, %v3314_v45  ;;  %v3343_v56 = vrot.slane %v4242_v62, 7  ;;  %v3522_v3 = vsel %vm2069_vm8, %v3521_v24, %v3520_v61  ;;  %v3536_v10 = vsel %vm2069_vm8, %v3535_v44, %v3534_v57  ;;  %v6069_v22 = vld [vmem:[#allocation2 + $0x280] sm:$0xff] }
 0x181   :  { %v4246_v0 = vpop.eup %4245  ;;  %v3317_v35 = vrot.slane %v4244_v13, 6  ;;  %v3330_v48 = vsel %vm2066_vm7, %v3329_v21, %v3328_v37  ;;  %v3550_v58 = vsel %vm2069_vm8, %v3549_v6, %v3548_v16  ;;  %v642_v63 = vrot.slane %v641_v18, 4 }
 0x182   :  { %v4248_v46 = vpop.eup %4247  ;;  %v3331_v33 = vrot.slane %v4246_v0, 6  ;;  %v3344_v9 = vsel %vm2066_vm7, %v3343_v56, %v3342_v15  ;;  %v636_v54 = vmax.f32 %v634_v30, %v635_v38  ;;  %v648_v8 = vsel %vm129_vm0, %v6036_v26, -inf  ;;  %v6071_v15 = vld [vmem:[#allocation2 + $0x288] sm:$0xff]  ;;  %v6075_v56 = vld [vmem:[#allocation2 + $0x298] sm:$0xff]  ;;  %v6077_v0 = vld [vmem:[#allocation2 + $0x2a0] sm:$0xff] }
 0x183   :  { %v3318_v43 = vsel %vm2069_vm8, %v3317_v35, %v3316_v25  ;;  %v3345_v50 = vrot.slane %v4248_v46, 6  ;;  %v655_v36 = vsel %vm129_vm0, %v6041_v29, -inf  ;;  %v662_v59 = vsel %vm129_vm0, %v6043_v49, -inf  ;;  %7817 = vst [vmem:[#allocation9_spill] sm:$0xff] %v6077_v0 }
 0x184   :  { %v3332_v27 = vsel %vm2069_vm8, %v3331_v33, %v3330_v48  ;;  %v3485_v14 = vmul.f32 %v3318_v43, %v2070_v32  ;;  %v669_v28 = vsel %vm129_vm0, %v6047_v5, -inf  ;;  %v676_v19 = vsel %vm129_vm0, %v6049_v7, -inf }
 0x185   :  { %v3346_v41 = vsel %vm2069_vm8, %v3345_v50, %v3344_v9  ;;  %v3486_v17 = vmul.f32 %v3332_v27, %v2084_v12  ;;  %v643_v60 = vmax.f32 %v641_v18, %v642_v63  ;;  %v649_v23 = vrot.slane %v648_v8, 4  ;;  %v6073_v12 = vld [vmem:[#allocation2 + $0x290] sm:$0xff] }
 0x186   :  { %v3487_v42 = vmul.f32 %v3346_v41, %v2239_v11  ;;  %v3497_v1 = vmin.f32 %v3485_v14, 1.0  ;;  %v656_v4 = vrot.slane %v655_v36, 4  ;;  %v663_v51 = vrot.slane %v662_v59, 4 }
 0x187   :  { %v3498_v32 = vmin.f32 %v3486_v17, 1.0  ;;  %v683_v40 = vsel %vm129_vm0, %v6055_v34, -inf  ;;  %v670_v52 = vrot.slane %v669_v28, 4  ;;  %v677_v24 = vrot.slane %v676_v19, 4 }
 0x188   :  { %v3499_v20 = vmin.f32 %v3487_v42, %v7816_v39  ;;  %v3689_v53 = vmul.f32 %v3522_v3, %v3497_v1  ;;  %v637_v31 = vrot.slane %v636_v54, 2  ;;  %v650_v57 = vmax.f32 %v648_v8, %v649_v23  ;;  %v6085_v8 = vld [vmem:[#allocation2 + $0x2a8] sm:$0xff] }
 0x189   :  { %v3690_v30 = vmul.f32 %v3536_v10, %v3498_v32  ;;  %v684_v44 = vrot.slane %v683_v40, 4  ;;  %v644_v37 = vrot.slane %v643_v60, 2  ;;  %v657_v16 = vmax.f32 %v655_v36, %v656_v4  ;;  %7818 = vst [vmem:[#allocation10_spill] sm:$0xff] %v6085_v8 }
 0x18a   :  { %v3691_v45 = vmul.f32 %v3550_v58, %v3499_v20  ;;  %v3701_v61 = vmax.f32 %v3689_v53, %v3485_v14  ;;  %v664_v6 = vmax.f32 %v662_v59, %v663_v51  ;;  %v671_v38 = vmax.f32 %v669_v28, %v670_v52  ;;  %v6091_v28 = vld [vmem:[#allocation2 + $0x2b0] sm:$0xff] }
 0x18b   :  { %v3702_v55 = vmax.f32 %v3690_v30, %v3486_v17  ;;  %v678_v18 = vmax.f32 %v676_v19, %v677_v24  ;;  %v638_v11 = vmax.f32 %v636_v54, %v637_v31  ;;  %v651_v35 = vrot.slane %v650_v57, 2  ;;  %7819 = vst [vmem:[#allocation12_spill] sm:$0xff] %v6091_v28 }
 0x18c   :  { %v3703_v62 = vmax.f32 %v3691_v45, %v3487_v42  ;;  %v3713_v21 = vmin.f32 %v3701_v61, %v3497_v1  ;;  %v685_v48 = vmax.f32 %v683_v40, %v684_v44  ;;  %v690_v3 = vsel %vm129_vm0, %v6069_v22, -inf }
 0x18d   :  { %v3714_v13 = vmin.f32 %v3702_v55, %v3498_v32  ;;  %v658_v46 = vrot.slane %v657_v16, 2  ;;  %v665_v33 = vrot.slane %v664_v6, 2  ;;  %v697_v9 = vsel %vm129_vm0, %v6071_v15, -inf }
 0x18e   :  { %v3715_v25 = vmin.f32 %v3703_v62, %v3499_v20  ;;  %v645_v58 = vmax.f32 %v643_v60, %v644_v37  ;;  %v672_v63 = vrot.slane %v671_v38, 2  ;;  %v679_v43 = vrot.slane %v678_v18, 2  ;;  %v6093_v60 = vld [vmem:[#allocation2 + $0x2b8] sm:$0xff] }
 0x18f   :  { %v3725_v10 = vadd.f32 %v3714_v13, %v3713_v21  ;;  %v704_v50 = vsel %vm129_vm0, %v6073_v12, -inf  ;;  %v691_v27 = vrot.slane %v690_v3, 4  ;;  %v711_v14 = vsel %vm129_vm0, %v6075_v56, -inf  ;;  %7820 = vst [vmem:[#allocation37_spill] sm:$0xff] %v6093_v60 }
 0x190   :  { %v718_v36 = vsel %vm129_vm0, %v6077_v0, -inf  ;;  %v652_v59 = vmax.f32 %v650_v57, %v651_v35  ;;  %v686_v41 = vrot.slane %v685_v48, 2  ;;  %v698_v17 = vrot.slane %v697_v9, 4 }
 0x191   :  { %v3726_v54 = vadd.f32 %v3725_v10, %v3715_v25  ;;  %v659_v19 = vmax.f32 %v657_v16, %v658_v46  ;;  %v666_v42 = vmax.f32 %v664_v6, %v665_v33  ;;  %v705_v1 = vrot.slane %v704_v50, 4  ;;  %v6103_v25 = vld [vmem:[#allocation2 + $0x2c0] sm:$0xff]  ;;  %v6107_v46 = vld [vmem:[#allocation2 + $0x2c8] sm:$0xff] }
 0x192   :  { %v673_v23 = vmax.f32 %v671_v38, %v672_v63  ;;  %v712_v32 = vrot.slane %v711_v14, 4  ;;  %v719_v4 = vrot.slane %v718_v36, 4  ;;  %v725_v51 = vsel %vm129_vm0, %v6085_v8, -inf  ;;  %7821 = vst [vmem:[#allocation13_spill] sm:$0xff] %v6103_v25  ;;  %7822 = vst [vmem:[#allocation20_spill] sm:$0xff] %v6107_v46 }
 0x193   :  { %3727 = vadd.xlane.f32.xlu0 %v3726_v54  ;;  %v639_v40 = vrot.slane %v638_v11, 1  ;;  %v646_v20 = vrot.slane %v645_v58, 1  ;;  %v680_v53 = vmax.f32 %v678_v18, %v679_v43  ;;  %v692_v52 = vmax.f32 %v690_v3, %v691_v27 }
 0x194   :  { %v653_v24 = vrot.slane %v652_v59, 1  ;;  %v687_v30 = vmax.f32 %v685_v48, %v686_v41  ;;  %v699_v31 = vmax.f32 %v697_v9, %v698_v17  ;;  %v732_v45 = vsel %vm129_vm0, %v6091_v28, -inf }
 0x195   :  { %v660_v61 = vrot.slane %v659_v19, 1  ;;  %v706_v57 = vmax.f32 %v704_v50, %v705_v1  ;;  %v726_v44 = vrot.slane %v725_v51, 4  ;;  %v739_v55 = vsel %vm129_vm0, %v6093_v60, -inf  ;;  %v6115_v50 = vld [vmem:[#allocation2 + $0x2d8] sm:$0xff]  ;;  %v6127_v1 = vld [vmem:[#allocation2 + $0x2e8] sm:$0xff] }
 0x196   :  { %v667_v37 = vrot.slane %v666_v42, 1  ;;  %v674_v16 = vrot.slane %v673_v23, 1  ;;  %v713_v6 = vmax.f32 %v711_v14, %v712_v32  ;;  %v720_v62 = vmax.f32 %v718_v36, %v719_v4  ;;  %7824 = vst [vmem:[#allocation22_spill] sm:$0xff] %v6115_v50  ;;  %v6121_v36 = vld [vmem:[#allocation2 + $0x2e0] sm:$0xff]  ;;  %7826 = vst [vmem:[#allocation18_spill] sm:$0xff] %v6127_v1  ;;  %v6129_v32 = vld [vmem:[#allocation2 + $0x2f0] sm:$0xff] }
 0x197   :  { %v6101_v21 = vmax.f32 %v638_v11, %v639_v40  ;;  %v681_v38 = vrot.slane %v680_v53, 1  ;;  %v693_v18 = vrot.slane %v692_v52, 2  ;;  %v733_v13 = vrot.slane %v732_v45, 4  ;;  %v6113_v11 = vld [vmem:[#allocation2 + $0x2d0] sm:$0xff]  ;;  %7825 = vst [vmem:[#allocation14_spill] sm:$0xff] %v6121_v36  ;;  %7827 = vst [vmem:[#allocation15_spill] sm:$0xff] %v6129_v32 }
 0x198   :  { %v6105_v35 = vmax.f32 %v645_v58, %v646_v20  ;;  %v688_v48 = vrot.slane %v687_v30, 1  ;;  %v700_v3 = vrot.slane %v699_v31, 2  ;;  %v740_v10 = vrot.slane %v739_v55, 4  ;;  %7823 = vst [vmem:[#allocation39_spill] sm:$0xff] %v6113_v11  ;;  %v6135_v40 = vld [vmem:[#allocation2 + $0x2f8] sm:$0xff] }
 0x199   :  { %v6109_v33 = vmax.f32 %v652_v59, %v653_v24  ;;  %v6111_v9 = vmax.f32 %v659_v19, %v660_v61  ;;  %v707_v63 = vrot.slane %v706_v57, 2  ;;  %v727_v43 = vmax.f32 %v725_v51, %v726_v44  ;;  %7828 = vst [vmem:[#allocation25_spill] sm:$0xff] %v6135_v40 }
 0x19a   :  { %v6117_v54 = vmax.f32 %v666_v42, %v667_v37  ;;  %v6119_v27 = vmax.f32 %v673_v23, %v674_v16  ;;  %v714_v58 = vrot.slane %v713_v6, 2  ;;  %v721_v14 = vrot.slane %v720_v62, 2 }
 0x19b   :  { %v6123_v41 = vmax.f32 %v680_v53, %v681_v38  ;;  %v694_v59 = vmax.f32 %v692_v52, %v693_v18  ;;  %v734_v17 = vmax.f32 %v732_v45, %v733_v13  ;;  %v746_v19 = vsel %vm129_vm0, %v6103_v25, -inf }
 0x19c   :  { %v6131_v4 = vmax.f32 %v687_v30, %v688_v48  ;;  %v701_v42 = vmax.f32 %v699_v31, %v700_v3  ;;  %v741_v23 = vmax.f32 %v739_v55, %v740_v10  ;;  %v753_v51 = vsel %vm129_vm0, %v6107_v46, -inf }
 0x19d   :  { %v708_v20 = vmax.f32 %v706_v57, %v707_v63  ;;  %v728_v53 = vrot.slane %v727_v43, 2  ;;  %v760_v52 = vsel %vm129_vm0, %v6113_v11, -inf  ;;  %v767_v24 = vsel %vm129_vm0, %v6115_v50, -inf }
 0x19e   :  { %v715_v45 = vmax.f32 %v713_v6, %v714_v58  ;;  %v722_v61 = vmax.f32 %v720_v62, %v721_v14  ;;  %v747_v44 = vrot.slane %v746_v19, 4  ;;  %v774_v30 = vsel %vm129_vm0, %v6121_v36, -inf }
 0x19f   :  { %v735_v31 = vrot.slane %v734_v17, 2  ;;  %v754_v55 = vrot.slane %v753_v51, 4  ;;  %v781_v37 = vsel %vm129_vm0, %v6127_v1, -inf  ;;  %v788_v57 = vsel %vm129_vm0, %v6129_v32, -inf }
 0x1a0   :  { %v742_v16 = vrot.slane %v741_v23, 2  ;;  %v761_v38 = vrot.slane %v760_v52, 4  ;;  %v768_v18 = vrot.slane %v767_v24, 4  ;;  %v795_v13 = vsel %vm129_vm0, %v6135_v40, -inf }
 0x1a1   :  { %v695_v6 = vrot.slane %v694_v59, 1  ;;  %v702_v62 = vrot.slane %v701_v42, 1  ;;  %v729_v48 = vmax.f32 %v727_v43, %v728_v53  ;;  %v775_v3 = vrot.slane %v774_v30, 4 }
 0x1a2   :  { %v709_v10 = vrot.slane %v708_v20, 1  ;;  %v748_v63 = vmax.f32 %v746_v19, %v747_v44  ;;  %v782_v58 = vrot.slane %v781_v37, 4  ;;  %v789_v14 = vrot.slane %v788_v57, 4 }
 0x1a3   :  { %v716_v39 = vrot.slane %v715_v45, 1  ;;  %v736_v36 = vmax.f32 %v734_v17, %v735_v31  ;;  %v755_v1 = vmax.f32 %v753_v51, %v754_v55  ;;  %v796_v50 = vrot.slane %v795_v13, 4 }
 0x1a4   :  { %v723_v11 = vrot.slane %v722_v61, 1  ;;  %v743_v32 = vmax.f32 %v741_v23, %v742_v16  ;;  %v762_v46 = vmax.f32 %v760_v52, %v761_v38  ;;  %v769_v25 = vmax.f32 %v767_v24, %v768_v18 }
 0x1a5   :  { %v6149_v60 = vmax.f32 %v694_v59, %v695_v6  ;;  %v6151_v28 = vmax.f32 %v701_v42, %v702_v62  ;;  %v730_v40 = vrot.slane %v729_v48, 1  ;;  %v776_v8 = vmax.f32 %v774_v30, %v775_v3 }
 0x1a6   :  { %v6153_v43 = vmax.f32 %v708_v20, %v709_v10  ;;  %v749_v53 = vrot.slane %v748_v63, 2  ;;  %v783_v19 = vmax.f32 %v781_v37, %v782_v58  ;;  %v790_v44 = vmax.f32 %v788_v57, %v789_v14 }
 0x1a7   :  { %v6155_v0 = vmax.f32 %v715_v45, %v716_v39  ;;  %v737_v17 = vrot.slane %v736_v36, 1  ;;  %v756_v51 = vrot.slane %v755_v1, 2  ;;  %v797_v31 = vmax.f32 %v795_v13, %v796_v50 }
 0x1a8   :  { %v6157_v55 = vmax.f32 %v722_v61, %v723_v11  ;;  %v744_v23 = vrot.slane %v743_v32, 1  ;;  %v763_v52 = vrot.slane %v762_v46, 2  ;;  %v770_v59 = vrot.slane %v769_v25, 2 }
 0x1a9   :  { %v6159_v24 = vmax.f32 %v729_v48, %v730_v40  ;;  %v777_v42 = vrot.slane %v776_v8, 2  ;;  %v874_v20 = vsub.f32 %v6000_v2, %v6101_v21  ;;  %v875_v30 = vsub.f32 %v6018_v47, %v6105_v35 }
 0x1aa   :  { %v750_v37 = vmax.f32 %v748_v63, %v749_v53  ;;  %v784_v39 = vrot.slane %v783_v19, 2  ;;  %v791_v45 = vrot.slane %v790_v44, 2  ;;  %v876_v50 = vsub.f32 %v6036_v26, %v6109_v33 }
 0x1ab   :  { %v6167_v11 = vmax.f32 %v736_v36, %v737_v17  ;;  %v757_v61 = vmax.f32 %v755_v1, %v756_v51  ;;  %v798_v57 = vrot.slane %v797_v31, 2  ;;  %v877_v40 = vsub.f32 %v6041_v29, %v6111_v9 }
 0x1ac   :  { %v6171_v16 = vmax.f32 %v743_v32, %v744_v23  ;;  %v764_v38 = vmax.f32 %v762_v46, %v763_v52  ;;  %v771_v21 = vmax.f32 %v769_v25, %v770_v59  ;;  %v878_v35 = vsub.f32 %v6043_v49, %v6117_v54 }
 0x1ad   :  { %v778_v18 = vmax.f32 %v776_v8, %v777_v42  ;;  %v879_v13 = vsub.f32 %v6047_v5, %v6119_v27  ;;  %v1042_v6 = vmul.f32 1.442695, %v874_v20  ;;  %v1044_v33 = vmul.f32 1.442695, %v875_v30 }
 0x1ae   :  { %v751_v36 = vrot.slane %v750_v37, 1  ;;  %v785_v62 = vmax.f32 %v783_v19, %v784_v39  ;;  %v792_v1 = vmax.f32 %v790_v44, %v791_v45  ;;  %v1046_v48 = vmul.f32 1.442695, %v876_v50 }
 0x1af   :  { %v758_v3 = vrot.slane %v757_v61, 1  ;;  %v799_v10 = vmax.f32 %v797_v31, %v798_v57  ;;  %v880_v9 = vsub.f32 %v6049_v7, %v6123_v41  ;;  %v1048_v46 = vmul.f32 1.442695, %v877_v40  ;;  %v7832_v40 = vld [vmem:[#allocation37_spill] sm:$0xff] }
 0x1b0   :  { %v765_v25 = vrot.slane %v764_v38, 1  ;;  %v772_v32 = vrot.slane %v771_v21, 1  ;;  %4249 = vpow2.f32 %v1042_v6  ;;  %v1050_v54 = vmul.f32 1.442695, %v878_v35 }
 0x1b1   :  { %v779_v8 = vrot.slane %v778_v18, 1  ;;  %v881_v27 = vsub.f32 %v6055_v34, %v6131_v4  ;;  %4251 = vpow2.f32 %v1044_v33  ;;  %v1052_v63 = vmul.f32 1.442695, %v879_v13  ;;  %v7835_v13 = vld [vmem:[#allocation39_spill] sm:$0xff] }
 0x1b2   :  { %v752_v58 = vmax.f32 %v750_v37, %v751_v36  ;;  %v786_v14 = vrot.slane %v785_v62, 1  ;;  %v793_v53 = vrot.slane %v792_v1, 1  ;;  %4253 = vpow2.f32 %v1046_v48  ;;  %v7829_v37 = vld [vmem:[#allocation9_spill] sm:$0xff]  ;;  %v7837_v36 = vld [vmem:[#allocation14_spill] sm:$0xff]  ;;  %v7839_v48 = vld [vmem:[#allocation15_spill] sm:$0xff] }
 0x1b3   :  { %v800_v19 = vrot.slane %v799_v10, 1  ;;  %v882_v44 = vsub.f32 %v6069_v22, %v6149_v60  ;;  %4255 = vpow2.f32 %v1048_v46  ;;  %v1054_v41 = vmul.f32 1.442695, %v880_v9 }
 0x1b4   :  { %v759_v17 = vmax.f32 %v757_v61, %v758_v3  ;;  %v766_v51 = vmax.f32 %v764_v38, %v765_v25  ;;  %v883_v31 = vsub.f32 %v6071_v15, %v6151_v28  ;;  %4257 = vpow2.f32 %v1050_v54  ;;  %v7830_v28 = vld [vmem:[#allocation10_spill] sm:$0xff]  ;;  %v7831_v61 = vld [vmem:[#allocation12_spill] sm:$0xff] }
 0x1b5   :  { %v773_v23 = vmax.f32 %v771_v21, %v772_v32  ;;  %v780_v4 = vmax.f32 %v778_v18, %v779_v8  ;;  %4259 = vpow2.f32 %v1052_v63  ;;  %v1056_v52 = vmul.f32 1.442695, %v881_v27  ;;  %v7834_v18 = vld [vmem:[#allocation20_spill] sm:$0xff] }
 0x1b6   :  { %v787_v59 = vmax.f32 %v785_v62, %v786_v14  ;;  %v794_v42 = vmax.f32 %v792_v1, %v793_v53  ;;  %v884_v20 = vsub.f32 %v6073_v12, %v6153_v43  ;;  %v885_v60 = vsub.f32 %v6075_v56, %v6155_v0  ;;  %v7833_v43 = vld [vmem:[#allocation13_spill] sm:$0xff]  ;;  %v7838_v1 = vld [vmem:[#allocation18_spill] sm:$0xff] }
 0x1b7   :  { %v801_v30 = vmax.f32 %v799_v10, %v800_v19  ;;  %v886_v39 = vsub.f32 %v7829_v37, %v6157_v55  ;;  %4261 = vpow2.f32 %v1054_v41  ;;  %v1058_v45 = vmul.f32 1.442695, %v882_v44  ;;  %v7836_v55 = vld [vmem:[#allocation22_spill] sm:$0xff] }
 0x1b8   :  { %v887_v50 = vsub.f32 %v7830_v28, %v6159_v24  ;;  %v888_v57 = vsub.f32 %v7831_v61, %v6167_v11  ;;  %v889_v38 = vsub.f32 %v7832_v40, %v6171_v16  ;;  %v1060_v21 = vmul.f32 1.442695, %v883_v31  ;;  %v7840_v11 = vld [vmem:[#allocation25_spill] sm:$0xff] }
 0x1b9   :  { %v890_v35 = vsub.f32 %v7833_v43, %v752_v58  ;;  %v891_v0 = vsub.f32 %v7834_v18, %v759_v17  ;;  %v892_v6 = vsub.f32 %v7835_v13, %v766_v51  ;;  %4263 = vpow2.f32 %v1056_v52 }
 0x1ba   :  { %v893_v33 = vsub.f32 %v7836_v55, %v773_v23  ;;  %v894_v62 = vsub.f32 %v7837_v36, %v780_v4  ;;  %v895_v24 = vsub.f32 %v7838_v1, %v787_v59  ;;  %v896_v3 = vsub.f32 %v7839_v48, %v794_v42 }
 0x1bb   :  { %v897_v10 = vsub.f32 %v7840_v11, %v801_v30  ;;  %4265 = vpow2.f32 %v1058_v45  ;;  %v1062_v16 = vmul.f32 1.442695, %v884_v20  ;;  %v1064_v9 = vmul.f32 1.442695, %v885_v60 }
 0x1bc   :  { %4267 = vpow2.f32 %v1060_v21  ;;  %v1066_v46 = vmul.f32 1.442695, %v886_v39  ;;  %v1068_v25 = vmul.f32 1.442695, %v887_v50  ;;  %v1070_v32 = vmul.f32 1.442695, %v888_v57 }
 0x1bd   :  { %v6205_v54 = vpop.eup %4249  ;;  %v1072_v8 = vmul.f32 1.442695, %v889_v38  ;;  %v1074_v27 = vmul.f32 1.442695, %v890_v35  ;;  %v1076_v63 = vmul.f32 1.442695, %v891_v0  ;;  %4269 = vpow2.f32 %v1062_v16 }
 0x1be   :  { %7841 = vst [vmem:[#allocation21_spill] sm:$0xff] %v6205_v54  ;;  %v6207_v58 = vpop.eup %4251  ;;  %v6209_v14 = vmul.f32 1.442695, %v892_v6  ;;  %v6211_v53 = vmul.f32 1.442695, %v893_v33  ;;  %4271 = vpow2.f32 %v1064_v9  ;;  %v1594_v42 = vsel %vm129_vm0, %v6205_v54, 0.0 }
 0x1bf   :  { %7842 = vst [vmem:[#allocation23_spill] sm:$0xff] %v6207_v58  ;;  %v6213_v19 = vmul.f32 1.442695, %v894_v62  ;;  %v6215_v44 = vpop.eup %4253  ;;  %v6217_v41 = vmul.f32 1.442695, %v895_v24  ;;  %v1601_v20 = vsel %vm129_vm0, %v6207_v58, 0.0  ;;  %4273 = vpow2.f32 %v1066_v46 }
 0x1c0   :  { %7843 = vst [vmem:[#allocation27_spill] sm:$0xff] %v6215_v44  ;;  %v6219_v17 = vmul.f32 1.442695, %v896_v3  ;;  %v6221_v51 = vmul.f32 1.442695, %v897_v10  ;;  %v6223_v31 = vpop.eup %4255  ;;  %v1608_v45 = vsel %vm129_vm0, %v6215_v44, 0.0  ;;  %4275 = vpow2.f32 %v1068_v25 }
 0x1c1   :  { %7844 = vst [vmem:[#allocation24_spill] sm:$0xff] %v6223_v31  ;;  %v6228_v59 = vpop.eup %4257  ;;  %v1615_v21 = vsel %vm129_vm0, %v6223_v31, 0.0  ;;  %v1595_v62 = vrot.slane %v1594_v42, 4  ;;  %v1602_v24 = vrot.slane %v1601_v20, 4  ;;  %v1609_v16 = vrot.slane %v1608_v45, 4 }
 0x1c2   :  { %7845 = vst [vmem:[#allocation26_spill] sm:$0xff] %v6228_v59  ;;  %v6236_v39 = vpop.eup %4259  ;;  %v1622_v3 = vsel %vm129_vm0, %v6228_v59, 0.0  ;;  %v1616_v0 = vrot.slane %v1615_v21, 4  ;;  %4277 = vpow2.f32 %v1070_v32 }
 0x1c3   :  { %7846 = vst [vmem:[#allocation28_spill] sm:$0xff] %v6236_v39  ;;  %v1629_v9 = vsel %vm129_vm0, %v6236_v39, 0.0  ;;  %v1623_v30 = vrot.slane %v1622_v3, 4  ;;  %v1596_v35 = vadd.f32 %v1595_v62, %v1594_v42  ;;  %v1603_v52 = vadd.f32 %v1602_v24, %v1601_v20 }
 0x1c4   :  { %v6248_v33 = vpop.eup %4261  ;;  %v1630_v4 = vrot.slane %v1629_v9, 4  ;;  %4279 = vpow2.f32 %v1072_v8  ;;  %v1610_v6 = vadd.f32 %v1609_v16, %v1608_v45  ;;  %v1617_v50 = vadd.f32 %v1616_v0, %v1615_v21 }
 0x1c5   :  { %7847 = vst [vmem:[#allocation29_spill] sm:$0xff] %v6248_v33  ;;  %v1636_v46 = vsel %vm129_vm0, %v6248_v33, 0.0  ;;  %4281 = vpow2.f32 %v1074_v27  ;;  %v1624_v10 = vadd.f32 %v1623_v30, %v1622_v3  ;;  %v1597_v8 = vrot.slane %v1596_v35, 2 }
 0x1c6   :  { %v6256_v38 = vpop.eup %4263  ;;  %v1637_v57 = vrot.slane %v1636_v46, 4  ;;  %4283 = vpow2.f32 %v1076_v63  ;;  %v1604_v45 = vrot.slane %v1603_v52, 2  ;;  %v1631_v62 = vadd.f32 %v1630_v4, %v1629_v9 }
 0x1c7   :  { %7848 = vst [vmem:[#allocation30_spill] sm:$0xff] %v6256_v38  ;;  %v1643_v25 = vsel %vm129_vm0, %v6256_v38, 0.0  ;;  %4285 = vpow2.f32 %v6209_v14  ;;  %v1611_v21 = vrot.slane %v1610_v6, 2  ;;  %v1618_v0 = vrot.slane %v1617_v50, 2 }
 0x1c8   :  { %v6264_v60 = vpop.eup %4265  ;;  %v1644_v39 = vrot.slane %v1643_v25, 4  ;;  %v1638_v63 = vadd.f32 %v1637_v57, %v1636_v46  ;;  %4287 = vpow2.f32 %v6211_v53  ;;  %v1625_v42 = vrot.slane %v1624_v10, 2 }
 0x1c9   :  { %7849 = vst [vmem:[#allocation31_spill] sm:$0xff] %v6264_v60  ;;  %v6266_v23 = vpop.eup %4267  ;;  %v1650_v32 = vsel %vm129_vm0, %v6264_v60, 0.0  ;;  %4289 = vpow2.f32 %v6213_v19  ;;  %v1598_v59 = vadd.f32 %v1597_v8, %v1596_v35  ;;  %v1632_v60 = vrot.slane %v1631_v62, 2 }
 0x1ca   :  { %7850 = vst [vmem:[#allocation32_spill] sm:$0xff] %v6266_v23  ;;  %v6274_v20 = vpop.eup %4269  ;;  %v1657_v24 = vsel %vm129_vm0, %v6266_v23, 0.0  ;;  %v1651_v30 = vrot.slane %v1650_v32, 4  ;;  %v1645_v3 = vadd.f32 %v1644_v39, %v1643_v25  ;;  %v1605_v23 = vadd.f32 %v1604_v45, %v1603_v52 }
 0x1cb   :  { %7851 = vst [vmem:[#allocation33_spill] sm:$0xff] %v6274_v20  ;;  %v6278_v27 = vpop.eup %4271  ;;  %v1658_v4 = vrot.slane %v1657_v24, 4  ;;  %v1664_v9 = vsel %vm129_vm0, %v6274_v20, 0.0  ;;  %4291 = vpow2.f32 %v6217_v41  ;;  %v1612_v53 = vadd.f32 %v1611_v21, %v1610_v6 }
 0x1cc   :  { %7852 = vst [vmem:[#allocation16_spill] sm:$0xff] %v6278_v27  ;;  %v1671_v14 = vsel %vm129_vm0, %v6278_v27, 0.0  ;;  %v1639_v57 = vrot.slane %v1638_v63, 2  ;;  %v1652_v39 = vadd.f32 %v1651_v30, %v1650_v32  ;;  %v6289_v46 = vpop.eup %4273  ;;  %4293 = vpow2.f32 %v6219_v17 }
 0x1cd   :  { %7853 = vst [vmem:[#allocation17_spill] sm:$0xff] %v6289_v46  ;;  %v1619_v19 = vadd.f32 %v1618_v0, %v1617_v50  ;;  %v1646_v25 = vrot.slane %v1645_v3, 2  ;;  %v1665_v16 = vrot.slane %v1664_v9, 4  ;;  %v1626_v38 = vadd.f32 %v1625_v42, %v1624_v10  ;;  %v6293_v8 = vpop.eup %4275 }
 0x1ce   :  { %v1659_v20 = vadd.f32 %v1658_v4, %v1657_v24  ;;  %v1672_v35 = vrot.slane %v1671_v14, 4  ;;  %7854 = vst [vmem:[#allocation34_spill] sm:$0xff] %v6293_v8  ;;  %4295 = vpow2.f32 %v6221_v51  ;;  %v1599_v41 = vrot.slane %v1598_v59, 1 }
 0x1cf   :  { %v1606_v6 = vrot.slane %v1605_v23, 1  ;;  %v1633_v45 = vadd.f32 %v1632_v60, %v1631_v62  ;;  %v6296_v32 = vpop.eup %4277  ;;  %v1613_v21 = vrot.slane %v1612_v53, 1  ;;  %v1640_v30 = vadd.f32 %v1639_v57, %v1638_v63 }
 0x1d0   :  { %7855 = vst [vmem:[#allocation35_spill] sm:$0xff] %v6296_v32  ;;  %v1653_v17 = vrot.slane %v1652_v39, 2  ;;  %v1678_v50 = vsel %vm129_vm0, %v6289_v46, 0.0  ;;  %v1620_v42 = vrot.slane %v1619_v19, 1  ;;  %v1647_v24 = vadd.f32 %v1646_v25, %v1645_v3 }
 0x1d1   :  { %v6300_v10 = vpop.eup %4279  ;;  %v1666_v0 = vadd.f32 %v1665_v16, %v1664_v9  ;;  %v1627_v51 = vrot.slane %v1626_v38, 1  ;;  %v1660_v27 = vrot.slane %v1659_v20, 2  ;;  %v1673_v60 = vadd.f32 %v1672_v35, %v1671_v14 }
 0x1d2   :  { %7856 = vst [vmem:[#allocation36_spill] sm:$0xff] %v6300_v10  ;;  %v6303_v52 = vpop.eup %4281  ;;  %v6308_v63 = vadd.f32 %v1599_v41, %v1598_v59  ;;  %v6310_v57 = vadd.f32 %v1606_v6, %v1605_v23  ;;  %v1634_v46 = vrot.slane %v1633_v45, 1  ;;  %v1679_v31 = vrot.slane %v1678_v50, 4 }
 0x1d3   :  { %7857 = vst [vmem:[#allocation38_spill] sm:$0xff] %v6303_v52  ;;  %v6306_v33 = vpop.eup %4283  ;;  %v6312_v44 = vadd.f32 %v1613_v21, %v1612_v53  ;;  %v1641_v3 = vrot.slane %v1640_v30, 1  ;;  %v1654_v16 = vadd.f32 %v1653_v17, %v1652_v39  ;;  %v1685_v9 = vsel %vm129_vm0, %v6293_v8, 0.0 }
 0x1d4   :  { %7858 = vst [vmem:[#allocation40_spill] sm:$0xff] %v6306_v33  ;;  %v6316_v25 = vpop.eup %4285  ;;  %v6318_v14 = vadd.f32 %v1620_v42, %v1619_v19  ;;  %v1648_v35 = vrot.slane %v1647_v24, 1  ;;  %v1667_v62 = vrot.slane %v1666_v0, 2  ;;  %v1692_v59 = vsel %vm129_vm0, %v6296_v32, 0.0 }
 0x1d5   :  { %7859 = vst [vmem:[#allocation42_spill] sm:$0xff] %v6316_v25  ;;  %v6322_v23 = vpop.eup %4287  ;;  %v6324_v41 = vadd.f32 %v1627_v51, %v1626_v38  ;;  %v1661_v53 = vadd.f32 %v1660_v27, %v1659_v20  ;;  %v1674_v6 = vrot.slane %v1673_v60, 2  ;;  %v1699_v39 = vsel %vm129_vm0, %v6300_v10, 0.0 }
 0x1d6   :  { %7860 = vst [vmem:[#allocation41_spill] sm:$0xff] %v6322_v23  ;;  %v6328_v21 = vpop.eup %4289  ;;  %v6330_v17 = vadd.f32 %v1634_v46, %v1633_v45  ;;  %v1680_v19 = vadd.f32 %v1679_v31, %v1678_v50  ;;  %v1686_v42 = vrot.slane %v1685_v9, 4  ;;  %v1706_v4 = vsel %vm129_vm0, %v6303_v52, 0.0 }
 0x1d7   :  { %7861 = vst [vmem:[#allocation19_spill] sm:$0xff] %v6328_v21  ;;  %v6334_v8 = vadd.f32 %v1641_v3, %v1640_v30  ;;  %v1655_v32 = vrot.slane %v1654_v16, 1  ;;  %v1693_v48 = vrot.slane %v1692_v59, 4  ;;  %v1713_v38 = vsel %vm129_vm0, %v6306_v33, 0.0 }
 0x1d8   :  { %v6338_v20 = vpop.eup %4291  ;;  %v6340_v27 = vadd.f32 %v1648_v35, %v1647_v24  ;;  %v1668_v51 = vadd.f32 %v1667_v62, %v1666_v0  ;;  %v1700_v10 = vrot.slane %v1699_v39, 4  ;;  %v1720_v31 = vsel %vm129_vm0, %v6316_v25, 0.0 }
 0x1d9   :  { %7862 = vst [vmem:[#allocation8_spill] sm:$0xff] %v6338_v20  ;;  %v6344_v46 = vpop.eup %4293  ;;  %v1662_v45 = vrot.slane %v1661_v53, 1  ;;  %v1675_v50 = vadd.f32 %v1674_v6, %v1673_v60  ;;  %v1707_v30 = vrot.slane %v1706_v4, 4  ;;  %v1727_v3 = vsel %vm129_vm0, %v6322_v23, 0.0 }
 0x1da   :  { %7863 = vst [vmem:[#allocation9_spill] sm:$0xff] %v6344_v46  ;;  %v1681_v52 = vrot.slane %v1680_v19, 2  ;;  %v1687_v1 = vadd.f32 %v1686_v42, %v1685_v9  ;;  %v1714_v33 = vrot.slane %v1713_v38, 4  ;;  %v1734_v24 = vsel %vm129_vm0, %v6328_v21, 0.0 }
 0x1db   :  { %v6350_v35 = vpop.eup %4295  ;;  %v1656_v0 = vadd.f32 %v1655_v32, %v1654_v16  ;;  %v1694_v62 = vadd.f32 %v1693_v48, %v1692_v59  ;;  %v1721_v36 = vrot.slane %v1720_v31, 4  ;;  %v1741_v25 = vsel %vm129_vm0, %v6338_v20, 0.0 }
 0x1dc   :  { %v1669_v58 = vrot.slane %v1668_v51, 1  ;;  %v1701_v60 = vadd.f32 %v1700_v10, %v1699_v39  ;;  %v1728_v6 = vrot.slane %v1727_v3, 4  ;;  %v1748_v23 = vsel %vm129_vm0, %v6344_v46, 0.0 }
 0x1dd   :  { %v1663_v55 = vadd.f32 %v1662_v45, %v1661_v53  ;;  %v1676_v9 = vrot.slane %v1675_v50, 1  ;;  %v1708_v42 = vadd.f32 %v1707_v30, %v1706_v4  ;;  %v1735_v13 = vrot.slane %v1734_v24, 4 }
 0x1de   :  { %v1688_v18 = vrot.slane %v1687_v1, 2  ;;  %v1715_v21 = vadd.f32 %v1714_v33, %v1713_v38  ;;  %v1742_v54 = vrot.slane %v1741_v25, 4  ;;  %v1755_v48 = vsel %vm129_vm0, %v6350_v35, 0.0 }
 0x1df   :  { %v1682_v32 = vadd.f32 %v1681_v52, %v1680_v19  ;;  %v1695_v16 = vrot.slane %v1694_v62, 2  ;;  %v1722_v59 = vadd.f32 %v1721_v36, %v1720_v31  ;;  %v1749_v20 = vrot.slane %v1748_v23, 4 }
 0x1e0   :  { %v1670_v43 = vadd.f32 %v1669_v58, %v1668_v51  ;;  %v1702_v10 = vrot.slane %v1701_v60, 2  ;;  %v1729_v39 = vadd.f32 %v1728_v6, %v1727_v3  ;;  %v1756_v40 = vrot.slane %v1755_v48, 4 }
 0x1e1   :  { %v1677_v61 = vadd.f32 %v1676_v9, %v1675_v50  ;;  %v1709_v46 = vrot.slane %v1708_v42, 2  ;;  %v1736_v53 = vadd.f32 %v1735_v13, %v1734_v24  ;;  %4297 = vrcp.f32 %v6308_v63 }
 0x1e2   :  { %v1689_v4 = vadd.f32 %v1688_v18, %v1687_v1  ;;  %v1716_v45 = vrot.slane %v1715_v21, 2  ;;  %v1743_v33 = vadd.f32 %v1742_v54, %v1741_v25  ;;  %4299 = vrcp.f32 %v6310_v57 }
 0x1e3   :  { %v1696_v38 = vadd.f32 %v1695_v16, %v1694_v62  ;;  %v1723_v30 = vrot.slane %v1722_v59, 2  ;;  %v1750_v52 = vadd.f32 %v1749_v20, %v1748_v23  ;;  %4301 = vrcp.f32 %v6312_v44 }
 0x1e4   :  { %v1703_v36 = vadd.f32 %v1702_v10, %v1701_v60  ;;  %v1730_v58 = vrot.slane %v1729_v39, 2  ;;  %v1757_v19 = vadd.f32 %v1756_v40, %v1755_v48  ;;  %4303 = vrcp.f32 %v6318_v14 }
 0x1e5   :  { %v1683_v51 = vrot.slane %v1682_v32, 1  ;;  %v1710_v31 = vadd.f32 %v1709_v46, %v1708_v42  ;;  %v1737_v13 = vrot.slane %v1736_v53, 2  ;;  %4305 = vrcp.f32 %v6324_v41 }
 0x1e6   :  { %v1690_v18 = vrot.slane %v1689_v4, 1  ;;  %v1717_v1 = vadd.f32 %v1716_v45, %v1715_v21  ;;  %v1744_v54 = vrot.slane %v1743_v33, 2  ;;  %4307 = vrcp.f32 %v6330_v17 }
 0x1e7   :  { %v1697_v63 = vrot.slane %v1696_v38, 1  ;;  %v1724_v57 = vadd.f32 %v1723_v30, %v1722_v59  ;;  %v1751_v25 = vrot.slane %v1750_v52, 2  ;;  %4309 = vrcp.f32 %v6334_v8 }
 0x1e8   :  { %v1704_v44 = vrot.slane %v1703_v36, 1  ;;  %v1731_v23 = vadd.f32 %v1730_v58, %v1729_v39  ;;  %v1758_v40 = vrot.slane %v1757_v19, 2  ;;  %4311 = vrcp.f32 %v6340_v27  ;;  %v4639_v39 = vld [vmem:[#allocation2 + $0x248] sm:$0xff]  ;;  %v4641_v58 = vld [vmem:[#allocation2 + $0x258] sm:$0xff] }
 0x1e9   :  { %v1684_v14 = vadd.f32 %v1683_v51, %v1682_v32  ;;  %v1711_v20 = vrot.slane %v1710_v31, 1  ;;  %v1738_v46 = vadd.f32 %v1737_v13, %v1736_v53  ;;  %4313 = vrcp.f32 %v1656_v0  ;;  %v4638_v32 = vld [vmem:[#allocation2 + $0x240] sm:$0xff] }
 0x1ea   :  { %v1691_v41 = vadd.f32 %v1690_v18, %v1689_v4  ;;  %v1718_v50 = vrot.slane %v1717_v1, 1  ;;  %v1745_v21 = vadd.f32 %v1744_v54, %v1743_v33  ;;  %4315 = vrcp.f32 %v1663_v55  ;;  %v4643_v54 = vld [vmem:[#allocation2 + $0x268] sm:$0xff] }
 0x1eb   :  { %v1698_v3 = vadd.f32 %v1697_v63, %v1696_v38  ;;  %v1725_v17 = vrot.slane %v1724_v57, 1  ;;  %v1752_v24 = vadd.f32 %v1751_v25, %v1750_v52  ;;  %4317 = vrcp.f32 %v1670_v43  ;;  %v4640_v38 = vld [vmem:[#allocation2 + $0x250] sm:$0xff] }
 0x1ec   :  { %v1705_v62 = vadd.f32 %v1704_v44, %v1703_v36  ;;  %v1732_v60 = vrot.slane %v1731_v23, 1  ;;  %v1759_v8 = vadd.f32 %v1758_v40, %v1757_v19  ;;  %4319 = vrcp.f32 %v1677_v61  ;;  %v4645_v40 = vld [vmem:[#allocation2 + $0x278] sm:$0xff] }
 0x1ed   :  { %v1712_v6 = vadd.f32 %v1711_v20, %v1710_v31  ;;  %v1739_v9 = vrot.slane %v1738_v46, 1  ;;  %4321 = vrcp.f32 %v1684_v14  ;;  %v2440_v27 = vrot.slane %v7840_v11, 7  ;;  %v4642_v31 = vld [vmem:[#allocation2 + $0x260] sm:$0xff] }
 0x1ee   :  { %v4298_v42 = vpop.eup %4297  ;;  %v1719_v48 = vadd.f32 %v1718_v50, %v1717_v1  ;;  %v1746_v0 = vrot.slane %v1745_v21, 1  ;;  %4323 = vrcp.f32 %v1691_v41  ;;  %v7864_v55 = vrot.slane %v6000_v2, 7 }
 0x1ef   :  { %v6369_v59 = vpop.eup %4299  ;;  %v1726_v43 = vadd.f32 %v1725_v17, %v1724_v57  ;;  %v1753_v10 = vrot.slane %v1752_v24, 1  ;;  %4325 = vrcp.f32 %v1698_v3  ;;  %v7865_v61 = vrot.slane %v6018_v47, 7  ;;  %v4644_v57 = vld [vmem:[#allocation2 + $0x270] sm:$0xff] }
 0x1f0   :  { %v2609_v16 = vsub.f32 %v4638_v32, %v7864_v55  ;;  %v4302_v4 = vpop.eup %4301  ;;  %v1733_v45 = vadd.f32 %v1732_v60, %v1731_v23  ;;  %v1760_v33 = vrot.slane %v1759_v8, 1  ;;  %4327 = vrcp.f32 %v1705_v62 }
 0x1f1   :  { %v2610_v53 = vsub.f32 %v4639_v39, %v7865_v61  ;;  %v7866_v30 = vrot.slane %v6036_v26, 7  ;;  %v6375_v36 = vpop.eup %4303  ;;  %v1740_v2 = vadd.f32 %v1739_v9, %v1738_v46  ;;  %4329 = vrcp.f32 %v1712_v6  ;;  %v7878_v9 = vld [vmem:[#allocation12_spill] sm:$0xff]  ;;  %v7884_v61 = vld [vmem:[#allocation21_spill] sm:$0xff] }
 0x1f2   :  { %v7867_v19 = vrot.slane %v6041_v29, 7  ;;  %v7868_v47 = vrot.slane %v6043_v49, 7  ;;  %v6381_v18 = vpop.eup %4305  ;;  %v1747_v1 = vadd.f32 %v1746_v0, %v1745_v21  ;;  %4331 = vrcp.f32 %v1719_v48 }
 0x1f3   :  { %v2611_v52 = vsub.f32 %v4640_v38, %v7866_v30  ;;  %v7869_v26 = vrot.slane %v6047_v5, 7  ;;  %v7870_v25 = vrot.slane %v6049_v7, 7  ;;  %v6387_v23 = vpop.eup %4307  ;;  %v1754_v29 = vadd.f32 %v1753_v10, %v1752_v24 }
 0x1f4   :  { %v2612_v51 = vsub.f32 %v4641_v58, %v7867_v19  ;;  %v2613_v13 = vsub.f32 %v4642_v31, %v7868_v47  ;;  %4333 = vrcp.f32 %v1726_v43  ;;  %v7871_v49 = vrot.slane %v6055_v34, 7  ;;  %v4310_v41 = vpop.eup %4309  ;;  %v7887_v58 = vld [vmem:[#allocation39_spill] sm:$0xff]  ;;  %v7889_v47 = vld [vmem:[#allocation22_spill] sm:$0xff] }
 0x1f5   :  { %v2614_v63 = vsub.f32 %v4643_v54, %v7869_v26  ;;  %v2615_v44 = vsub.f32 %v4644_v57, %v7870_v25  ;;  %v7872_v20 = vrot.slane %v6069_v22, 7  ;;  %v1761_v50 = vadd.f32 %v1760_v33, %v1759_v8  ;;  %v4312_v17 = vpop.eup %4311  ;;  %v7885_v33 = vld [vmem:[#allocation20_spill] sm:$0xff]  ;;  %v7891_v26 = vld [vmem:[#allocation23_spill] sm:$0xff]  ;;  %v7892_v25 = vld [vmem:[#allocation14_spill] sm:$0xff] }
 0x1f6   :  { %v2616_v14 = vsub.f32 %v4645_v40, %v7871_v49  ;;  %4335 = vrcp.f32 %v1733_v45  ;;  %v7873_v5 = vrot.slane %v6071_v15, 7  ;;  %v7874_v21 = vrot.slane %v6073_v12, 7  ;;  %v4314_v8 = vpop.eup %4313 }
 0x1f7   :  { %v2617_v46 = vsub.f32 %v6069_v22, %v7872_v20  ;;  %4337 = vrcp.f32 %v1740_v2  ;;  %v7875_v34 = vrot.slane %v6075_v56, 7  ;;  %v7876_v62 = vrot.slane %v7829_v37, 7  ;;  %v4316_v32 = vpop.eup %4315  ;;  %v7894_v20 = vld [vmem:[#allocation27_spill] sm:$0xff] }
 0x1f8   :  { %v2618_v7 = vsub.f32 %v6071_v15, %v7873_v5  ;;  %v2619_v3 = vsub.f32 %v6073_v12, %v7874_v21  ;;  %v3834_v60 = vmul.f32 -1.442695, %v2609_v16  ;;  %4339 = vrcp.f32 %v1747_v1  ;;  %v7895_v5 = vld [vmem:[#allocation18_spill] sm:$0xff] }
 0x1f9   :  { %v2620_v24 = vsub.f32 %v6075_v56, %v7875_v34  ;;  %v2621_v22 = vsub.f32 %v7829_v37, %v7876_v62  ;;  %v7877_v6 = vrot.slane %v7830_v28, 7  ;;  %v7879_v48 = vrot.slane %v7878_v9, 7  ;;  %v7880_v56 = vld [vmem:[#allocation37_spill] sm:$0xff] }
 0x1fa   :  { %v3835_v0 = vmul.f32 -1.442695, %v2610_v53  ;;  %4341 = vrcp.f32 %v1754_v29  ;;  %v7881_v55 = vrot.slane %v7880_v56, 7  ;;  %v7882_v37 = vld [vmem:[#allocation13_spill] sm:$0xff]  ;;  %v3836_v39 = vmul.f32 -1.442695, %v2611_v52 }
 0x1fb   :  { %v2622_v15 = vsub.f32 %v7830_v28, %v7877_v6  ;;  %v6412_v12 = vsub.f32 %v7878_v9, %v7879_v48  ;;  %v7883_v16 = vrot.slane %v7882_v37, 7  ;;  %v4318_v28 = vpop.eup %4317  ;;  %4343 = vrcp.f32 %v1761_v50  ;;  %v7899_v48 = vld [vmem:[#allocation24_spill] sm:$0xff] }
 0x1fc   :  { %v6417_v43 = vsub.f32 %v7880_v56, %v7881_v55  ;;  %v6425_v45 = vmul.f32 %v4298_v42, %v7884_v61  ;;  %v7886_v53 = vrot.slane %v7885_v33, 7  ;;  %v3837_v30 = vmul.f32 -1.442695, %v2612_v51  ;;  %v4320_v2 = vpop.eup %4319  ;;  %v7900_v56 = vld [vmem:[#allocation29_spill] sm:$0xff] }
 0x1fd   :  { %v6422_v10 = vsub.f32 %v7882_v37, %v7883_v16  ;;  %v7888_v19 = vrot.slane %v7887_v58, 7  ;;  %v7890_v1 = vrot.slane %v7889_v47, 7  ;;  %4345 = vpow2.f32 %v3834_v60  ;;  %v4322_v54 = vpop.eup %4321  ;;  %v7897_v60 = vld [vmem:[#allocation15_spill] sm:$0xff]  ;;  %v7901_v16 = vld [vmem:[#allocation30_spill] sm:$0xff] }
 0x1fe   :  { %v6430_v38 = vsub.f32 %v7885_v33, %v7886_v53  ;;  %v3838_v42 = vmul.f32 -1.442695, %v2613_v13  ;;  %v6444_v57 = vmul.f32 %v6369_v59, %v7891_v26  ;;  %v7893_v51 = vrot.slane %v7892_v25, 7  ;;  %v6451_v49 = vpop.eup %4323  ;;  %v7902_v53 = vld [vmem:[#allocation26_spill] sm:$0xff] }
 0x1ff   :  { %v6435_v31 = vsub.f32 %v7887_v58, %v7888_v19  ;;  %v6440_v52 = vsub.f32 %v7889_v47, %v7890_v1  ;;  %4347 = vpow2.f32 %v3835_v0  ;;  %v3839_v40 = vmul.f32 -1.442695, %v2614_v63  ;;  %v6461_v34 = vpop.eup %4325  ;;  %v7903_v58 = vld [vmem:[#allocation28_spill] sm:$0xff]  ;;  %v7904_v19 = vld [vmem:[#allocation31_spill] sm:$0xff] }
 0x200   :  { %v6449_v29 = vsub.f32 %v7892_v25, %v7893_v51  ;;  %v6454_v50 = vmul.f32 %v4302_v4, %v7894_v20  ;;  %v7896_v21 = vrot.slane %v7895_v5, 7  ;;  %4349 = vpow2.f32 %v3836_v39  ;;  %v6469_v4 = vpop.eup %4327 }
 0x201   :  { %v3840_v59 = vmul.f32 -1.442695, %v2615_v44  ;;  %v2183_v62 = vrot.slane %v6425_v45, 1  ;;  %v7898_v6 = vrot.slane %v7897_v60, 7  ;;  %4351 = vpow2.f32 %v3837_v30  ;;  %v6478_v37 = vpop.eup %4329 }
 0x202   :  { %v6459_v13 = vsub.f32 %v7895_v5, %v7896_v21  ;;  %v3841_v9 = vmul.f32 -1.442695, %v2616_v14  ;;  %v6473_v0 = vmul.f32 %v6375_v36, %v7899_v48  ;;  %v6476_v55 = vmul.f32 %v4310_v41, %v7900_v56  ;;  %v6484_v33 = vpop.eup %4331  ;;  %v7908_v48 = vld [vmem:[#allocation17_spill] sm:$0xff] }
 0x203   :  { %v6467_v63 = vsub.f32 %v7897_v60, %v7898_v6  ;;  %4353 = vpow2.f32 %v3838_v42  ;;  %v3842_v44 = vmul.f32 -1.442695, %v2617_v46  ;;  %v6481_v39 = vmul.f32 %v4312_v17, %v7901_v16  ;;  %v6491_v46 = vpop.eup %4333  ;;  %v7905_v42 = vld [vmem:[#allocation32_spill] sm:$0xff] }
 0x204   :  { %v2197_v61 = vrot.slane %v6444_v57, 1  ;;  %4355 = vpow2.f32 %v3839_v40  ;;  %v3843_v14 = vmul.f32 -1.442695, %v2618_v7  ;;  %v6488_v36 = vmul.f32 %v6381_v18, %v7902_v53  ;;  %v6500_v1 = vpop.eup %4335 }
 0x205   :  { %v2211_v41 = vrot.slane %v6454_v50, 1  ;;  %4357 = vpow2.f32 %v3840_v59  ;;  %v3844_v30 = vmul.f32 -1.442695, %v2619_v3  ;;  %v6495_v17 = vmul.f32 %v6387_v23, %v7903_v58  ;;  %v6506_v25 = vpop.eup %4337  ;;  %v7909_v58 = vld [vmem:[#allocation34_spill] sm:$0xff] }
 0x206   :  { %v6498_v47 = vmul.f32 %v4314_v8, %v7904_v19  ;;  %4359 = vpow2.f32 %v3841_v9  ;;  %v3845_v7 = vmul.f32 -1.442695, %v2620_v24  ;;  %v6503_v18 = vmul.f32 %v4316_v32, %v7905_v42  ;;  %v6511_v40 = vpop.eup %4339  ;;  %v7906_v24 = vld [vmem:[#allocation33_spill] sm:$0xff]  ;;  %v7910_v19 = vld [vmem:[#allocation35_spill] sm:$0xff]  ;;  %v7911_v42 = vld [vmem:[#allocation36_spill] sm:$0xff] }
 0x207   :  { %v2185_v26 = vrot.slane %v6476_v55, 7  ;;  %4361 = vpow2.f32 %v3842_v44  ;;  %v3846_v3 = vmul.f32 -1.442695, %v2621_v22  ;;  %v2184_v23 = vsel %vm2051_vm2, %v6473_v0, %v2183_v62  ;;  %v6519_v5 = vpop.eup %4341  ;;  %v7907_v62 = vld [vmem:[#allocation16_spill] sm:$0xff] }
 0x208   :  { %v2199_v51 = vrot.slane %v6481_v39, 7  ;;  %4363 = vpow2.f32 %v3843_v14  ;;  %v3847_v8 = vmul.f32 -1.442695, %v2622_v15  ;;  %v6514_v20 = vmul.f32 %v4318_v28, %v7906_v24  ;;  %v6527_v28 = vpop.eup %4343 }
 0x209   :  { %v2198_v32 = vsel %vm2051_vm2, %v6488_v36, %v2197_v61  ;;  %4365 = vpow2.f32 %v3844_v30  ;;  %v3848_v22 = vmul.f32 -1.442695, %v6412_v12  ;;  %v2212_v21 = vsel %vm2051_vm2, %v6495_v17, %v2211_v41 }
 0x20a   :  { %v2213_v59 = vrot.slane %v6498_v47, 7  ;;  %v2632_v15 = vsub.f32 %v7840_v11, %v2440_v27  ;;  %4367 = vpow2.f32 %v3845_v7  ;;  %v6530_v60 = vmul.f32 %v4320_v2, %v7907_v62  ;;  %v4346_v9 = vpop.eup %4345 }
 0x20b   :  { %v2186_v6 = vsel %vm2054_vm3, %v2185_v26, %v2184_v23  ;;  %v2187_v12 = vrot.slane %v6503_v18, 6  ;;  %4369 = vpow2.f32 %v3846_v3  ;;  %v6535_v56 = vmul.f32 %v4322_v54, %v7908_v48 }
 0x20c   :  { %v2200_v44 = vsel %vm2054_vm3, %v2199_v51, %v2198_v32  ;;  %4371 = vpow2.f32 %v3847_v8  ;;  %v3849_v11 = vmul.f32 -1.442695, %v6417_v43  ;;  %v4348_v27 = vpop.eup %4347  ;;  %v2201_v16 = vrot.slane %v6514_v20, 6 }
 0x20d   :  { %4373 = vpow2.f32 %v3848_v22  ;;  %v3850_v2 = vmul.f32 -1.442695, %v6422_v10  ;;  %v3851_v61 = vmul.f32 -1.442695, %v6430_v38  ;;  %v4350_v14 = vpop.eup %4349  ;;  %v2214_v53 = vsel %vm2054_vm3, %v2213_v59, %v2212_v21 }
 0x20e   :  { %4375 = vpow2.f32 %v3849_v11  ;;  %v3852_v54 = vmul.f32 -1.442695, %v6435_v31  ;;  %v3853_v41 = vmul.f32 -1.442695, %v6440_v52  ;;  %v4352_v30 = vpop.eup %4351  ;;  %v6547_v43 = vmul.f32 %v6451_v49, %v7909_v58  ;;  %v7915_v58 = vld [vmem:[#allocation41_spill] sm:$0xff] }
 0x20f   :  { %v6551_v7 = vmul.f32 %v6461_v34, %v7910_v19  ;;  %4377 = vpow2.f32 %v3850_v2  ;;  %v3854_v10 = vmul.f32 -1.442695, %v6449_v29  ;;  %v6556_v26 = vmul.f32 %v6469_v4, %v7911_v42  ;;  %v7912_v29 = vld [vmem:[#allocation38_spill] sm:$0xff]  ;;  %v7916_v42 = vld [vmem:[#allocation19_spill] sm:$0xff] }
 0x210   :  { %v4354_v38 = vpop.eup %4353  ;;  %v2215_v31 = vrot.slane %v6530_v60, 6  ;;  %4379 = vpow2.f32 %v3851_v61  ;;  %v3855_v52 = vmul.f32 -1.442695, %v6459_v13  ;;  %v2188_v49 = vsel %vm2057_vm4, %v2187_v12, %v2186_v6  ;;  %v7913_v12 = vld [vmem:[#allocation40_spill] sm:$0xff] }
 0x211   :  { %v4356_v3 = vpop.eup %4355  ;;  %v2189_v23 = vrot.slane %v6535_v56, 5  ;;  %4381 = vpow2.f32 %v3852_v54  ;;  %v3856_v34 = vmul.f32 -1.442695, %v6467_v63  ;;  %v6565_v8 = vmul.f32 %v6478_v37, %v7912_v29 }
 0x212   :  { %v4358_v51 = vpop.eup %4357  ;;  %v2202_v4 = vsel %vm2057_vm4, %v2201_v16, %v2200_v44  ;;  %4383 = vpow2.f32 %v3853_v41  ;;  %v3857_v24 = vmul.f32 -1.442695, %v2632_v15  ;;  %v2203_v13 = vrot.slane %v6547_v43, 5  ;;  %v7914_v16 = vld [vmem:[#allocation42_spill] sm:$0xff] }
 0x213   :  { %v4360_v32 = vpop.eup %4359  ;;  %v2217_v22 = vrot.slane %v6551_v7, 5  ;;  %4385 = vpow2.f32 %v3854_v10  ;;  %v2993_v21 = vadd.f32 1.0, %v4346_v9  ;;  %v2191_v62 = vrot.slane %v6556_v26, 4 }
 0x214   :  { %v4362_v59 = vpop.eup %4361  ;;  %v2216_v63 = vsel %vm2057_vm4, %v2215_v31, %v2214_v53  ;;  %4387 = vpow2.f32 %v3855_v52  ;;  %v2994_v6 = vadd.f32 1.0, %v4348_v27  ;;  %v6574_v48 = vmul.f32 %v6484_v33, %v7913_v12 }
 0x215   :  { %v4364_v37 = vpop.eup %4363  ;;  %v2190_v15 = vsel %vm2060_vm5, %v2189_v23, %v2188_v49  ;;  %4389 = vpow2.f32 %v3856_v34  ;;  %v2995_v44 = vadd.f32 1.0, %v4350_v14  ;;  %v6579_v9 = vmul.f32 %v6491_v46, %v7914_v16 }
 0x216   :  { %v4366_v11 = vpop.eup %4365  ;;  %v2205_v2 = vrot.slane %v6565_v8, 4  ;;  %4391 = vpow2.f32 %v3857_v24  ;;  %v2996_v61 = vadd.f32 1.0, %v4352_v30  ;;  %v2204_v27 = vsel %vm2060_vm5, %v2203_v13, %v2202_v4  ;;  %v7917_v24 = vld [vmem:[#allocation8_spill] sm:$0xff] }
 0x217   :  { %v4368_v53 = vpop.eup %4367  ;;  %v2218_v54 = vsel %vm2060_vm5, %v2217_v22, %v2216_v63  ;;  %v2997_v33 = vadd.f32 1.0, %v4354_v38  ;;  %4393 = vrcp.f32 %v2993_v21  ;;  %v6586_v14 = vmul.f32 %v6500_v1, %v7915_v58 }
 0x218   :  { %v4370_v41 = vpop.eup %4369  ;;  %v2192_v19 = vsel %vm2063_vm6, %v2191_v62, %v2190_v15  ;;  %v2998_v46 = vadd.f32 1.0, %v4356_v3  ;;  %4395 = vrcp.f32 %v2994_v6  ;;  %v6591_v30 = vmul.f32 %v6506_v25, %v7916_v42  ;;  %v7918_v62 = vld [vmem:[#allocation9_spill] sm:$0xff] }
 0x219   :  { %v4372_v10 = vpop.eup %4371  ;;  %v2219_v31 = vrot.slane %v6574_v48, 4  ;;  %v2999_v52 = vadd.f32 1.0, %v4358_v51  ;;  %4397 = vrcp.f32 %v2995_v44  ;;  %v2193_v49 = vrot.slane %v6579_v9, 3 }
 0x21a   :  { %v4374_v38 = vpop.eup %4373  ;;  %v2206_v23 = vsel %vm2063_vm6, %v2205_v2, %v2204_v27  ;;  %v3000_v1 = vadd.f32 1.0, %v4360_v32  ;;  %4399 = vrcp.f32 %v2996_v61  ;;  %v3001_v29 = vadd.f32 1.0, %v4362_v59 }
 0x21b   :  { %v4376_v34 = vpop.eup %4375  ;;  %4401 = vrcp.f32 %v2997_v33  ;;  %v3635_v3 = vrot.slane %v6425_v45, 2  ;;  %v3636_v4 = vrot.slane %v6473_v0, 1  ;;  %v6600_v13 = vmul.f32 %v6511_v40, %v7917_v24 }
 0x21c   :  { %v4378_v25 = vpop.eup %4377  ;;  %v2207_v51 = vrot.slane %v6586_v14, 3  ;;  %v3002_v22 = vadd.f32 1.0, %v4364_v37  ;;  %4403 = vrcp.f32 %v2998_v46  ;;  %v6605_v32 = vmul.f32 %v6519_v5, %v7918_v62 }
 0x21d   :  { %v4380_v21 = vpop.eup %4379  ;;  %v6608_v59 = vsel %vm2063_vm6, %v2219_v31, %v2218_v54  ;;  %v3003_v45 = vadd.f32 1.0, %v4366_v11  ;;  %4405 = vrcp.f32 %v2999_v52  ;;  %v6611_v63 = vsel %vm2066_vm7, %v2193_v49, %v2192_v19 }
 0x21e   :  { %v4382_v0 = vpop.eup %4381  ;;  %v2221_v40 = vrot.slane %v6591_v30, 3  ;;  %v3004_v6 = vadd.f32 1.0, %v4368_v53  ;;  %4407 = vrcp.f32 %v3000_v1  ;;  %v6616_v12 = vmul.f32 %v6527_v28, %v6350_v35 }
 0x21f   :  { %v4384_v37 = vpop.eup %4383  ;;  %v3005_v5 = vadd.f32 1.0, %v4370_v41  ;;  %4409 = vrcp.f32 %v3001_v29  ;;  %v3637_v15 = vsel %vm2051_vm2, %v3636_v4, %v3635_v3  ;;  %v2195_v11 = vrot.slane %v6600_v13, 2 }
 0x220   :  { %v4386_v44 = vpop.eup %4385  ;;  %v3006_v16 = vadd.f32 1.0, %v4372_v10  ;;  %4411 = vrcp.f32 %v3002_v22  ;;  %v3639_v2 = vrot.slane %v6503_v18, 7  ;;  %v3007_v27 = vadd.f32 1.0, %v4374_v38 }
 0x221   :  { %v4388_v61 = vpop.eup %4387  ;;  %4413 = vrcp.f32 %v3003_v45  ;;  %v3649_v53 = vrot.slane %v6444_v57, 2  ;;  %v3650_v54 = vrot.slane %v6488_v36, 1  ;;  %v6624_v28 = vsel %vm2066_vm7, %v2207_v51, %v2206_v23 }
 0x222   :  { %v4390_v35 = vpop.eup %4389  ;;  %v3008_v33 = vadd.f32 1.0, %v4376_v34  ;;  %4415 = vrcp.f32 %v3004_v6  ;;  %v3638_v41 = vsel %vm2054_vm3, %v6476_v55, %v3637_v15  ;;  %v2209_v19 = vrot.slane %v6605_v32, 2 }
 0x223   :  { %v4392_v58 = vpop.eup %4391  ;;  %v2223_v18 = vrot.slane %v6616_v12, 2  ;;  %v3009_v46 = vadd.f32 1.0, %v4378_v25  ;;  %4417 = vrcp.f32 %v3005_v5  ;;  %v3010_v57 = vadd.f32 1.0, %v4380_v21 }
 0x224   :  { %v4394_v10 = vpop.eup %4393  ;;  %4419 = vrcp.f32 %v3006_v16  ;;  %v3641_v36 = vrot.slane %v6535_v56, 6  ;;  %v3643_v42 = vrot.slane %v6556_v26, 5  ;;  %v3011_v52 = vadd.f32 1.0, %v4382_v0 }
 0x225   :  { %v4396_v31 = vpop.eup %4395  ;;  %4421 = vrcp.f32 %v3007_v27  ;;  %v3640_v38 = vsel %vm2057_vm4, %v3639_v2, %v3638_v41  ;;  %v3651_v55 = vsel %vm2051_vm2, %v3650_v54, %v3649_v53  ;;  %v3012_v23 = vadd.f32 1.0, %v4384_v37 }
 0x226   :  { %v4398_v49 = vpop.eup %4397  ;;  %4423 = vrcp.f32 %v3008_v33  ;;  %v3431_v1 = vrot.slane %v4394_v10, 5  ;;  %v3663_v34 = vrot.slane %v6454_v50, 2  ;;  %v3013_v3 = vadd.f32 1.0, %v4386_v44 }
 0x227   :  { %v4400_v29 = vpop.eup %4399  ;;  %4425 = vrcp.f32 %v3009_v46  ;;  %v3445_v4 = vrot.slane %v4396_v31, 5  ;;  %v3664_v56 = vrot.slane %v6495_v17, 1  ;;  %v3014_v24 = vadd.f32 1.0, %v4388_v61 }
 0x228   :  { %v4402_v25 = vpop.eup %4401  ;;  %4427 = vrcp.f32 %v3010_v57  ;;  %v3432_v51 = vrot.slane %v4400_v29, 4  ;;  %v3459_v22 = vrot.slane %v4398_v49, 5  ;;  %v3015_v62 = vadd.f32 1.0, %v4390_v35 }
 0x229   :  { %v4404_v21 = vpop.eup %4403  ;;  %4429 = vrcp.f32 %v3011_v52  ;;  %v3446_v45 = vrot.slane %v4402_v25, 4  ;;  %v3653_v0 = vrot.slane %v6514_v20, 7  ;;  %v3016_v37 = vadd.f32 1.0, %v4392_v58 }
 0x22a   :  { %v4406_v6 = vpop.eup %4405  ;;  %4431 = vrcp.f32 %v3012_v23  ;;  %v3433_v50 = vsel %vm2051_vm2, %v3432_v51, %v3431_v1  ;;  %v3460_v5 = vrot.slane %v4404_v21, 4  ;;  %v3652_v16 = vsel %vm2054_vm3, %v6481_v39, %v3651_v55 }
 0x22b   :  { %v4408_v15 = vpop.eup %4407  ;;  %4433 = vrcp.f32 %v3013_v3  ;;  %v3434_v17 = vrot.slane %v4406_v6, 3  ;;  %v3447_v44 = vsel %vm2051_vm2, %v3446_v45, %v3445_v4  ;;  %v3665_v20 = vsel %vm2051_vm2, %v3664_v56, %v3663_v34 }
 0x22c   :  { %v4410_v2 = vpop.eup %4409  ;;  %4435 = vrcp.f32 %v3014_v24  ;;  %v3448_v61 = vrot.slane %v4408_v15, 3  ;;  %v3461_v27 = vsel %vm2051_vm2, %v3460_v5, %v3459_v22  ;;  %v3655_v33 = vrot.slane %v6547_v43, 6  ;;  %v6688_v5 = vld [vmem:[#allocation2 + $0xc0] sm:$0xff] }
 0x22d   :  { %v4412_v53 = vpop.eup %4411  ;;  %4437 = vrcp.f32 %v3015_v62  ;;  %v3435_v54 = vsel %vm2054_vm3, %v3434_v17, %v3433_v50  ;;  %v3462_v35 = vrot.slane %v4410_v2, 3  ;;  %v3667_v39 = vrot.slane %v6530_v60, 7 }
 0x22e   :  { %v4414_v41 = vpop.eup %4413  ;;  %4439 = vrcp.f32 %v3016_v37  ;;  %v3436_v58 = vrot.slane %v4412_v53, 2  ;;  %v3449_v46 = vsel %vm2054_vm3, %v3448_v61, %v3447_v44  ;;  %v3654_v52 = vsel %vm2057_vm4, %v3653_v0, %v3652_v16 }
 0x22f   :  { %v4416_v10 = vpop.eup %4415  ;;  %v3450_v57 = vrot.slane %v4414_v41, 2  ;;  %v3463_v31 = vsel %vm2054_vm3, %v3462_v35, %v3461_v27  ;;  %v3666_v55 = vsel %vm2054_vm3, %v6498_v47, %v3665_v20  ;;  %v3642_v1 = vsel %vm2060_vm5, %v3641_v36, %v3640_v38 }
 0x230   :  { %v4418_v49 = vpop.eup %4417  ;;  %v3437_v23 = vsel %vm2057_vm4, %v3436_v58, %v3435_v54  ;;  %v3464_v43 = vrot.slane %v4416_v10, 2  ;;  %v3645_v34 = vrot.slane %v6579_v9, 4  ;;  %v3657_v4 = vrot.slane %v6565_v8, 5  ;;  %v6705_v10 = vld [vmem:[#allocation2 + $0xd0] sm:$0xff] }
 0x231   :  { %v4420_v29 = vpop.eup %4419  ;;  %v3438_v3 = vrot.slane %v4418_v49, 1  ;;  %v3451_v60 = vsel %vm2057_vm4, %v3450_v57, %v3449_v46  ;;  %v3669_v56 = vrot.slane %v6551_v7, 6  ;;  %v3656_v51 = vsel %vm2060_vm5, %v3655_v33, %v3654_v52  ;;  %v6698_v33 = vld [vmem:[#allocation2 + $0xc8] sm:$0xff]  ;;  %v6707_v57 = vld [vmem:[#allocation2 + $0xd8] sm:$0xff] }
 0x232   :  { %v4422_v25 = vpop.eup %4421  ;;  %v3452_v24 = vrot.slane %v4420_v29, 1  ;;  %v3465_v47 = vsel %vm2057_vm4, %v3464_v43, %v3463_v31  ;;  %v3668_v22 = vsel %vm2057_vm4, %v3667_v39, %v3666_v55  ;;  %v2222_v9 = vsel %vm2066_vm7, %v2221_v40, %v6608_v59  ;;  %v6712_v43 = vld [vmem:[#allocation2 + $0xe0] sm:$0xff]  ;;  %v6715_v29 = vld [vmem:[#allocation2 + $0xe8] sm:$0xff] }
 0x233   :  { %v4424_v21 = vpop.eup %4423  ;;  %v3439_v36 = vsel %vm2060_vm5, %v3438_v3, %v3437_v23  ;;  %v3466_v38 = vrot.slane %v4422_v25, 1  ;;  %v3644_v7 = vsel %vm2063_vm6, %v3643_v42, %v3642_v1  ;;  %v2196_v62 = vsel %vm2069_vm8, %v2195_v11, %v6611_v63 }
 0x234   :  { %v4426_v8 = vpop.eup %4425  ;;  %v3453_v45 = vsel %vm2060_vm5, %v3452_v24, %v3451_v60  ;;  %v3659_v0 = vrot.slane %v6586_v14, 4  ;;  %v3671_v6 = vrot.slane %v6574_v48, 5  ;;  %v2210_v26 = vsel %vm2069_vm8, %v2209_v19, %v6624_v28 }
 0x235   :  { %v4428_v59 = vpop.eup %4427  ;;  %v3467_v40 = vsel %vm2060_vm5, %v3466_v38, %v3465_v47  ;;  %v3658_v42 = vsel %vm2063_vm6, %v3657_v4, %v3656_v51  ;;  %v3670_v37 = vsel %vm2060_vm5, %v3669_v56, %v3668_v22  ;;  %v2224_v63 = vsel %vm2069_vm8, %v2223_v18, %v2222_v9  ;;  %v6720_v56 = vld [vmem:[#allocation2 + $0xf0] sm:$0xff] }
 0x236   :  { %v4430_v50 = vpop.eup %4429  ;;  %v3440_v14 = vsel %vm2063_vm6, %v4424_v21, %v3439_v36  ;;  %v3646_v48 = vsel %vm2066_vm7, %v3645_v34, %v3644_v7  ;;  %v3647_v11 = vrot.slane %v6600_v13, 3  ;;  %v3454_v15 = vsel %vm2063_vm6, %v4426_v8, %v3453_v45  ;;  %v7919_v13 = vld [vmem:[#allocation11_spill] sm:$0xff] }
 0x237   :  { %v4432_v28 = vpop.eup %4431  ;;  %v3441_v19 = vrot.slane %v4430_v50, 7  ;;  %v3661_v17 = vrot.slane %v6605_v32, 3  ;;  %v3673_v44 = vrot.slane %v6591_v30, 4  ;;  %v3468_v18 = vsel %vm2063_vm6, %v4428_v59, %v3467_v40  ;;  %v6728_v21 = vld [vmem:[#allocation2 + $0xf8] sm:$0xff]  ;;  %v6739_v50 = vld [vmem:[#allocation2 + $0x100] sm:$0xff] }
 0x238   :  { %v4434_v16 = vpop.eup %4433  ;;  %v3455_v2 = vrot.slane %v4432_v28, 7  ;;  %v3660_v61 = vsel %vm2066_vm7, %v3659_v0, %v3658_v42  ;;  %v3672_v27 = vsel %vm2063_vm6, %v3671_v6, %v3670_v37  ;;  %v2248_v53 = vmul.f32 %v2224_v63, %v7919_v13 }
 0x239   :  { %v4436_v20 = vpop.eup %4435  ;;  %v3442_v54 = vsel %vm2066_vm7, %v3441_v19, %v3440_v14  ;;  %v3469_v35 = vrot.slane %v4434_v16, 7  ;;  %v298_v32 = vsel %vm129_vm0, %v6688_v5, -inf  ;;  %v3648_v46 = vsel %vm2069_vm8, %v3647_v11, %v3646_v48 }
 0x23a   :  { %v4438_v30 = vpop.eup %4437  ;;  %v3443_v41 = vrot.slane %v4436_v20, 6  ;;  %v3456_v58 = vsel %vm2066_vm7, %v3455_v2, %v3454_v15  ;;  %v3675_v39 = vrot.slane %v6616_v12, 3  ;;  %v3662_v49 = vsel %vm2069_vm8, %v3661_v17, %v3660_v61  ;;  %v6741_v17 = vld [vmem:[#allocation2 + $0x108] sm:$0xff] }
 0x23b   :  { %v4440_v31 = vpop.eup %4439  ;;  %v3457_v52 = vrot.slane %v4438_v30, 6  ;;  %v3470_v55 = vsel %vm2066_vm7, %v3469_v35, %v3468_v18  ;;  %v3674_v23 = vsel %vm2066_vm7, %v3673_v44, %v3672_v27  ;;  %v299_v12 = vrot.slane %v298_v32, 4  ;;  %7920 = vst [vmem:[#allocation10_spill] sm:$0xff] %v6741_v17  ;;  %v6743_v27 = vld [vmem:[#allocation2 + $0x110] sm:$0xff]  ;;  %v6747_v35 = vld [vmem:[#allocation2 + $0x118] sm:$0xff] }
 0x23c   :  { %v3444_v1 = vsel %vm2069_vm8, %v3443_v41, %v3442_v54  ;;  %v3471_v34 = vrot.slane %v4440_v31, 6  ;;  %v305_v3 = vsel %vm129_vm0, %v6698_v33, -inf  ;;  %v312_v25 = vsel %vm129_vm0, %v6705_v10, -inf  ;;  %7921 = vst [vmem:[#allocation25_spill] sm:$0xff] %v6743_v27  ;;  %7922 = vst [vmem:[#allocation12_spill] sm:$0xff] %v6747_v35 }
 0x23d   :  { %v3458_v60 = vsel %vm2069_vm8, %v3457_v52, %v3456_v58  ;;  %v3494_v4 = vmul.f32 %v3444_v1, %v2196_v62  ;;  %v319_v24 = vsel %vm129_vm0, %v6707_v57, -inf  ;;  %v3676_v22 = vsel %vm2069_vm8, %v3675_v39, %v3674_v23  ;;  %v6751_v52 = vld [vmem:[#allocation2 + $0x120] sm:$0xff]  ;;  %v6755_v1 = vld [vmem:[#allocation2 + $0x128] sm:$0xff] }
 0x23e   :  { %v3472_v47 = vsel %vm2069_vm8, %v3471_v34, %v3470_v55  ;;  %v3495_v51 = vmul.f32 %v3458_v60, %v2210_v26  ;;  %v326_v9 = vsel %vm129_vm0, %v6712_v43, -inf  ;;  %v306_v7 = vrot.slane %v305_v3, 4  ;;  %7923 = vst [vmem:[#allocation37_spill] sm:$0xff] %v6751_v52  ;;  %7924 = vst [vmem:[#allocation13_spill] sm:$0xff] %v6755_v1 }
 0x23f   :  { %v3496_v36 = vmul.f32 %v3472_v47, %v2248_v53  ;;  %v3506_v38 = vmin.f32 %v3494_v4, 1.0  ;;  %v333_v8 = vsel %vm129_vm0, %v6715_v29, -inf  ;;  %v313_v45 = vrot.slane %v312_v25, 4 }
 0x240   :  { %v3507_v62 = vmin.f32 %v3495_v51, 1.0  ;;  %v320_v0 = vrot.slane %v319_v24, 4  ;;  %v340_v6 = vsel %vm129_vm0, %v6720_v56, -inf  ;;  %v327_v40 = vrot.slane %v326_v9, 4 }
 0x241   :  { %v3508_v59 = vmin.f32 %v3496_v36, %v7919_v13  ;;  %v3698_v26 = vmul.f32 %v3648_v46, %v3506_v38  ;;  %v347_v42 = vsel %vm129_vm0, %v6728_v21, -inf  ;;  %v300_v63 = vmax.f32 %v298_v32, %v299_v12 }
 0x242   :  { %v3699_v37 = vmul.f32 %v3662_v49, %v3507_v62  ;;  %v334_v14 = vrot.slane %v333_v8, 4  ;;  %v307_v28 = vmax.f32 %v305_v3, %v306_v7  ;;  %v341_v19 = vrot.slane %v340_v6, 4 }
 0x243   :  { %v3700_v48 = vmul.f32 %v3676_v22, %v3508_v59  ;;  %v3710_v11 = vmax.f32 %v3698_v26, %v3494_v4  ;;  %v314_v44 = vmax.f32 %v312_v25, %v313_v45  ;;  %v321_v16 = vmax.f32 %v319_v24, %v320_v0  ;;  %v6765_v26 = vld [vmem:[#allocation2 + $0x138] sm:$0xff] }
 0x244   :  { %v3711_v15 = vmax.f32 %v3699_v37, %v3495_v51  ;;  %v348_v2 = vrot.slane %v347_v42, 4  ;;  %v328_v20 = vmax.f32 %v326_v9, %v327_v40  ;;  %v354_v53 = vsel %vm129_vm0, %v6739_v50, -inf  ;;  %7926 = vst [vmem:[#allocation20_spill] sm:$0xff] %v6765_v26 }
 0x245   :  { %v3712_v18 = vmax.f32 %v3700_v48, %v3496_v36  ;;  %v3722_v61 = vmin.f32 %v3710_v11, %v3506_v38  ;;  %v301_v32 = vrot.slane %v300_v63, 2  ;;  %v335_v30 = vmax.f32 %v333_v8, %v334_v14  ;;  %v6761_v38 = vld [vmem:[#allocation2 + $0x130] sm:$0xff] }
 0x246   :  { %v3723_v54 = vmin.f32 %v3711_v15, %v3507_v62  ;;  %v308_v58 = vrot.slane %v307_v28, 2  ;;  %v342_v46 = vmax.f32 %v340_v6, %v341_v19  ;;  %v361_v39 = vsel %vm129_vm0, %v6741_v17, -inf  ;;  %7925 = vst [vmem:[#allocation21_spill] sm:$0xff] %v6761_v38 }
 0x247   :  { %v3724_v41 = vmin.f32 %v3712_v18, %v3508_v59  ;;  %v349_v55 = vmax.f32 %v347_v42, %v348_v2  ;;  %v355_v49 = vrot.slane %v354_v53, 4  ;;  %v368_v23 = vsel %vm129_vm0, %v6743_v27, -inf }
 0x248   :  { %v3737_v31 = vadd.f32 %v3723_v54, %v3722_v61  ;;  %v315_v34 = vrot.slane %v314_v44, 2  ;;  %v322_v12 = vrot.slane %v321_v16, 2  ;;  %v329_v3 = vrot.slane %v328_v20, 2 }
 0x249   :  { %v375_v60 = vsel %vm129_vm0, %v6747_v35, -inf  ;;  %v302_v25 = vmax.f32 %v300_v63, %v301_v32  ;;  %v336_v24 = vrot.slane %v335_v30, 2  ;;  %v362_v47 = vrot.slane %v361_v39, 4 }
 0x24a   :  { %v3738_v4 = vadd.f32 %v3737_v31, %v3724_v41  ;;  %v309_v51 = vmax.f32 %v307_v28, %v308_v58  ;;  %v343_v22 = vrot.slane %v342_v46, 2  ;;  %v369_v9 = vrot.slane %v368_v23, 4  ;;  %v6773_v41 = vld [vmem:[#allocation2 + $0x140] sm:$0xff] }
 0x24b   :  { %v382_v36 = vsel %vm129_vm0, %v6751_v52, -inf  ;;  %v350_v7 = vrot.slane %v349_v55, 2  ;;  %v356_v8 = vmax.f32 %v354_v53, %v355_v49  ;;  %v376_v62 = vrot.slane %v375_v60, 4  ;;  %7927 = vst [vmem:[#allocation39_spill] sm:$0xff] %v6773_v41 }
 0x24c   :  { %3739 = vadd.xlane.f32.xlu1 %v3738_v4  ;;  %v389_v45 = vsel %vm129_vm0, %v6755_v1, -inf  ;;  %v316_v0 = vmax.f32 %v314_v44, %v315_v34  ;;  %v323_v6 = vmax.f32 %v321_v16, %v322_v12  ;;  %v330_v59 = vmax.f32 %v328_v20, %v329_v3 }
 0x24d   :  { %v303_v40 = vrot.slane %v302_v25, 1  ;;  %v337_v42 = vmax.f32 %v335_v30, %v336_v24  ;;  %v363_v37 = vmax.f32 %v361_v39, %v362_v47  ;;  %v383_v63 = vrot.slane %v382_v36, 4  ;;  %v6785_v24 = vld [vmem:[#allocation2 + $0x150] sm:$0xff]  ;;  %v6787_v47 = vld [vmem:[#allocation2 + $0x158] sm:$0xff] }
 0x24e   :  { %v344_v14 = vmax.f32 %v342_v46, %v343_v22  ;;  %v370_v48 = vmax.f32 %v368_v23, %v369_v9  ;;  %v390_v11 = vrot.slane %v389_v45, 4  ;;  %v396_v28 = vsel %vm129_vm0, %v6761_v38, -inf  ;;  %7929 = vst [vmem:[#allocation23_spill] sm:$0xff] %v6785_v24  ;;  %7930 = vst [vmem:[#allocation14_spill] sm:$0xff] %v6787_v47 }
 0x24f   :  { %v310_v19 = vrot.slane %v309_v51, 1  ;;  %v351_v15 = vmax.f32 %v349_v55, %v350_v7  ;;  %v357_v2 = vrot.slane %v356_v8, 2  ;;  %v377_v18 = vmax.f32 %v375_v60, %v376_v62 }
 0x250   :  { %v317_v61 = vrot.slane %v316_v0, 1  ;;  %v324_v44 = vrot.slane %v323_v6, 1  ;;  %v331_v16 = vrot.slane %v330_v59, 1  ;;  %v403_v20 = vsel %vm129_vm0, %v6765_v26, -inf }
 0x251   :  { %v6771_v53 = vmax.f32 %v302_v25, %v303_v40  ;;  %v364_v54 = vrot.slane %v363_v37, 2  ;;  %v384_v32 = vmax.f32 %v382_v36, %v383_v63  ;;  %v397_v30 = vrot.slane %v396_v28, 4  ;;  %v6783_v25 = vld [vmem:[#allocation2 + $0x148] sm:$0xff] }
 0x252   :  { %v338_v58 = vrot.slane %v337_v42, 1  ;;  %v345_v46 = vrot.slane %v344_v14, 1  ;;  %v371_v39 = vrot.slane %v370_v48, 2  ;;  %v391_v31 = vmax.f32 %v389_v45, %v390_v11  ;;  %7928 = vst [vmem:[#allocation22_spill] sm:$0xff] %v6783_v25 }
 0x253   :  { %v352_v55 = vrot.slane %v351_v15, 1  ;;  %v358_v49 = vmax.f32 %v356_v8, %v357_v2  ;;  %v378_v23 = vrot.slane %v377_v18, 2  ;;  %v404_v34 = vrot.slane %v403_v20, 4 }
 0x254   :  { %v6775_v12 = vmax.f32 %v309_v51, %v310_v19  ;;  %v6777_v3 = vmax.f32 %v316_v0, %v317_v61  ;;  %v6779_v60 = vmax.f32 %v323_v6, %v324_v44  ;;  %v6781_v4 = vmax.f32 %v330_v59, %v331_v16  ;;  %v6791_v51 = vld [vmem:[#allocation2 + $0x160] sm:$0xff]  ;;  %v6797_v6 = vld [vmem:[#allocation2 + $0x168] sm:$0xff]  ;;  %v6799_v59 = vld [vmem:[#allocation2 + $0x170] sm:$0xff] }
 0x255   :  { %v365_v22 = vmax.f32 %v363_v37, %v364_v54  ;;  %v385_v9 = vrot.slane %v384_v32, 2  ;;  %v398_v36 = vmax.f32 %v396_v28, %v397_v30  ;;  %v410_v7 = vsel %vm129_vm0, %v6773_v41, -inf  ;;  %7931 = vst [vmem:[#allocation27_spill] sm:$0xff] %v6791_v51  ;;  %7932 = vst [vmem:[#allocation18_spill] sm:$0xff] %v6797_v6  ;;  %v6803_v28 = vld [vmem:[#allocation2 + $0x178] sm:$0xff] }
 0x256   :  { %v6793_v8 = vmax.f32 %v337_v42, %v338_v58  ;;  %v6795_v62 = vmax.f32 %v344_v14, %v345_v46  ;;  %v372_v45 = vmax.f32 %v370_v48, %v371_v39  ;;  %v392_v0 = vrot.slane %v391_v31, 2  ;;  %7933 = vst [vmem:[#allocation15_spill] sm:$0xff] %v6799_v59  ;;  %7934 = vst [vmem:[#allocation24_spill] sm:$0xff] %v6803_v28 }
 0x257   :  { %v6801_v40 = vmax.f32 %v351_v15, %v352_v55  ;;  %v359_v37 = vrot.slane %v358_v49, 1  ;;  %v379_v63 = vmax.f32 %v377_v18, %v378_v23  ;;  %v405_v11 = vmax.f32 %v403_v20, %v404_v34 }
 0x258   :  { %v411_v19 = vrot.slane %v410_v7, 4  ;;  %v417_v42 = vsel %vm129_vm0, %v6783_v25, -inf  ;;  %v424_v14 = vsel %vm129_vm0, %v6785_v24, -inf  ;;  %v431_v48 = vsel %vm129_vm0, %v6787_v47, -inf }
 0x259   :  { %v366_v2 = vrot.slane %v365_v22, 1  ;;  %v386_v61 = vmax.f32 %v384_v32, %v385_v9  ;;  %v399_v44 = vrot.slane %v398_v36, 2  ;;  %v438_v15 = vsel %vm129_vm0, %v6791_v51, -inf }
 0x25a   :  { %v373_v18 = vrot.slane %v372_v45, 1  ;;  %v393_v16 = vmax.f32 %v391_v31, %v392_v0  ;;  %v445_v20 = vsel %vm129_vm0, %v6797_v6, -inf  ;;  %v452_v54 = vsel %vm129_vm0, %v6799_v59, -inf }
 0x25b   :  { %v418_v30 = vrot.slane %v417_v42, 4  ;;  %v425_v58 = vrot.slane %v424_v14, 4  ;;  %v432_v46 = vrot.slane %v431_v48, 4  ;;  %v459_v39 = vsel %vm129_vm0, %v6803_v28, -inf }
 0x25c   :  { %v380_v55 = vrot.slane %v379_v63, 1  ;;  %v406_v32 = vrot.slane %v405_v11, 2  ;;  %v412_v23 = vmax.f32 %v410_v7, %v411_v19  ;;  %v439_v34 = vrot.slane %v438_v15, 4 }
 0x25d   :  { %v387_v9 = vrot.slane %v386_v61, 1  ;;  %v400_v13 = vmax.f32 %v398_v36, %v399_v44  ;;  %v446_v51 = vrot.slane %v445_v20, 4  ;;  %v453_v31 = vrot.slane %v452_v54, 4 }
 0x25e   :  { %v6819_v0 = vmax.f32 %v358_v49, %v359_v37  ;;  %v6821_v6 = vmax.f32 %v365_v22, %v366_v2  ;;  %v394_v47 = vrot.slane %v393_v16, 1  ;;  %v460_v59 = vrot.slane %v459_v39, 4 }
 0x25f   :  { %v6823_v24 = vmax.f32 %v372_v45, %v373_v18  ;;  %v419_v25 = vmax.f32 %v417_v42, %v418_v30  ;;  %v426_v41 = vmax.f32 %v424_v14, %v425_v58  ;;  %v433_v26 = vmax.f32 %v431_v48, %v432_v46 }
 0x260   :  { %v6825_v28 = vmax.f32 %v379_v63, %v380_v55  ;;  %v407_v38 = vmax.f32 %v405_v11, %v406_v32  ;;  %v413_v7 = vrot.slane %v412_v23, 2  ;;  %v440_v19 = vmax.f32 %v438_v15, %v439_v34 }
 0x261   :  { %v6827_v1 = vmax.f32 %v386_v61, %v387_v9  ;;  %v401_v36 = vrot.slane %v400_v13, 1  ;;  %v447_v44 = vmax.f32 %v445_v20, %v446_v51  ;;  %v454_v49 = vmax.f32 %v452_v54, %v453_v31 }
 0x262   :  { %v6829_v37 = vmax.f32 %v393_v16, %v394_v47  ;;  %v461_v22 = vmax.f32 %v459_v39, %v460_v59  ;;  %v826_v45 = vsub.f32 %v6688_v5, %v6771_v53  ;;  %v827_v42 = vsub.f32 %v6698_v33, %v6775_v12 }
 0x263   :  { %v420_v14 = vrot.slane %v419_v25, 2  ;;  %v427_v63 = vrot.slane %v426_v41, 2  ;;  %v434_v48 = vrot.slane %v433_v26, 2  ;;  %v828_v11 = vsub.f32 %v6705_v10, %v6777_v3 }
 0x264   :  { %v408_v2 = vrot.slane %v407_v38, 1  ;;  %v414_v61 = vmax.f32 %v412_v23, %v413_v7  ;;  %v441_v15 = vrot.slane %v440_v19, 2  ;;  %v829_v47 = vsub.f32 %v6707_v57, %v6779_v60 }
 0x265   :  { %v6839_v51 = vmax.f32 %v400_v13, %v401_v36  ;;  %v448_v59 = vrot.slane %v447_v44, 2  ;;  %v455_v18 = vrot.slane %v454_v49, 2  ;;  %v830_v53 = vsub.f32 %v6712_v43, %v6781_v4 }
 0x266   :  { %v462_v12 = vrot.slane %v461_v22, 2  ;;  %v831_v16 = vsub.f32 %v6715_v29, %v6793_v8  ;;  %v946_v20 = vmul.f32 1.442695, %v826_v45  ;;  %v948_v54 = vmul.f32 1.442695, %v827_v42 }
 0x267   :  { %v421_v3 = vmax.f32 %v419_v25, %v420_v14  ;;  %v428_v30 = vmax.f32 %v426_v41, %v427_v63  ;;  %v435_v58 = vmax.f32 %v433_v26, %v434_v48  ;;  %v950_v46 = vmul.f32 1.442695, %v828_v11 }
 0x268   :  { %v415_v39 = vrot.slane %v414_v61, 1  ;;  %v442_v55 = vmax.f32 %v440_v19, %v441_v15  ;;  %v832_v13 = vsub.f32 %v6720_v56, %v6795_v62  ;;  %v952_v60 = vmul.f32 1.442695, %v829_v47 }
 0x269   :  { %v449_v32 = vmax.f32 %v447_v44, %v448_v59  ;;  %v833_v4 = vsub.f32 %v6728_v21, %v6801_v40  ;;  %4441 = vpow2.f32 %v946_v20  ;;  %v954_v23 = vmul.f32 1.442695, %v830_v53  ;;  %v7936_v53 = vld [vmem:[#allocation21_spill] sm:$0xff]  ;;  %v7938_v20 = vld [vmem:[#allocation39_spill] sm:$0xff] }
 0x26a   :  { %v456_v34 = vmax.f32 %v454_v49, %v455_v18  ;;  %v463_v8 = vmax.f32 %v461_v22, %v462_v12  ;;  %4443 = vpow2.f32 %v948_v54  ;;  %v956_v9 = vmul.f32 1.442695, %v831_v16 }
 0x26b   :  { %v422_v25 = vrot.slane %v421_v3, 1  ;;  %v429_v41 = vrot.slane %v428_v30, 1  ;;  %v436_v26 = vrot.slane %v435_v58, 1  ;;  %4445 = vpow2.f32 %v950_v46  ;;  %v7941_v46 = vld [vmem:[#allocation14_spill] sm:$0xff] }
 0x26c   :  { %v443_v31 = vrot.slane %v442_v55, 1  ;;  %v834_v7 = vsub.f32 %v6739_v50, %v6819_v0  ;;  %4447 = vpow2.f32 %v952_v60  ;;  %v958_v62 = vmul.f32 1.442695, %v832_v13  ;;  %v7943_v60 = vld [vmem:[#allocation18_spill] sm:$0xff] }
 0x26d   :  { %v409_v19 = vmax.f32 %v407_v38, %v408_v2  ;;  %v450_v36 = vrot.slane %v449_v32, 1  ;;  %v835_v40 = vsub.f32 %v6741_v17, %v6821_v6  ;;  %4449 = vpow2.f32 %v954_v23 }
 0x26e   :  { %v457_v44 = vrot.slane %v456_v34, 1  ;;  %v464_v49 = vrot.slane %v463_v8, 1  ;;  %4451 = vpow2.f32 %v956_v9  ;;  %v960_v22 = vmul.f32 1.442695, %v833_v4 }
 0x26f   :  { %v416_v45 = vmax.f32 %v414_v61, %v415_v39  ;;  %v423_v42 = vmax.f32 %v421_v3, %v422_v25  ;;  %v430_v14 = vmax.f32 %v428_v30, %v429_v41  ;;  %v437_v63 = vmax.f32 %v435_v58, %v436_v26  ;;  %v7935_v61 = vld [vmem:[#allocation13_spill] sm:$0xff]  ;;  %v7939_v3 = vld [vmem:[#allocation22_spill] sm:$0xff] }
 0x270   :  { %v444_v48 = vmax.f32 %v442_v55, %v443_v31  ;;  %v836_v0 = vsub.f32 %v6743_v27, %v6823_v24  ;;  %4453 = vpow2.f32 %v958_v62  ;;  %v962_v11 = vmul.f32 1.442695, %v834_v7  ;;  %v7937_v24 = vld [vmem:[#allocation20_spill] sm:$0xff]  ;;  %v7942_v55 = vld [vmem:[#allocation27_spill] sm:$0xff] }
 0x271   :  { %v451_v38 = vmax.f32 %v449_v32, %v450_v36  ;;  %v837_v2 = vsub.f32 %v6747_v35, %v6825_v28  ;;  %v838_v6 = vsub.f32 %v6751_v52, %v6827_v1  ;;  %v964_v15 = vmul.f32 1.442695, %v835_v40  ;;  %v7940_v28 = vld [vmem:[#allocation23_spill] sm:$0xff] }
 0x272   :  { %v458_v47 = vmax.f32 %v456_v34, %v457_v44  ;;  %v465_v59 = vmax.f32 %v463_v8, %v464_v49  ;;  %v839_v18 = vsub.f32 %v7935_v61, %v6829_v37  ;;  %4455 = vpow2.f32 %v960_v22  ;;  %v7946_v34 = vld [vmem:[#allocation24_spill] sm:$0xff] }
 0x273   :  { %v840_v12 = vsub.f32 %v7936_v53, %v6839_v51  ;;  %v841_v16 = vsub.f32 %v7937_v24, %v409_v19  ;;  %v842_v54 = vsub.f32 %v7938_v20, %v416_v45  ;;  %v843_v30 = vsub.f32 %v7939_v3, %v423_v42  ;;  %v7945_v51 = vld [vmem:[#allocation15_spill] sm:$0xff] }
 0x274   :  { %v844_v58 = vsub.f32 %v7940_v28, %v430_v14  ;;  %v845_v1 = vsub.f32 %v7941_v46, %v437_v63  ;;  %4457 = vpow2.f32 %v962_v11  ;;  %v966_v39 = vmul.f32 1.442695, %v836_v0 }
 0x275   :  { %v846_v13 = vsub.f32 %v7942_v55, %v444_v48  ;;  %v847_v37 = vsub.f32 %v7943_v60, %v451_v38  ;;  %4459 = vpow2.f32 %v964_v15  ;;  %v968_v32 = vmul.f32 1.442695, %v837_v2 }
 0x276   :  { %v6870_v4 = vpop.eup %4441  ;;  %v848_v23 = vsub.f32 %v7945_v51, %v458_v47  ;;  %v849_v8 = vsub.f32 %v7946_v34, %v465_v59  ;;  %v970_v9 = vmul.f32 1.442695, %v838_v6  ;;  %v972_v41 = vmul.f32 1.442695, %v839_v18 }
 0x277   :  { %7944 = vst [vmem:[#allocation29_spill] sm:$0xff] %v6870_v4  ;;  %v6874_v25 = vpop.eup %4443  ;;  %v974_v26 = vmul.f32 1.442695, %v840_v12  ;;  %v976_v31 = vmul.f32 1.442695, %v841_v16  ;;  %4461 = vpow2.f32 %v966_v39  ;;  %v1258_v63 = vsel %vm129_vm0, %v6870_v4, 0.0 }
 0x278   :  { %7947 = vst [vmem:[#allocation30_spill] sm:$0xff] %v6874_v25  ;;  %v6876_v7 = vpop.eup %4445  ;;  %v978_v62 = vmul.f32 1.442695, %v842_v54  ;;  %v980_v19 = vmul.f32 1.442695, %v843_v30  ;;  %4463 = vpow2.f32 %v968_v32  ;;  %v1265_v48 = vsel %vm129_vm0, %v6874_v25, 0.0 }
 0x279   :  { %7948 = vst [vmem:[#allocation26_spill] sm:$0xff] %v6876_v7  ;;  %v6878_v36 = vmul.f32 1.442695, %v844_v58  ;;  %v6880_v40 = vpop.eup %4447  ;;  %v6882_v44 = vmul.f32 1.442695, %v845_v1  ;;  %v1272_v11 = vsel %vm129_vm0, %v6876_v7, 0.0  ;;  %4465 = vpow2.f32 %v970_v9 }
 0x27a   :  { %7949 = vst [vmem:[#allocation28_spill] sm:$0xff] %v6880_v40  ;;  %v6884_v49 = vmul.f32 1.442695, %v846_v13  ;;  %v6886_v22 = vmul.f32 1.442695, %v847_v37  ;;  %v6888_v45 = vpop.eup %4449  ;;  %v1279_v15 = vsel %vm129_vm0, %v6880_v40, 0.0  ;;  %4467 = vpow2.f32 %v972_v41 }
 0x27b   :  { %7950 = vst [vmem:[#allocation31_spill] sm:$0xff] %v6888_v45  ;;  %v6890_v42 = vmul.f32 1.442695, %v848_v23  ;;  %v6892_v14 = vmul.f32 1.442695, %v849_v8  ;;  %v6898_v0 = vpop.eup %4451  ;;  %v1259_v16 = vrot.slane %v1258_v63, 4  ;;  %4469 = vpow2.f32 %v974_v26 }
 0x27c   :  { %7951 = vst [vmem:[#allocation32_spill] sm:$0xff] %v6898_v0  ;;  %v1266_v54 = vrot.slane %v1265_v48, 4  ;;  %v1286_v30 = vsel %vm129_vm0, %v6888_v45, 0.0  ;;  %v1273_v1 = vrot.slane %v1272_v11, 4  ;;  %v1293_v39 = vsel %vm129_vm0, %v6898_v0, 0.0 }
 0x27d   :  { %v6910_v12 = vpop.eup %4453  ;;  %v1280_v32 = vrot.slane %v1279_v15, 4  ;;  %v1287_v59 = vrot.slane %v1286_v30, 4  ;;  %v1260_v13 = vadd.f32 %v1259_v16, %v1258_v63  ;;  %v1294_v2 = vrot.slane %v1293_v39, 4 }
 0x27e   :  { %7952 = vst [vmem:[#allocation33_spill] sm:$0xff] %v6910_v12  ;;  %v1300_v9 = vsel %vm129_vm0, %v6910_v12, 0.0  ;;  %v1267_v6 = vadd.f32 %v1266_v54, %v1265_v48  ;;  %4471 = vpow2.f32 %v976_v31  ;;  %v1274_v23 = vadd.f32 %v1273_v1, %v1272_v11 }
 0x27f   :  { %v6918_v37 = vpop.eup %4455  ;;  %v1301_v8 = vrot.slane %v1300_v9, 4  ;;  %4473 = vpow2.f32 %v978_v62  ;;  %v1281_v18 = vadd.f32 %v1280_v32, %v1279_v15  ;;  %v1288_v58 = vadd.f32 %v1287_v59, %v1286_v30  ;;  %v3736_v62 = vpop.xlane.xlu1 %3735 }
 0x280   :  { %7953 = vst [vmem:[#allocation16_spill] sm:$0xff] %v6918_v37  ;;  %v1307_v41 = vsel %vm129_vm0, %v6918_v37, 0.0  ;;  %4475 = vpow2.f32 %v980_v19  ;;  %v1261_v31 = vrot.slane %v1260_v13, 2  ;;  %v1268_v11 = vrot.slane %v1267_v6, 2  ;;  %v3728_v15 = vpop.xlane.xlu0 %3727  ;;  %3743 = vst [vmem:[#allocation5 + $0x10] sm:$0xff] %v3736_v62 }
 0x281   :  { %v6926_v47 = vpop.eup %4457  ;;  %v1308_v0 = vrot.slane %v1307_v41, 4  ;;  %v1295_v16 = vadd.f32 %v1294_v2, %v1293_v39  ;;  %4477 = vpow2.f32 %v6878_v36  ;;  %v1275_v19 = vrot.slane %v1274_v23, 2  ;;  %3741 = vst [vmem:[#allocation5] sm:$0xff] %v3728_v15 }
 0x282   :  { %7954 = vst [vmem:[#allocation17_spill] sm:$0xff] %v6926_v47  ;;  %v6928_v38 = vpop.eup %4459  ;;  %v1314_v26 = vsel %vm129_vm0, %v6926_v47, 0.0  ;;  %v1302_v59 = vadd.f32 %v1301_v8, %v1300_v9  ;;  %4479 = vpow2.f32 %v6882_v44  ;;  %v1282_v32 = vrot.slane %v1281_v18, 2 }
 0x283   :  { %7955 = vst [vmem:[#allocation34_spill] sm:$0xff] %v6928_v38  ;;  %v1321_v54 = vsel %vm129_vm0, %v6928_v38, 0.0  ;;  %v1315_v30 = vrot.slane %v1314_v26, 4  ;;  %v1309_v63 = vadd.f32 %v1308_v0, %v1307_v41  ;;  %4481 = vpow2.f32 %v6884_v49 }
 0x284   :  { %v6936_v48 = vpop.eup %4461  ;;  %v1289_v39 = vrot.slane %v1288_v58, 2  ;;  %v1322_v12 = vrot.slane %v1321_v54, 4  ;;  %v1262_v47 = vadd.f32 %v1261_v31, %v1260_v13  ;;  %v1269_v36 = vadd.f32 %v1268_v11, %v1267_v6 }
 0x285   :  { %7956 = vst [vmem:[#allocation35_spill] sm:$0xff] %v6936_v48  ;;  %v6940_v1 = vpop.eup %4463  ;;  %v1328_v38 = vsel %vm129_vm0, %v6936_v48, 0.0  ;;  %v1296_v37 = vrot.slane %v1295_v16, 2  ;;  %4483 = vpow2.f32 %v6886_v22  ;;  %v1276_v44 = vadd.f32 %v1275_v19, %v1274_v23 }
 0x286   :  { %7957 = vst [vmem:[#allocation36_spill] sm:$0xff] %v6940_v1  ;;  %v1335_v8 = vsel %vm129_vm0, %v6940_v1, 0.0  ;;  %v1303_v9 = vrot.slane %v1302_v59, 2  ;;  %v1316_v0 = vadd.f32 %v1315_v30, %v1314_v26  ;;  %v6951_v41 = vpop.eup %4465  ;;  %4485 = vpow2.f32 %v6890_v42 }
 0x287   :  { %7958 = vst [vmem:[#allocation38_spill] sm:$0xff] %v6951_v41  ;;  %v1283_v49 = vadd.f32 %v1282_v32, %v1281_v18  ;;  %v1310_v62 = vrot.slane %v1309_v63, 2  ;;  %v1329_v15 = vrot.slane %v1328_v38, 4  ;;  %v1290_v2 = vadd.f32 %v1289_v39, %v1288_v58  ;;  %v6955_v31 = vpop.eup %4467 }
 0x288   :  { %v1323_v48 = vadd.f32 %v1322_v12, %v1321_v54  ;;  %v1336_v13 = vrot.slane %v1335_v8, 4  ;;  %7959 = vst [vmem:[#allocation40_spill] sm:$0xff] %v6955_v31  ;;  %4487 = vpow2.f32 %v6892_v14  ;;  %v1263_v22 = vrot.slane %v1262_v47, 1  ;;  %v6958_v26 = vpop.eup %4469 }
 0x289   :  { %v1270_v23 = vrot.slane %v1269_v36, 1  ;;  %v1297_v11 = vadd.f32 %v1296_v37, %v1295_v16  ;;  %7960 = vst [vmem:[#allocation42_spill] sm:$0xff] %v6958_v26  ;;  %v1277_v19 = vrot.slane %v1276_v44, 1  ;;  %v1304_v30 = vadd.f32 %v1303_v9, %v1302_v59 }
 0x28a   :  { %v1317_v42 = vrot.slane %v1316_v0, 2  ;;  %v1342_v18 = vsel %vm129_vm0, %v6951_v41, 0.0  ;;  %v1284_v12 = vrot.slane %v1283_v49, 1  ;;  %v1311_v54 = vadd.f32 %v1310_v62, %v1309_v63 }
 0x28b   :  { %v6962_v58 = vpop.eup %4471  ;;  %v1330_v32 = vadd.f32 %v1329_v15, %v1328_v38  ;;  %v1291_v14 = vrot.slane %v1290_v2, 1  ;;  %v1324_v1 = vrot.slane %v1323_v48, 2  ;;  %v1337_v37 = vadd.f32 %v1336_v13, %v1335_v8 }
 0x28c   :  { %7961 = vst [vmem:[#allocation41_spill] sm:$0xff] %v6962_v58  ;;  %v6965_v6 = vpop.eup %4473  ;;  %v6970_v59 = vadd.f32 %v1263_v22, %v1262_v47  ;;  %v6972_v9 = vadd.f32 %v1270_v23, %v1269_v36  ;;  %v1298_v41 = vrot.slane %v1297_v11, 1  ;;  %v1343_v40 = vrot.slane %v1342_v18, 4 }
 0x28d   :  { %7962 = vst [vmem:[#allocation19_spill] sm:$0xff] %v6965_v6  ;;  %v6968_v45 = vpop.eup %4475  ;;  %v6974_v7 = vadd.f32 %v1277_v19, %v1276_v44  ;;  %v1305_v38 = vrot.slane %v1304_v30, 1  ;;  %v1318_v63 = vadd.f32 %v1317_v42, %v1316_v0  ;;  %v1349_v62 = vsel %vm129_vm0, %v6955_v31, 0.0 }
 0x28e   :  { %7963 = vst [vmem:[#allocation8_spill] sm:$0xff] %v6968_v45  ;;  %v6978_v15 = vpop.eup %4477  ;;  %v6980_v8 = vadd.f32 %v1284_v12, %v1283_v49  ;;  %v1312_v13 = vrot.slane %v1311_v54, 1  ;;  %v1331_v16 = vrot.slane %v1330_v32, 2  ;;  %v1356_v47 = vsel %vm129_vm0, %v6958_v26, 0.0 }
 0x28f   :  { %7964 = vst [vmem:[#allocation9_spill] sm:$0xff] %v6978_v15  ;;  %v6984_v36 = vpop.eup %4479  ;;  %v6986_v22 = vadd.f32 %v1291_v14, %v1290_v2  ;;  %v1325_v44 = vadd.f32 %v1324_v1, %v1323_v48  ;;  %v1338_v23 = vrot.slane %v1337_v37, 2  ;;  %v1363_v0 = vsel %vm129_vm0, %v6962_v58, 0.0 }
 0x290   :  { %7965 = vst [vmem:[#allocation23_spill] sm:$0xff] %v6984_v36  ;;  %v6990_v19 = vpop.eup %4481  ;;  %v6992_v42 = vadd.f32 %v1298_v41, %v1297_v11  ;;  %v1344_v49 = vadd.f32 %v1343_v40, %v1342_v18  ;;  %v1350_v12 = vrot.slane %v1349_v62, 4  ;;  %v1370_v39 = vsel %vm129_vm0, %v6965_v6, 0.0 }
 0x291   :  { %7966 = vst [vmem:[#allocation14_spill] sm:$0xff] %v6990_v19  ;;  %v6996_v31 = vadd.f32 %v1305_v38, %v1304_v30  ;;  %v1319_v26 = vrot.slane %v1318_v63, 1  ;;  %v1357_v3 = vrot.slane %v1356_v47, 4  ;;  %v1377_v48 = vsel %vm129_vm0, %v6968_v45, 0.0 }
 0x292   :  { %v7000_v1 = vpop.eup %4483  ;;  %v7002_v2 = vadd.f32 %v1312_v13, %v1311_v54  ;;  %v1332_v14 = vadd.f32 %v1331_v16, %v1330_v32  ;;  %v1364_v58 = vrot.slane %v1363_v0, 4  ;;  %v1384_v40 = vsel %vm129_vm0, %v6978_v15, 0.0 }
 0x293   :  { %7967 = vst [vmem:[#allocation27_spill] sm:$0xff] %v7000_v1  ;;  %v7006_v41 = vpop.eup %4485  ;;  %v1326_v11 = vrot.slane %v1325_v44, 1  ;;  %v1339_v18 = vadd.f32 %v1338_v23, %v1337_v37  ;;  %v1371_v30 = vrot.slane %v1370_v39, 4  ;;  %v1391_v38 = vsel %vm129_vm0, %v6984_v36, 0.0 }
 0x294   :  { %7968 = vst [vmem:[#allocation18_spill] sm:$0xff] %v7006_v41  ;;  %v1345_v6 = vrot.slane %v1344_v49, 2  ;;  %v1351_v25 = vadd.f32 %v1350_v12, %v1349_v62  ;;  %v1378_v45 = vrot.slane %v1377_v48, 4  ;;  %v1398_v54 = vsel %vm129_vm0, %v6990_v19, 0.0 }
 0x295   :  { %v7012_v13 = vpop.eup %4487  ;;  %v1320_v32 = vadd.f32 %v1319_v26, %v1318_v63  ;;  %v1358_v16 = vadd.f32 %v1357_v3, %v1356_v47  ;;  %v1385_v20 = vrot.slane %v1384_v40, 4  ;;  %v1405_v15 = vsel %vm129_vm0, %v7000_v1, 0.0 }
 0x296   :  { %v1333_v4 = vrot.slane %v1332_v14, 1  ;;  %v1365_v37 = vadd.f32 %v1364_v58, %v1363_v0  ;;  %v1392_v23 = vrot.slane %v1391_v38, 4  ;;  %v1412_v36 = vsel %vm129_vm0, %v7006_v41, 0.0 }
 0x297   :  { %v1327_v24 = vadd.f32 %v1326_v11, %v1325_v44  ;;  %v1340_v62 = vrot.slane %v1339_v18, 1  ;;  %v1372_v12 = vadd.f32 %v1371_v30, %v1370_v39  ;;  %v1399_v53 = vrot.slane %v1398_v54, 4 }
 0x298   :  { %v1352_v61 = vrot.slane %v1351_v25, 2  ;;  %v1379_v19 = vadd.f32 %v1378_v45, %v1377_v48  ;;  %v1406_v52 = vrot.slane %v1405_v15, 4  ;;  %v1419_v3 = vsel %vm129_vm0, %v7012_v13, 0.0 }
 0x299   :  { %v1346_v26 = vadd.f32 %v1345_v6, %v1344_v49  ;;  %v1359_v63 = vrot.slane %v1358_v16, 2  ;;  %v1386_v47 = vadd.f32 %v1385_v20, %v1384_v40  ;;  %v1413_v1 = vrot.slane %v1412_v36, 4 }
 0x29a   :  { %v1334_v35 = vadd.f32 %v1333_v4, %v1332_v14  ;;  %v1366_v58 = vrot.slane %v1365_v37, 2  ;;  %v1393_v0 = vadd.f32 %v1392_v23, %v1391_v38  ;;  %v1420_v27 = vrot.slane %v1419_v3, 4 }
 0x29b   :  { %v1341_v17 = vadd.f32 %v1340_v62, %v1339_v18  ;;  %v1373_v41 = vrot.slane %v1372_v12, 2  ;;  %v1400_v44 = vadd.f32 %v1399_v53, %v1398_v54  ;;  %4489 = vrcp.f32 %v6970_v59 }
 0x29c   :  { %v1353_v39 = vadd.f32 %v1352_v61, %v1351_v25  ;;  %v1380_v11 = vrot.slane %v1379_v19, 2  ;;  %v1407_v45 = vadd.f32 %v1406_v52, %v1405_v15  ;;  %4491 = vrcp.f32 %v6972_v9 }
 0x29d   :  { %v1360_v48 = vadd.f32 %v1359_v63, %v1358_v16  ;;  %v1387_v30 = vrot.slane %v1386_v47, 2  ;;  %v1414_v6 = vadd.f32 %v1413_v1, %v1412_v36  ;;  %4493 = vrcp.f32 %v6974_v7 }
 0x29e   :  { %v1367_v20 = vadd.f32 %v1366_v58, %v1365_v37  ;;  %v1394_v4 = vrot.slane %v1393_v0, 2  ;;  %v1421_v49 = vadd.f32 %v1420_v27, %v1419_v3  ;;  %4495 = vrcp.f32 %v6980_v8 }
 0x29f   :  { %v1347_v14 = vrot.slane %v1346_v26, 1  ;;  %v1374_v40 = vadd.f32 %v1373_v41, %v1372_v12  ;;  %v1401_v53 = vrot.slane %v1400_v44, 2  ;;  %4497 = vrcp.f32 %v6986_v22 }
 0x2a0   :  { %v1354_v61 = vrot.slane %v1353_v39, 1  ;;  %v1381_v25 = vadd.f32 %v1380_v11, %v1379_v19  ;;  %v1408_v52 = vrot.slane %v1407_v45, 2  ;;  %4499 = vrcp.f32 %v6992_v42 }
 0x2a1   :  { %v1361_v59 = vrot.slane %v1360_v48, 1  ;;  %v1388_v9 = vadd.f32 %v1387_v30, %v1386_v47  ;;  %v1415_v15 = vrot.slane %v1414_v6, 2  ;;  %4501 = vrcp.f32 %v6996_v31 }
 0x2a2   :  { %v1368_v7 = vrot.slane %v1367_v20, 1  ;;  %v1395_v36 = vadd.f32 %v1394_v4, %v1393_v0  ;;  %v1422_v27 = vrot.slane %v1421_v49, 2  ;;  %4503 = vrcp.f32 %v7002_v2 }
 0x2a3   :  { %v1348_v8 = vadd.f32 %v1347_v14, %v1346_v26  ;;  %v1375_v1 = vrot.slane %v1374_v40, 1  ;;  %v1402_v41 = vadd.f32 %v1401_v53, %v1400_v44  ;;  %4505 = vrcp.f32 %v1320_v32  ;;  %v4647_v14 = vld [vmem:[#allocation2 + $0xc8] sm:$0xff] }
 0x2a4   :  { %v1355_v22 = vadd.f32 %v1354_v61, %v1353_v39  ;;  %v1382_v18 = vrot.slane %v1381_v25, 1  ;;  %v1409_v19 = vadd.f32 %v1408_v52, %v1407_v45  ;;  %4507 = vrcp.f32 %v1327_v24  ;;  %v4648_v52 = vld [vmem:[#allocation2 + $0xd0] sm:$0xff] }
 0x2a5   :  { %v1362_v38 = vadd.f32 %v1361_v59, %v1360_v48  ;;  %v1389_v42 = vrot.slane %v1388_v9, 1  ;;  %v1416_v54 = vadd.f32 %v1415_v15, %v1414_v6  ;;  %4509 = vrcp.f32 %v1334_v35  ;;  %v4646_v48 = vld [vmem:[#allocation2 + $0xc0] sm:$0xff] }
 0x2a6   :  { %v1369_v16 = vadd.f32 %v1368_v7, %v1367_v20  ;;  %v1396_v37 = vrot.slane %v1395_v36, 1  ;;  %v1423_v31 = vadd.f32 %v1422_v27, %v1421_v49  ;;  %4511 = vrcp.f32 %v1341_v17 }
 0x2a7   :  { %v1376_v23 = vadd.f32 %v1375_v1, %v1374_v40  ;;  %v1403_v62 = vrot.slane %v1402_v41, 1  ;;  %4513 = vrcp.f32 %v1348_v8  ;;  %v2387_v2 = vrot.slane %v7940_v28, 7  ;;  %v4650_v8 = vld [vmem:[#allocation2 + $0xe0] sm:$0xff] }
 0x2a8   :  { %v7029_v12 = vpop.eup %4489  ;;  %v1383_v32 = vadd.f32 %v1382_v18, %v1381_v25  ;;  %v1410_v3 = vrot.slane %v1409_v19, 1  ;;  %4515 = vrcp.f32 %v1355_v22  ;;  %v2388_v24 = vrot.slane %v7941_v46, 7 }
 0x2a9   :  { %v7032_v26 = vpop.eup %4491  ;;  %v1390_v63 = vadd.f32 %v1389_v42, %v1388_v9  ;;  %v1417_v35 = vrot.slane %v1416_v54, 1  ;;  %4517 = vrcp.f32 %v1362_v38  ;;  %v2389_v47 = vrot.slane %v7942_v55, 7  ;;  %v4653_v42 = vld [vmem:[#allocation2 + $0xf8] sm:$0xff] }
 0x2aa   :  { %v7035_v17 = vpop.eup %4493  ;;  %v1397_v58 = vadd.f32 %v1396_v37, %v1395_v36  ;;  %v1424_v0 = vrot.slane %v1423_v31, 1  ;;  %4519 = vrcp.f32 %v1369_v16  ;;  %v2390_v44 = vrot.slane %v7943_v60, 7 }
 0x2ab   :  { %v7038_v39 = vpop.eup %4495  ;;  %v1404_v11 = vadd.f32 %v1403_v62, %v1402_v41  ;;  %4521 = vrcp.f32 %v1376_v23  ;;  %v2391_v45 = vrot.slane %v7945_v51, 7  ;;  %v7969_v30 = vrot.slane %v6688_v5, 7  ;;  %v4649_v5 = vld [vmem:[#allocation2 + $0xd8] sm:$0xff]  ;;  %v4651_v41 = vld [vmem:[#allocation2 + $0xe8] sm:$0xff] }
 0x2ac   :  { %v7043_v20 = vpop.eup %4497  ;;  %v1411_v4 = vadd.f32 %v1410_v3, %v1409_v19  ;;  %4523 = vrcp.f32 %v1383_v32  ;;  %v2392_v49 = vrot.slane %v7946_v34, 7  ;;  %v7970_v40 = vrot.slane %v6698_v33, 7 }
 0x2ad   :  { %v2561_v6 = vsub.f32 %v4646_v48, %v7969_v30  ;;  %v7048_v61 = vpop.eup %4499  ;;  %v1418_v25 = vadd.f32 %v1417_v35, %v1416_v54  ;;  %4525 = vrcp.f32 %v1390_v63  ;;  %v7971_v59 = vrot.slane %v6705_v10, 7  ;;  %v4652_v10 = vld [vmem:[#allocation2 + $0xf0] sm:$0xff] }
 0x2ae   :  { %v2562_v53 = vsub.f32 %v4647_v14, %v7970_v40  ;;  %v7972_v15 = vrot.slane %v6707_v57, 7  ;;  %v7054_v36 = vpop.eup %4501  ;;  %v1425_v27 = vadd.f32 %v1424_v0, %v1423_v31  ;;  %4527 = vrcp.f32 %v1397_v58  ;;  %v7982_v0 = vld [vmem:[#allocation12_spill] sm:$0xff]  ;;  %v7986_v40 = vld [vmem:[#allocation13_spill] sm:$0xff] }
 0x2af   :  { %v2563_v9 = vsub.f32 %v4648_v52, %v7971_v59  ;;  %v7973_v33 = vrot.slane %v6712_v43, 7  ;;  %v7974_v22 = vrot.slane %v6715_v29, 7  ;;  %v7060_v19 = vpop.eup %4503  ;;  %4529 = vrcp.f32 %v1404_v11  ;;  %v4654_v43 = vld [vmem:[#allocation2 + $0x100] sm:$0xff]  ;;  %v7978_v29 = vld [vmem:[#allocation10_spill] sm:$0xff] }
 0x2b0   :  { %v2564_v7 = vsub.f32 %v4649_v5, %v7972_v15  ;;  %v7975_v38 = vrot.slane %v6720_v56, 7  ;;  %v7976_v54 = vrot.slane %v6728_v21, 7  ;;  %v3786_v37 = vmul.f32 -1.442695, %v2561_v6  ;;  %v4506_v31 = vpop.eup %4505  ;;  %v7980_v56 = vld [vmem:[#allocation25_spill] sm:$0xff] }
 0x2b1   :  { %v2565_v1 = vsub.f32 %v4650_v8, %v7973_v33  ;;  %v2566_v18 = vsub.f32 %v4651_v41, %v7974_v22  ;;  %4531 = vrcp.f32 %v1411_v4  ;;  %v7977_v23 = vrot.slane %v6739_v50, 7  ;;  %v7071_v35 = vpop.eup %4507  ;;  %v7984_v50 = vld [vmem:[#allocation37_spill] sm:$0xff]  ;;  %v7990_v33 = vld [vmem:[#allocation20_spill] sm:$0xff] }
 0x2b2   :  { %v2567_v57 = vsub.f32 %v4652_v10, %v7975_v38  ;;  %v2568_v16 = vsub.f32 %v4653_v42, %v7976_v54  ;;  %v7979_v32 = vrot.slane %v7978_v29, 7  ;;  %v3787_v63 = vmul.f32 -1.442695, %v2562_v53  ;;  %v7079_v6 = vpop.eup %4509  ;;  %v7988_v5 = vld [vmem:[#allocation21_spill] sm:$0xff] }
 0x2b3   :  { %v2569_v62 = vsub.f32 %v4654_v43, %v7977_v23  ;;  %4533 = vrcp.f32 %v1418_v25  ;;  %v7981_v58 = vrot.slane %v7980_v56, 7  ;;  %v7983_v11 = vrot.slane %v7982_v0, 7  ;;  %v7087_v59 = vpop.eup %4511  ;;  %v7992_v10 = vld [vmem:[#allocation29_spill] sm:$0xff] }
 0x2b4   :  { %v2570_v3 = vsub.f32 %v7978_v29, %v7979_v32  ;;  %v3788_v30 = vmul.f32 -1.442695, %v2563_v9  ;;  %4535 = vrcp.f32 %v1425_v27  ;;  %v7985_v4 = vrot.slane %v7984_v50, 7  ;;  %v7097_v22 = vpop.eup %4513  ;;  %v7995_v29 = vld [vmem:[#allocation30_spill] sm:$0xff] }
 0x2b5   :  { %v2571_v21 = vsub.f32 %v7980_v56, %v7981_v58  ;;  %v2572_v48 = vsub.f32 %v7982_v0, %v7983_v11  ;;  %v7987_v53 = vrot.slane %v7986_v40, 7  ;;  %v3789_v52 = vmul.f32 -1.442695, %v2564_v7  ;;  %v7993_v7 = vld [vmem:[#allocation39_spill] sm:$0xff]  ;;  %v7108_v23 = vpop.eup %4515  ;;  %v7998_v0 = vld [vmem:[#allocation26_spill] sm:$0xff] }
 0x2b6   :  { %v2573_v14 = vsub.f32 %v7984_v50, %v7985_v4  ;;  %v7989_v15 = vrot.slane %v7988_v5, 7  ;;  %v7991_v9 = vrot.slane %v7990_v33, 7  ;;  %4537 = vpow2.f32 %v3786_v37  ;;  %v7117_v58 = vpop.eup %4517  ;;  %v7999_v4 = vld [vmem:[#allocation28_spill] sm:$0xff] }
 0x2b7   :  { %v2574_v25 = vsub.f32 %v7986_v40, %v7987_v53  ;;  %v3790_v27 = vmul.f32 -1.442695, %v2565_v1  ;;  %v7101_v38 = vmul.f32 %v7029_v12, %v7992_v10  ;;  %v7994_v42 = vrot.slane %v7993_v7, 7  ;;  %v7996_v1 = vld [vmem:[#allocation22_spill] sm:$0xff]  ;;  %v8000_v53 = vld [vmem:[#allocation31_spill] sm:$0xff] }
 0x2b8   :  { %v2575_v8 = vsub.f32 %v7988_v5, %v7989_v15  ;;  %v7095_v41 = vsub.f32 %v7990_v33, %v7991_v9  ;;  %4539 = vpow2.f32 %v3787_v63  ;;  %v3791_v43 = vmul.f32 -1.442695, %v2566_v18  ;;  %v8002_v15 = vld [vmem:[#allocation33_spill] sm:$0xff]  ;;  %v8003_v33 = vld [vmem:[#allocation16_spill] sm:$0xff] }
 0x2b9   :  { %v7106_v54 = vsub.f32 %v7993_v7, %v7994_v42  ;;  %v7112_v32 = vmul.f32 %v7032_v26, %v7995_v29  ;;  %v7997_v37 = vrot.slane %v7996_v1, 7  ;;  %4541 = vpow2.f32 %v3788_v30  ;;  %v7126_v26 = vpop.eup %4519 }
 0x2ba   :  { %v3792_v12 = vmul.f32 -1.442695, %v2567_v57  ;;  %v7121_v11 = vmul.f32 %v7035_v17, %v7998_v0  ;;  %v2579_v18 = vsub.f32 %v7940_v28, %v2387_v2  ;;  %4543 = vpow2.f32 %v3789_v52  ;;  %v7134_v17 = vpop.eup %4521  ;;  %v8007_v0 = vld [vmem:[#allocation36_spill] sm:$0xff] }
 0x2bb   :  { %v2578_v56 = vsub.f32 %v7996_v1, %v7997_v37  ;;  %v3793_v63 = vmul.f32 -1.442695, %v2568_v16  ;;  %v2580_v50 = vsub.f32 %v7941_v46, %v2388_v24  ;;  %v2581_v57 = vsub.f32 %v7942_v55, %v2389_v47  ;;  %v7141_v16 = vpop.eup %4523 }
 0x2bc   :  { %4545 = vpow2.f32 %v3790_v27  ;;  %v3794_v30 = vmul.f32 -1.442695, %v2569_v62  ;;  %v7138_v40 = vmul.f32 %v7038_v39, %v7999_v4  ;;  %v2099_v28 = vrot.slane %v7101_v38, 1  ;;  %v7148_v47 = vpop.eup %4525  ;;  %v8001_v62 = vld [vmem:[#allocation32_spill] sm:$0xff] }
 0x2bd   :  { %4547 = vpow2.f32 %v3791_v43  ;;  %v3795_v2 = vmul.f32 -1.442695, %v2570_v3  ;;  %v7145_v46 = vmul.f32 %v7043_v20, %v8000_v53  ;;  %v2113_v55 = vrot.slane %v7112_v32, 1  ;;  %v7155_v5 = vpop.eup %4527  ;;  %v8005_v43 = vld [vmem:[#allocation34_spill] sm:$0xff] }
 0x2be   :  { %4549 = vpow2.f32 %v3792_v12  ;;  %v3796_v24 = vmul.f32 -1.442695, %v2571_v21  ;;  %v7152_v39 = vmul.f32 %v7048_v61, %v8001_v62  ;;  %v2127_v52 = vrot.slane %v7121_v11, 1  ;;  %v7165_v27 = vpop.eup %4529  ;;  %v8004_v61 = vld [vmem:[#allocation17_spill] sm:$0xff] }
 0x2bf   :  { %4551 = vpow2.f32 %v3793_v63  ;;  %v3797_v3 = vmul.f32 -1.442695, %v2572_v48  ;;  %v7159_v20 = vmul.f32 %v7054_v36, %v8002_v15  ;;  %v7163_v9 = vmul.f32 %v7060_v19, %v8003_v33  ;;  %v7173_v42 = vpop.eup %4531 }
 0x2c0   :  { %4553 = vpow2.f32 %v3794_v30  ;;  %v3798_v21 = vmul.f32 -1.442695, %v2573_v14  ;;  %v7168_v10 = vmul.f32 %v4506_v31, %v8004_v61  ;;  %v2582_v48 = vsub.f32 %v7943_v60, %v2390_v44  ;;  %v7181_v31 = vpop.eup %4533 }
 0x2c1   :  { %4555 = vpow2.f32 %v3795_v2  ;;  %v3799_v7 = vmul.f32 -1.442695, %v2574_v25  ;;  %v2583_v36 = vsub.f32 %v7945_v51, %v2391_v45  ;;  %v2584_v19 = vsub.f32 %v7946_v34, %v2392_v49  ;;  %v7191_v51 = vpop.eup %4535 }
 0x2c2   :  { %4557 = vpow2.f32 %v3796_v24  ;;  %v3800_v14 = vmul.f32 -1.442695, %v2575_v8  ;;  %v7185_v29 = vmul.f32 %v7071_v35, %v8005_v43  ;;  %v2100_v60 = vsel %vm2051_vm2, %v7138_v40, %v2099_v28  ;;  %v8006_v35 = vld [vmem:[#allocation35_spill] sm:$0xff]  ;;  %v8008_v24 = vld [vmem:[#allocation38_spill] sm:$0xff] }
 0x2c3   :  { %v2114_v44 = vsel %vm2051_vm2, %v7145_v46, %v2113_v55  ;;  %4559 = vpow2.f32 %v3797_v3  ;;  %v2101_v45 = vrot.slane %v7159_v20, 7  ;;  %v2115_v34 = vrot.slane %v7163_v9, 7  ;;  %v4538_v25 = vpop.eup %4537  ;;  %v8009_v3 = vld [vmem:[#allocation40_spill] sm:$0xff] }
 0x2c4   :  { %v2128_v49 = vsel %vm2051_vm2, %v7152_v39, %v2127_v52  ;;  %4561 = vpow2.f32 %v3798_v21  ;;  %v7199_v8 = vmul.f32 %v7079_v6, %v8006_v35  ;;  %v2129_v1 = vrot.slane %v7168_v10, 7 }
 0x2c5   :  { %4563 = vpow2.f32 %v3799_v7  ;;  %v3801_v37 = vmul.f32 -1.442695, %v7095_v41  ;;  %v4540_v12 = vpop.eup %4539  ;;  %v7205_v63 = vmul.f32 %v7087_v59, %v8007_v0  ;;  %v3802_v30 = vmul.f32 -1.442695, %v7106_v54  ;;  %v8012_v0 = vld [vmem:[#allocation19_spill] sm:$0xff] }
 0x2c6   :  { %4565 = vpow2.f32 %v3800_v14  ;;  %v3803_v4 = vmul.f32 -1.442695, %v2578_v56  ;;  %v4542_v28 = vpop.eup %4541  ;;  %v2103_v2 = vrot.slane %v7185_v29, 6  ;;  %v3804_v6 = vmul.f32 -1.442695, %v2579_v18  ;;  %v8010_v14 = vld [vmem:[#allocation42_spill] sm:$0xff] }
 0x2c7   :  { %4567 = vpow2.f32 %v3801_v37  ;;  %v3805_v53 = vmul.f32 -1.442695, %v2580_v50  ;;  %v4544_v55 = vpop.eup %4543  ;;  %v7211_v62 = vmul.f32 %v7097_v22, %v8008_v24  ;;  %v2102_v41 = vsel %vm2054_vm3, %v2101_v45, %v2100_v60  ;;  %v8011_v45 = vld [vmem:[#allocation41_spill] sm:$0xff] }
 0x2c8   :  { %4569 = vpow2.f32 %v3802_v30  ;;  %v3806_v59 = vmul.f32 -1.442695, %v2581_v57  ;;  %v7216_v54 = vmul.f32 %v7108_v23, %v8009_v3  ;;  %v2116_v56 = vsel %vm2054_vm3, %v2115_v34, %v2114_v44  ;;  %v8013_v30 = vld [vmem:[#allocation8_spill] sm:$0xff]  ;;  %v8014_v3 = vld [vmem:[#allocation9_spill] sm:$0xff] }
 0x2c9   :  { %v4546_v52 = vpop.eup %4545  ;;  %4571 = vpow2.f32 %v3803_v4  ;;  %v3807_v15 = vmul.f32 -1.442695, %v2582_v48  ;;  %v2117_v50 = vrot.slane %v7199_v8, 6  ;;  %v2131_v33 = vrot.slane %v7205_v63, 6 }
 0x2ca   :  { %v4548_v18 = vpop.eup %4547  ;;  %4573 = vpow2.f32 %v3804_v6  ;;  %v3808_v22 = vmul.f32 -1.442695, %v2583_v36  ;;  %v2104_v61 = vsel %vm2057_vm4, %v2103_v2, %v2102_v41  ;;  %v2130_v57 = vsel %vm2054_vm3, %v2129_v1, %v2128_v49 }
 0x2cb   :  { %v4550_v21 = vpop.eup %4549  ;;  %4575 = vpow2.f32 %v3805_v53  ;;  %v3809_v7 = vmul.f32 -1.442695, %v2584_v19  ;;  %v7225_v43 = vmul.f32 %v7117_v58, %v8010_v14  ;;  %v2105_v48 = vrot.slane %v7211_v62, 5 }
 0x2cc   :  { %v4552_v23 = vpop.eup %4551  ;;  %4577 = vpow2.f32 %v3806_v59  ;;  %v2945_v60 = vadd.f32 1.0, %v4538_v25  ;;  %v7230_v36 = vmul.f32 %v7126_v26, %v8011_v45  ;;  %v2119_v34 = vrot.slane %v7216_v54, 5 }
 0x2cd   :  { %v4554_v44 = vpop.eup %4553  ;;  %4579 = vpow2.f32 %v3807_v15  ;;  %v2946_v49 = vadd.f32 1.0, %v4540_v12  ;;  %v2118_v19 = vsel %vm2057_vm4, %v2117_v50, %v2116_v56  ;;  %v2132_v1 = vsel %vm2057_vm4, %v2131_v33, %v2130_v57 }
 0x2ce   :  { %v4556_v35 = vpop.eup %4555  ;;  %4581 = vpow2.f32 %v3808_v22  ;;  %v2947_v58 = vadd.f32 1.0, %v4542_v28  ;;  %v7237_v25 = vmul.f32 %v7134_v17, %v8012_v0  ;;  %v7241_v26 = vmul.f32 %v7141_v16, %v8013_v30 }
 0x2cf   :  { %v4558_v37 = vpop.eup %4557  ;;  %4583 = vpow2.f32 %v3809_v7  ;;  %v2948_v4 = vadd.f32 1.0, %v4544_v55  ;;  %v2106_v12 = vsel %vm2060_vm5, %v2105_v48, %v2104_v61  ;;  %v2133_v6 = vrot.slane %v7225_v43, 5  ;;  %v8015_v55 = vld [vmem:[#allocation14_spill] sm:$0xff]  ;;  %v8016_v61 = vld [vmem:[#allocation23_spill] sm:$0xff] }
 0x2d0   :  { %v4560_v2 = vpop.eup %4559  ;;  %v2949_v53 = vadd.f32 1.0, %v4546_v52  ;;  %4585 = vrcp.f32 %v2945_v60  ;;  %v2107_v28 = vrot.slane %v7230_v36, 4  ;;  %v2120_v41 = vsel %vm2060_vm5, %v2119_v34, %v2118_v19 }
 0x2d1   :  { %v4562_v24 = vpop.eup %4561  ;;  %v2950_v17 = vadd.f32 1.0, %v4548_v18  ;;  %4587 = vrcp.f32 %v2946_v49  ;;  %v7249_v16 = vmul.f32 %v7148_v47, %v8014_v3  ;;  %v7253_v56 = vmul.f32 %v7165_v27, %v8015_v55  ;;  %v8017_v49 = vld [vmem:[#allocation27_spill] sm:$0xff] }
 0x2d2   :  { %v4564_v59 = vpop.eup %4563  ;;  %v2951_v15 = vadd.f32 1.0, %v4550_v21  ;;  %4589 = vrcp.f32 %v2947_v58  ;;  %v2121_v50 = vrot.slane %v7237_v25, 4  ;;  %v2135_v33 = vrot.slane %v7241_v26, 4 }
 0x2d3   :  { %v4566_v52 = vpop.eup %4565  ;;  %v2952_v22 = vadd.f32 1.0, %v4552_v23  ;;  %4591 = vrcp.f32 %v2948_v4  ;;  %v7259_v57 = vmul.f32 %v7155_v5, %v8016_v61  ;;  %v2134_v47 = vsel %vm2060_vm5, %v2133_v6, %v2132_v1 }
 0x2d4   :  { %v4568_v18 = vpop.eup %4567  ;;  %v2953_v7 = vadd.f32 1.0, %v4554_v44  ;;  %4593 = vrcp.f32 %v2949_v53  ;;  %v7264_v21 = vmul.f32 %v7191_v51, %v7012_v13  ;;  %v2108_v48 = vsel %vm2063_vm6, %v2107_v28, %v2106_v12 }
 0x2d5   :  { %v3740_v27 = vpop.xlane.xlu1 %3739  ;;  %v4570_v14 = vpop.eup %4569  ;;  %v2954_v60 = vadd.f32 1.0, %v4556_v35  ;;  %4595 = vrcp.f32 %v2950_v17  ;;  %v2109_v45 = vrot.slane %v7249_v16, 3  ;;  %v2137_v5 = vrot.slane %v7253_v56, 3  ;;  %v8018_v35 = vld [vmem:[#allocation18_spill] sm:$0xff] }
 0x2d6   :  { %3744 = vst [vmem:[#allocation5 + $0x18] sm:$0xff] %v3740_v27  ;;  %v4572_v23 = vpop.eup %4571  ;;  %v2955_v34 = vadd.f32 1.0, %v4558_v37  ;;  %4597 = vrcp.f32 %v2951_v15  ;;  %v7271_v19 = vmul.f32 %v7173_v42, %v8017_v49  ;;  %v2136_v13 = vsel %vm2063_vm6, %v2135_v33, %v2134_v47 }
 0x2d7   :  { %v4574_v44 = vpop.eup %4573  ;;  %v2956_v51 = vadd.f32 1.0, %v4560_v2  ;;  %4599 = vrcp.f32 %v2952_v22  ;;  %v7276_v58 = vmul.f32 %v7181_v31, %v8018_v35  ;;  %v2123_v0 = vrot.slane %v7259_v57, 3 }
 0x2d8   :  { %v4576_v1 = vpop.eup %4575  ;;  %v2957_v30 = vadd.f32 1.0, %v4562_v24  ;;  %4601 = vrcp.f32 %v2953_v7  ;;  %v2122_v4 = vsel %vm2063_vm6, %v2121_v50, %v2120_v41  ;;  %v2139_v12 = vrot.slane %v7264_v21, 2 }
 0x2d9   :  { %v4578_v37 = vpop.eup %4577  ;;  %v2958_v42 = vadd.f32 1.0, %v4564_v59  ;;  %4603 = vrcp.f32 %v2954_v60  ;;  %v2138_v2 = vsel %vm2066_vm7, %v2137_v5, %v2136_v13  ;;  %v2959_v53 = vadd.f32 1.0, %v4566_v52 }
 0x2da   :  { %v4580_v6 = vpop.eup %4579  ;;  %4605 = vrcp.f32 %v2955_v34  ;;  %v7283_v31 = vsel %vm2066_vm7, %v2109_v45, %v2108_v48  ;;  %v2111_v17 = vrot.slane %v7271_v19, 2  ;;  %v2960_v24 = vadd.f32 1.0, %v4568_v18 }
 0x2db   :  { %v4582_v28 = vpop.eup %4581  ;;  %4607 = vrcp.f32 %v2956_v51  ;;  %v7287_v41 = vsel %vm2066_vm7, %v2123_v0, %v2122_v4  ;;  %v2125_v59 = vrot.slane %v7276_v58, 2  ;;  %v2961_v55 = vadd.f32 1.0, %v4570_v14 }
 0x2dc   :  { %v4584_v3 = vpop.eup %4583  ;;  %4609 = vrcp.f32 %v2957_v30  ;;  %v7291_v52 = vsel %vm2069_vm8, %v2139_v12, %v2138_v2  ;;  %v2962_v50 = vadd.f32 1.0, %v4572_v23  ;;  %v3551_v33 = vrot.slane %v7101_v38, 2 }
 0x2dd   :  { %v4586_v15 = vpop.eup %4585  ;;  %4611 = vrcp.f32 %v2958_v42  ;;  %v2963_v61 = vadd.f32 1.0, %v4574_v44  ;;  %v3552_v18 = vrot.slane %v7138_v40, 1  ;;  %v3565_v47 = vrot.slane %v7112_v32, 2 }
 0x2de   :  { %v4588_v22 = vpop.eup %4587  ;;  %4613 = vrcp.f32 %v2959_v53  ;;  %v2964_v27 = vadd.f32 1.0, %v4576_v1  ;;  %v3347_v14 = vrot.slane %v4586_v15, 5  ;;  %v3566_v48 = vrot.slane %v7145_v46, 1 }
 0x2df   :  { %v4590_v7 = vpop.eup %4589  ;;  %4615 = vrcp.f32 %v2960_v24  ;;  %v2965_v45 = vadd.f32 1.0, %v4578_v37  ;;  %v3361_v23 = vrot.slane %v4588_v22, 5  ;;  %v3579_v5 = vrot.slane %v7121_v11, 2 }
 0x2e0   :  { %v4592_v60 = vpop.eup %4591  ;;  %4617 = vrcp.f32 %v2961_v55  ;;  %v2966_v34 = vadd.f32 1.0, %v4580_v6  ;;  %v3375_v49 = vrot.slane %v4590_v7, 5  ;;  %v2967_v13 = vadd.f32 1.0, %v4582_v28 }
 0x2e1   :  { %v4594_v38 = vpop.eup %4593  ;;  %4619 = vrcp.f32 %v2962_v50  ;;  %v3348_v44 = vrot.slane %v4592_v60, 4  ;;  %v3580_v51 = vrot.slane %v7152_v39, 1  ;;  %v2968_v35 = vadd.f32 1.0, %v4584_v3 }
 0x2e2   :  { %v4596_v40 = vpop.eup %4595  ;;  %4621 = vrcp.f32 %v2963_v61  ;;  %v3362_v32 = vrot.slane %v4594_v38, 4  ;;  %v3555_v4 = vrot.slane %v7185_v29, 7  ;;  %v3553_v39 = vsel %vm2051_vm2, %v3552_v18, %v3551_v33 }
 0x2e3   :  { %v4598_v1 = vpop.eup %4597  ;;  %4623 = vrcp.f32 %v2964_v27  ;;  %v3349_v46 = vsel %vm2051_vm2, %v3348_v44, %v3347_v14  ;;  %v3376_v0 = vrot.slane %v4596_v40, 4  ;;  %v3567_v24 = vsel %vm2051_vm2, %v3566_v48, %v3565_v47 }
 0x2e4   :  { %v4600_v30 = vpop.eup %4599  ;;  %4625 = vrcp.f32 %v2965_v45  ;;  %v3350_v11 = vrot.slane %v4598_v1, 3  ;;  %v3363_v37 = vsel %vm2051_vm2, %v3362_v32, %v3361_v23  ;;  %v3581_v29 = vsel %vm2051_vm2, %v3580_v51, %v3579_v5 }
 0x2e5   :  { %v4602_v12 = vpop.eup %4601  ;;  %4627 = vrcp.f32 %v2966_v34  ;;  %v3364_v42 = vrot.slane %v4600_v30, 3  ;;  %v3377_v6 = vsel %vm2051_vm2, %v3376_v0, %v3375_v49  ;;  %v3554_v33 = vsel %vm2054_vm3, %v7159_v20, %v3553_v39 }
 0x2e6   :  { %v4604_v2 = vpop.eup %4603  ;;  %4629 = vrcp.f32 %v2967_v13  ;;  %v3351_v53 = vsel %vm2054_vm3, %v3350_v11, %v3349_v46  ;;  %v3378_v28 = vrot.slane %v4602_v12, 3  ;;  %v3569_v18 = vrot.slane %v7199_v8, 7 }
 0x2e7   :  { %v4606_v3 = vpop.eup %4605  ;;  %4631 = vrcp.f32 %v2968_v35  ;;  %v3352_v55 = vrot.slane %v4604_v2, 2  ;;  %v3365_v15 = vsel %vm2054_vm3, %v3364_v42, %v3363_v37  ;;  %v3568_v14 = vsel %vm2054_vm3, %v7163_v9, %v3567_v24 }
 0x2e8   :  { %v4608_v50 = vpop.eup %4607  ;;  %v3366_v22 = vrot.slane %v4606_v3, 2  ;;  %v3379_v61 = vsel %vm2054_vm3, %v3378_v28, %v3377_v6  ;;  %v3583_v48 = vrot.slane %v7205_v63, 7  ;;  %v3557_v5 = vrot.slane %v7211_v62, 6 }
 0x2e9   :  { %v4610_v7 = vpop.eup %4609  ;;  %v3353_v27 = vsel %vm2057_vm4, %v3352_v55, %v3351_v53  ;;  %v3380_v47 = vrot.slane %v4608_v50, 2  ;;  %v3582_v20 = vsel %vm2054_vm3, %v7168_v10, %v3581_v29  ;;  %v3556_v44 = vsel %vm2057_vm4, %v3555_v4, %v3554_v33 }
 0x2ea   :  { %v4612_v60 = vpop.eup %4611  ;;  %v3354_v45 = vrot.slane %v4610_v7, 1  ;;  %v3367_v23 = vsel %vm2057_vm4, %v3366_v22, %v3365_v15  ;;  %v3571_v49 = vrot.slane %v7216_v54, 6  ;;  %v3570_v13 = vsel %vm2057_vm4, %v3569_v18, %v3568_v14 }
 0x2eb   :  { %v4614_v38 = vpop.eup %4613  ;;  %v3368_v8 = vrot.slane %v4612_v60, 1  ;;  %v3381_v34 = vsel %vm2057_vm4, %v3380_v47, %v3379_v61  ;;  %v3585_v32 = vrot.slane %v7225_v43, 6  ;;  %v2112_v10 = vsel %vm2069_vm8, %v2111_v17, %v7283_v31  ;;  %v8019_v31 = vld [vmem:[#allocation11_spill] sm:$0xff] }
 0x2ec   :  { %v4616_v9 = vpop.eup %4615  ;;  %v3355_v63 = vsel %vm2060_vm5, %v3354_v45, %v3353_v27  ;;  %v3382_v40 = vrot.slane %v4614_v38, 1  ;;  %v3559_v1 = vrot.slane %v7230_v36, 5  ;;  %v3584_v54 = vsel %vm2057_vm4, %v3583_v48, %v3582_v20 }
 0x2ed   :  { %v4618_v62 = vpop.eup %4617  ;;  %v3369_v51 = vsel %vm2060_vm5, %v3368_v8, %v3367_v23  ;;  %v2126_v46 = vsel %vm2069_vm8, %v2125_v59, %v7287_v41  ;;  %v3558_v0 = vsel %vm2060_vm5, %v3557_v5, %v3556_v44  ;;  %v3573_v30 = vrot.slane %v7237_v25, 5 }
 0x2ee   :  { %v4620_v35 = vpop.eup %4619  ;;  %v3383_v43 = vsel %vm2060_vm5, %v3382_v40, %v3381_v34  ;;  %v2242_v17 = vmul.f32 %v7291_v52, %v8019_v31  ;;  %v3356_v36 = vsel %vm2063_vm6, %v4616_v9, %v3355_v63  ;;  %v3572_v37 = vsel %vm2060_vm5, %v3571_v49, %v3570_v13 }
 0x2ef   :  { %v4622_v11 = vpop.eup %4621  ;;  %v3587_v4 = vrot.slane %v7241_v26, 5  ;;  %v3370_v41 = vsel %vm2063_vm6, %v4618_v62, %v3369_v51  ;;  %v3561_v59 = vrot.slane %v7249_v16, 4  ;;  %v3586_v6 = vsel %vm2060_vm5, %v3585_v32, %v3584_v54 }
 0x2f0   :  { %v4624_v12 = vpop.eup %4623  ;;  %v3357_v42 = vrot.slane %v4622_v11, 7  ;;  %v3384_v2 = vsel %vm2063_vm6, %v4620_v35, %v3383_v43  ;;  %v3560_v52 = vsel %vm2063_vm6, %v3559_v1, %v3558_v0  ;;  %v3575_v53 = vrot.slane %v7259_v57, 4 }
 0x2f1   :  { %v4626_v39 = vpop.eup %4625  ;;  %v3371_v25 = vrot.slane %v4624_v12, 7  ;;  %v3574_v3 = vsel %vm2063_vm6, %v3573_v30, %v3572_v37  ;;  %v3589_v55 = vrot.slane %v7253_v56, 4  ;;  %v3563_v50 = vrot.slane %v7271_v19, 3 }
 0x2f2   :  { %v4628_v28 = vpop.eup %4627  ;;  %v3358_v24 = vsel %vm2066_vm7, %v3357_v42, %v3356_v36  ;;  %v3385_v26 = vrot.slane %v4626_v39, 7  ;;  %v3588_v22 = vsel %vm2063_vm6, %v3587_v4, %v3586_v6  ;;  %v3562_v18 = vsel %vm2066_vm7, %v3561_v59, %v3560_v52 }
 0x2f3   :  { %v4630_v15 = vpop.eup %4629  ;;  %v3359_v16 = vrot.slane %v4628_v28, 6  ;;  %v3372_v29 = vsel %vm2066_vm7, %v3371_v25, %v3370_v41  ;;  %v3577_v7 = vrot.slane %v7276_v58, 3  ;;  %v3576_v56 = vsel %vm2066_vm7, %v3575_v53, %v3574_v3 }
 0x2f4   :  { %v4632_v61 = vpop.eup %4631  ;;  %v3373_v33 = vrot.slane %v4630_v15, 6  ;;  %v3386_v57 = vsel %vm2066_vm7, %v3385_v26, %v3384_v2  ;;  %v3591_v14 = vrot.slane %v7264_v21, 3  ;;  %v3590_v60 = vsel %vm2066_vm7, %v3589_v55, %v3588_v22 }
 0x2f5   :  { %v3360_v27 = vsel %vm2069_vm8, %v3359_v16, %v3358_v24  ;;  %v3387_v47 = vrot.slane %v4632_v61, 6  ;;  %v3564_v5 = vsel %vm2069_vm8, %v3563_v50, %v3562_v18  ;;  %v3578_v58 = vsel %vm2069_vm8, %v3577_v7, %v3576_v56 }
 0x2f6   :  { %v3374_v48 = vsel %vm2069_vm8, %v3373_v33, %v3372_v29  ;;  %v3488_v19 = vmul.f32 %v3360_v27, %v2112_v10  ;;  %v3592_v34 = vsel %vm2069_vm8, %v3591_v14, %v3590_v60 }
 0x2f7   :  { %v3388_v45 = vsel %vm2069_vm8, %v3387_v47, %v3386_v57  ;;  %v3489_v23 = vmul.f32 %v3374_v48, %v2126_v46 }
 0x2f8   :  { %v3490_v20 = vmul.f32 %v3388_v45, %v2242_v17  ;;  %v3500_v38 = vmin.f32 %v3488_v19, 1.0 }
 0x2f9   :  { %v3501_v8 = vmin.f32 %v3489_v23, 1.0 }
 0x2fa   :  { %v3502_v44 = vmin.f32 %v3490_v20, %v8019_v31  ;;  %v3692_v21 = vmul.f32 %v3564_v5, %v3500_v38 }
 0x2fb   :  { %v3693_v49 = vmul.f32 %v3578_v58, %v3501_v8 }
 0x2fc   :  { %v3694_v9 = vmul.f32 %v3592_v34, %v3502_v44  ;;  %v3704_v63 = vmax.f32 %v3692_v21, %v3488_v19 }
 0x2fd   :  { %v3705_v40 = vmax.f32 %v3693_v49, %v3489_v23 }
 0x2fe   :  { %v3706_v13 = vmax.f32 %v3694_v9, %v3490_v20  ;;  %v3716_v32 = vmin.f32 %v3704_v63, %v3500_v38 }
 0x2ff   :  { %v3717_v62 = vmin.f32 %v3705_v40, %v3501_v8 }
 0x300   :  { %v3718_v10 = vmin.f32 %v3706_v13, %v3502_v44 }
 0x301   :  { %v3729_v51 = vadd.f32 %v3717_v62, %v3716_v32 }
 0x303   :  { %v3730_v1 = vadd.f32 %v3729_v51, %v3718_v10 }
 0x305   :  { %3731 = vadd.xlane.f32.xlu0 %v3730_v1 }
 0x38e   :  { %v3732_v54 = vpop.xlane.xlu0 %3731 }
 0x38f   :  { %3742 = vst [vmem:[#allocation5 + $0x8] sm:$0xff] %v3732_v54 }
 0x390   :  { %4686 = shalt.err (!%p4683_p9)
}
 0x391   :  { %s4704_s15 = smov 128   ;;  %s4705_s16 = smov 8  }
 0x392   :  { %3756 = dma.vmem_to_hbm [thread:$0]  %s3751_s13, 512, %s7374_s1, [#allocation4], %s4704_s15, %s4704_s15, %s4705_s16  }
 0x393   :  { %4697 = dma.done.wait [#allocation4], 512  }
 0x394   :  { %4698 = vsyncadd [#allocation4], 4294966784 }
 0x395   :  { %3760 = vsyncpa [#allocation3], 1 }
 0x396   :  { %3761 = vsyncpa [#allocation4], 1 }

</bundles_post_ra>
